<compile_context>
chip_gen: v6e
topology: v6e:2x2x1
jax: 0.10.0
libtpu: 0.0.40
codegen_flags: <defaults>
</compile_context>

<pallas_src>
import jax
import jax.numpy as jnp
from jax.experimental import pallas as pl
from jax.experimental.pallas import tpu as pltpu


def gnn_layer_kernel(xd_ref, we1_ref, we2_ref, wn1_ref, wn2_ref,
                     be_ref, bn_ref, o_ref, wcomb_scr, wn2bd_scr):
    """One grid step processes TM (batch, seq) slabs of N nodes each.

    xd_ref   : (TM, N*fp)       node-major x, fp = f padded to a sublane mult.
    we*_ref  : (fp, out)        dense edge / node input-side weights
    wn2_ref  : (out, out)       dense node edge-sum-side weight
    be_ref   : (1, N*out)       edge bias tiled over the N lane groups
    bn_ref   : (1, N*out)       node bias tiled over the N lane groups
    o_ref    : (TM, N*out)      lane-dense output slab
    wcomb_scr: (N*fp, 3*N*out)  scratch: blockdiag [We1 | We2 | Wn1]
    wn2bd_scr: (N*out, N*out)   scratch: blockdiag Wn2
    """
    tm, n_out = o_ref.shape
    fp = we1_ref.shape[0]
    out = we1_ref.shape[1]
    n = n_out // out

    # ---- Build block-diagonal weights in VMEM (no inflated HBM traffic). ----
    wcomb_scr[...] = jnp.zeros_like(wcomb_scr)
    wn2bd_scr[...] = jnp.zeros_like(wn2bd_scr)
    for i in range(n):                       # static unroll, n is small
        r0 = i * fp
        c0 = i * out
        wcomb_scr[pl.ds(r0, fp), pl.ds(c0, out)] = we1_ref[...]
        wcomb_scr[pl.ds(r0, fp), pl.ds(n_out + c0, out)] = we2_ref[...]
        wcomb_scr[pl.ds(r0, fp), pl.ds(2 * n_out + c0, out)] = wn1_ref[...]
        wn2bd_scr[pl.ds(c0, out), pl.ds(c0, out)] = wn2_ref[...]

    # ---- Fused projections: one MXU pass, node-major along the lane axis. ----
    #   proj[:, :n_out]          a[m, i*out+c]    = x[m,i] @ We1
    #   proj[:, n_out:2n_out]    b[m, j*out+c]    = x[m,j] @ We2
    #   proj[:, 2n_out:]         xwn1[m, i*out+c] = x[m,i] @ Wn1
    proj = jnp.dot(xd_ref[...], wcomb_scr[...],
                   preferred_element_type=jnp.float32)        # (TM, 3*N*out)
    a = proj[:, :n_out] + be_ref[...]      # edge bias folded once
    b = proj[:, n_out:2 * n_out]
    xwn1 = proj[:, 2 * n_out:]

    # ---- Pairwise edge sum: sum_j relu(a_i + b_j) via lane-group rolls. ----
    # roll(b, d*out) aligns lane group (i-d) mod N of b under group i of a;
    # summing d = 0..N-1 covers every j exactly once.  No (TM, N, N*out)
    # intermediate, no cross-sublane reduction.
    edge_sum = jnp.maximum(a + b, 0.0)                        # d = 0 term
    for d in range(1, n):                                     # static unroll
        b_d = pltpu.roll(b, shift=d * out, axis=1)
        edge_sum = edge_sum + jnp.maximum(a + b_d, 0.0)

    # ---- Node MLP: relu(x @ Wn1 + edge_sum @ Wn2 + bn), node-major lanes. ----
    node = (xwn1
            + jnp.dot(edge_sum, wn2bd_scr[...],
                      preferred_element_type=jnp.float32)
            + bn_ref[...])
    o_ref[...] = jnp.maximum(node, 0.0)   # lane-dense unmasked store


def gnn_layer(x, we, be, wn, bn):
    """x: (bs, L, N, f); we: (out, 2f); be: (out,); wn: (out, f+out); bn: (out,)."""
    bs, L, N, f = x.shape
    out_dim = we.shape[0]
    M = bs * L
    n_out = N * out_dim
    f_pad = ((f + 7) // 8) * 8            # sublane-align each node's block

    # TM policy (rows per grid step): single step for small M; 128/256-row
    # steps for large M (>=2 "parallel" steps for v7x, >=128-row MXU LHS).
    if M >= 512:
        tm = 256
    elif M >= 256:
        tm = 128
    else:
        tm = M
    M_pad = ((M + tm - 1) // tm) * tm     # pad instead of shrinking tm

    # Node-major x slab with per-node features zero-padded to f_pad lanes.
    xf = x.astype(jnp.float32)
    xf = jnp.pad(xf, ((0, 0), (0, 0), (0, 0), (0, f_pad - f)))
    xf = xf.reshape(M, N * f_pad)
    if M_pad != M:
        xf = jnp.pad(xf, ((0, M_pad - M), (0, 0)))

    # nn.Linear splits:
    #   concat([x_i, x_j]) @ we.T + be == x_i @ we1 + x_j @ we2 + be
    #   concat([x, e_sum]) @ wn.T + bn == x  @ wn1 + e_sum @ wn2 + bn
    we1 = jnp.pad(we[:, :f].T.astype(jnp.float32), ((0, f_pad - f), (0, 0)))
    we2 = jnp.pad(we[:, f:].T.astype(jnp.float32), ((0, f_pad - f), (0, 0)))
    wn1 = jnp.pad(wn[:, :f].T.astype(jnp.float32), ((0, f_pad - f), (0, 0)))
    wn2 = wn[:, f:].T.astype(jnp.float32)                      # (out, out)
    be_t = jnp.tile(be.astype(jnp.float32), N).reshape(1, n_out)
    bn_t = jnp.tile(bn.astype(jnp.float32), N).reshape(1, n_out)

    out_flat = pl.pallas_call(
        gnn_layer_kernel,
        out_shape=jax.ShapeDtypeStruct((M_pad, n_out), jnp.float32),
        grid_spec=pltpu.PrefetchScalarGridSpec(
            num_scalar_prefetch=0,
            grid=(M_pad // tm,),
            in_specs=[
                pl.BlockSpec((tm, N * f_pad), lambda m: (m, 0)),     # x slab
                pl.BlockSpec((f_pad, out_dim), lambda m: (0, 0)),    # we1
                pl.BlockSpec((f_pad, out_dim), lambda m: (0, 0)),    # we2
                pl.BlockSpec((f_pad, out_dim), lambda m: (0, 0)),    # wn1
                pl.BlockSpec((out_dim, out_dim), lambda m: (0, 0)),  # wn2
                pl.BlockSpec((1, n_out), lambda m: (0, 0)),          # be tiled
                pl.BlockSpec((1, n_out), lambda m: (0, 0)),          # bn tiled
            ],
            out_specs=pl.BlockSpec((tm, n_out), lambda m: (m, 0)),
            scratch_shapes=[
                pltpu.VMEM((N * f_pad, 3 * n_out), jnp.float32),  # [We1|We2|Wn1] bd
                pltpu.VMEM((n_out, n_out), jnp.float32),          # Wn2 blockdiag
            ],
        ),
        compiler_params=pltpu.CompilerParams(
            dimension_semantics=("parallel",)),
    )(xf, we1, we2, wn1, wn2, be_t, bn_t)

    return out_flat[:M].reshape(bs, L, N, out_dim)


def gnn_layer_ref(x, we, be, wn, bn):
    """Pure-JAX reference mirroring the PyTorch forward."""
    bs, L, N, f = x.shape
    x_i = jnp.broadcast_to(x[:, :, :, None, :], (bs, L, N, N, f))
    x_j = jnp.broadcast_to(x[:, :, None, :, :], (bs, L, N, N, f))
    edge_in = jnp.concatenate([x_i, x_j], axis=-1)
    edge = jax.nn.relu(edge_in @ we.T + be)
    edge_sum = edge.sum(axis=3)
    node_in = jnp.concatenate([x, edge_sum], axis=-1)
    return jax.nn.relu(node_in @ wn.T + bn)


if __name__ == "__main__":
    # Small shapes consistent with the module's forward: x is (bs, L, N, f).
    bs, L, N, input_dim, output_dim = 2, 8, 16, 4, 32

    key = jax.random.PRNGKey(0)
    kx, kwe, kbe, kwn, kbn = jax.random.split(key, 5)

    x = jax.random.normal(kx, (bs, L, N, input_dim), dtype=jnp.float32)

    # Deterministic parameter init (shapes match nn.Linear in __init__).
    we = jax.random.normal(kwe, (output_dim, 2 * input_dim), jnp.float32) * 0.1
    be = jax.random.normal(kbe, (output_dim,), jnp.float32) * 0.1
    wn = jax.random.normal(kwn, (output_dim, input_dim + output_dim), jnp.float32) * 0.1
    bn = jax.random.normal(kbn, (output_dim,), jnp.float32) * 0.1

    out = gnn_layer(x, we, be, wn, bn)
    out = jax.block_until_ready(out)

    ref = gnn_layer_ref(x, we, be, wn, bn)
    assert out.shape == (bs, L, N, output_dim)
    assert jnp.allclose(out, ref, atol=1e-4, rtol=1e-4), \
        float(jnp.max(jnp.abs(out - ref)))

    print("KERNEL_OK")
</pallas_src>

<mosaic_0001>
module attributes {stable_mosaic.version = 11 : i64} {
  func.func @gnn_layer_kernel(%arg0: i32, %arg1: memref<16x128xf32, #tpu.memory_space<vmem>>, %arg2: memref<8x32xf32, #tpu.memory_space<vmem>>, %arg3: memref<8x32xf32, #tpu.memory_space<vmem>>, %arg4: memref<8x32xf32, #tpu.memory_space<vmem>>, %arg5: memref<32x32xf32, #tpu.memory_space<vmem>>, %arg6: memref<1x512xf32, #tpu.memory_space<vmem>>, %arg7: memref<1x512xf32, #tpu.memory_space<vmem>>, %arg8: memref<16x512xf32, #tpu.memory_space<vmem>>, %arg9: memref<128x1536xf32, #tpu.memory_space<vmem>>, %arg10: memref<512x512xf32, #tpu.memory_space<vmem>>) attributes {dimension_semantics = [#tpu.dimension_semantics<parallel>], iteration_bounds = array<i64: 1>, scalar_prefetch = 0 : i64, scratch_operands = 2 : i64, tpu.core_type = #tpu.core_type<tc>, window_params = [{transform_indices = @transform_0, window_bounds = array<i64: 16, 128>}, {pipeline_mode = #tpu.pipeline_mode<synchronous>, transform_indices = @transform_1, window_bounds = array<i64: 8, 32>}, {pipeline_mode = #tpu.pipeline_mode<synchronous>, transform_indices = @transform_2, window_bounds = array<i64: 8, 32>}, {pipeline_mode = #tpu.pipeline_mode<synchronous>, transform_indices = @transform_3, window_bounds = array<i64: 8, 32>}, {pipeline_mode = #tpu.pipeline_mode<synchronous>, transform_indices = @transform_4, window_bounds = array<i64: 32, 32>}, {pipeline_mode = #tpu.pipeline_mode<synchronous>, transform_indices = @transform_5, window_bounds = array<i64: 1, 512>}, {pipeline_mode = #tpu.pipeline_mode<synchronous>, transform_indices = @transform_6, window_bounds = array<i64: 1, 512>}, {transform_indices = @transform_7, window_bounds = array<i64: 16, 512>}]} {
    %cst = arith.constant 0.000000e+00 : f32
    %0 = vector.broadcast %cst : f32 to vector<128x1536xf32>
    %c0 = arith.constant 0 : index
    %c0_0 = arith.constant 0 : index
    %1 = vector.load %arg9[%c0, %c0_0] : memref<128x1536xf32, #tpu.memory_space<vmem>>, vector<128x1536xf32>
    tpu.vector_store %arg9[%c0, %c0_0], %0 {strides = array<i32>} : memref<128x1536xf32, #tpu.memory_space<vmem>>, vector<128x1536xf32>,
    %cst_1 = arith.constant 0.000000e+00 : f32
    %2 = vector.broadcast %cst_1 : f32 to vector<512x512xf32>
    %c0_2 = arith.constant 0 : index
    %c0_3 = arith.constant 0 : index
    %3 = vector.load %arg10[%c0_2, %c0_3] : memref<512x512xf32, #tpu.memory_space<vmem>>, vector<512x512xf32>
    tpu.vector_store %arg10[%c0_2, %c0_3], %2 {strides = array<i32>} : memref<512x512xf32, #tpu.memory_space<vmem>>, vector<512x512xf32>,
    %c0_4 = arith.constant 0 : index
    %c0_5 = arith.constant 0 : index
    %4 = vector.load %arg2[%c0_4, %c0_5] : memref<8x32xf32, #tpu.memory_space<vmem>>, vector<8x32xf32>
    %c0_6 = arith.constant 0 : index
    %c0_7 = arith.constant 0 : index
    %5 = vector.load %arg9[%c0_6, %c0_7] : memref<128x1536xf32, #tpu.memory_space<vmem>>, vector<8x32xf32>
    tpu.vector_store %arg9[%c0_6, %c0_7], %4 {strides = array<i32>} : memref<128x1536xf32, #tpu.memory_space<vmem>>, vector<8x32xf32>,
    %c0_8 = arith.constant 0 : index
    %c0_9 = arith.constant 0 : index
    %6 = vector.load %arg3[%c0_8, %c0_9] : memref<8x32xf32, #tpu.memory_space<vmem>>, vector<8x32xf32>
    %c0_10 = arith.constant 0 : index
    %c512 = arith.constant 512 : index
    %7 = vector.load %arg9[%c0_10, %c512] : memref<128x1536xf32, #tpu.memory_space<vmem>>, vector<8x32xf32>
    tpu.vector_store %arg9[%c0_10, %c512], %6 {strides = array<i32>} : memref<128x1536xf32, #tpu.memory_space<vmem>>, vector<8x32xf32>,
    %c0_11 = arith.constant 0 : index
    %c0_12 = arith.constant 0 : index
    %8 = vector.load %arg4[%c0_11, %c0_12] : memref<8x32xf32, #tpu.memory_space<vmem>>, vector<8x32xf32>
    %c0_13 = arith.constant 0 : index
    %c1024 = arith.constant 1024 : index
    %9 = vector.load %arg9[%c0_13, %c1024] : memref<128x1536xf32, #tpu.memory_space<vmem>>, vector<8x32xf32>
    tpu.vector_store %arg9[%c0_13, %c1024], %8 {strides = array<i32>} : memref<128x1536xf32, #tpu.memory_space<vmem>>, vector<8x32xf32>,
    %c0_14 = arith.constant 0 : index
    %c0_15 = arith.constant 0 : index
    %10 = vector.load %arg5[%c0_14, %c0_15] : memref<32x32xf32, #tpu.memory_space<vmem>>, vector<32x32xf32>
    %c0_16 = arith.constant 0 : index
    %c0_17 = arith.constant 0 : index
    %11 = vector.load %arg10[%c0_16, %c0_17] : memref<512x512xf32, #tpu.memory_space<vmem>>, vector<32x32xf32>
    tpu.vector_store %arg10[%c0_16, %c0_17], %10 {strides = array<i32>} : memref<512x512xf32, #tpu.memory_space<vmem>>, vector<32x32xf32>,
    %c0_18 = arith.constant 0 : index
    %c0_19 = arith.constant 0 : index
    %12 = vector.load %arg2[%c0_18, %c0_19] : memref<8x32xf32, #tpu.memory_space<vmem>>, vector<8x32xf32>
    %c8 = arith.constant 8 : index
    %c32 = arith.constant 32 : index
    %13 = vector.load %arg9[%c8, %c32] : memref<128x1536xf32, #tpu.memory_space<vmem>>, vector<8x32xf32>
    tpu.vector_store %arg9[%c8, %c32], %12 {strides = array<i32>} : memref<128x1536xf32, #tpu.memory_space<vmem>>, vector<8x32xf32>,
    %c0_20 = arith.constant 0 : index
    %c0_21 = arith.constant 0 : index
    %14 = vector.load %arg3[%c0_20, %c0_21] : memref<8x32xf32, #tpu.memory_space<vmem>>, vector<8x32xf32>
    %c8_22 = arith.constant 8 : index
    %c544 = arith.constant 544 : index
    %15 = vector.load %arg9[%c8_22, %c544] : memref<128x1536xf32, #tpu.memory_space<vmem>>, vector<8x32xf32>
    tpu.vector_store %arg9[%c8_22, %c544], %14 {strides = array<i32>} : memref<128x1536xf32, #tpu.memory_space<vmem>>, vector<8x32xf32>,
    %c0_23 = arith.constant 0 : index
    %c0_24 = arith.constant 0 : index
    %16 = vector.load %arg4[%c0_23, %c0_24] : memref<8x32xf32, #tpu.memory_space<vmem>>, vector<8x32xf32>
    %c8_25 = arith.constant 8 : index
    %c1056 = arith.constant 1056 : index
    %17 = vector.load %arg9[%c8_25, %c1056] : memref<128x1536xf32, #tpu.memory_space<vmem>>, vector<8x32xf32>
    tpu.vector_store %arg9[%c8_25, %c1056], %16 {strides = array<i32>} : memref<128x1536xf32, #tpu.memory_space<vmem>>, vector<8x32xf32>,
    %c0_26 = arith.constant 0 : index
    %c0_27 = arith.constant 0 : index
    %18 = vector.load %arg5[%c0_26, %c0_27] : memref<32x32xf32, #tpu.memory_space<vmem>>, vector<32x32xf32>
    %c32_28 = arith.constant 32 : index
    %c32_29 = arith.constant 32 : index
    %19 = vector.load %arg10[%c32_28, %c32_29] : memref<512x512xf32, #tpu.memory_space<vmem>>, vector<32x32xf32>
    tpu.vector_store %arg10[%c32_28, %c32_29], %18 {strides = array<i32>} : memref<512x512xf32, #tpu.memory_space<vmem>>, vector<32x32xf32>,
    %c0_30 = arith.constant 0 : index
    %c0_31 = arith.constant 0 : index
    %20 = vector.load %arg2[%c0_30, %c0_31] : memref<8x32xf32, #tpu.memory_space<vmem>>, vector<8x32xf32>
    %c16 = arith.constant 16 : index
    %c64 = arith.constant 64 : index
    %21 = vector.load %arg9[%c16, %c64] : memref<128x1536xf32, #tpu.memory_space<vmem>>, vector<8x32xf32>
    tpu.vector_store %arg9[%c16, %c64], %20 {strides = array<i32>} : memref<128x1536xf32, #tpu.memory_space<vmem>>, vector<8x32xf32>,
    %c0_32 = arith.constant 0 : index
    %c0_33 = arith.constant 0 : index
    %22 = vector.load %arg3[%c0_32, %c0_33] : memref<8x32xf32, #tpu.memory_space<vmem>>, vector<8x32xf32>
    %c16_34 = arith.constant 16 : index
    %c576 = arith.constant 576 : index
    %23 = vector.load %arg9[%c16_34, %c576] : memref<128x1536xf32, #tpu.memory_space<vmem>>, vector<8x32xf32>
    tpu.vector_store %arg9[%c16_34, %c576], %22 {strides = array<i32>} : memref<128x1536xf32, #tpu.memory_space<vmem>>, vector<8x32xf32>,
    %c0_35 = arith.constant 0 : index
    %c0_36 = arith.constant 0 : index
    %24 = vector.load %arg4[%c0_35, %c0_36] : memref<8x32xf32, #tpu.memory_space<vmem>>, vector<8x32xf32>
    %c16_37 = arith.constant 16 : index
    %c1088 = arith.constant 1088 : index
    %25 = vector.load %arg9[%c16_37, %c1088] : memref<128x1536xf32, #tpu.memory_space<vmem>>, vector<8x32xf32>
    tpu.vector_store %arg9[%c16_37, %c1088], %24 {strides = array<i32>} : memref<128x1536xf32, #tpu.memory_space<vmem>>, vector<8x32xf32>,
    %c0_38 = arith.constant 0 : index
    %c0_39 = arith.constant 0 : index
    %26 = vector.load %arg5[%c0_38, %c0_39] : memref<32x32xf32, #tpu.memory_space<vmem>>, vector<32x32xf32>
    %c64_40 = arith.constant 64 : index
    %c64_41 = arith.constant 64 : index
    %27 = vector.load %arg10[%c64_40, %c64_41] : memref<512x512xf32, #tpu.memory_space<vmem>>, vector<32x32xf32>
    tpu.vector_store %arg10[%c64_40, %c64_41], %26 {strides = array<i32>} : memref<512x512xf32, #tpu.memory_space<vmem>>, vector<32x32xf32>,
    %c0_42 = arith.constant 0 : index
    %c0_43 = arith.constant 0 : index
    %28 = vector.load %arg2[%c0_42, %c0_43] : memref<8x32xf32, #tpu.memory_space<vmem>>, vector<8x32xf32>
    %c24 = arith.constant 24 : index
    %c96 = arith.constant 96 : index
    %29 = vector.load %arg9[%c24, %c96] : memref<128x1536xf32, #tpu.memory_space<vmem>>, vector<8x32xf32>
    tpu.vector_store %arg9[%c24, %c96], %28 {strides = array<i32>} : memref<128x1536xf32, #tpu.memory_space<vmem>>, vector<8x32xf32>,
    %c0_44 = arith.constant 0 : index
    %c0_45 = arith.constant 0 : index
    %30 = vector.load %arg3[%c0_44, %c0_45] : memref<8x32xf32, #tpu.memory_space<vmem>>, vector<8x32xf32>
    %c24_46 = arith.constant 24 : index
    %c608 = arith.constant 608 : index
    %31 = vector.load %arg9[%c24_46, %c608] : memref<128x1536xf32, #tpu.memory_space<vmem>>, vector<8x32xf32>
    tpu.vector_store %arg9[%c24_46, %c608], %30 {strides = array<i32>} : memref<128x1536xf32, #tpu.memory_space<vmem>>, vector<8x32xf32>,
    %c0_47 = arith.constant 0 : index
    %c0_48 = arith.constant 0 : index
    %32 = vector.load %arg4[%c0_47, %c0_48] : memref<8x32xf32, #tpu.memory_space<vmem>>, vector<8x32xf32>
    %c24_49 = arith.constant 24 : index
    %c1120 = arith.constant 1120 : index
    %33 = vector.load %arg9[%c24_49, %c1120] : memref<128x1536xf32, #tpu.memory_space<vmem>>, vector<8x32xf32>
    tpu.vector_store %arg9[%c24_49, %c1120], %32 {strides = array<i32>} : memref<128x1536xf32, #tpu.memory_space<vmem>>, vector<8x32xf32>,
    %c0_50 = arith.constant 0 : index
    %c0_51 = arith.constant 0 : index
    %34 = vector.load %arg5[%c0_50, %c0_51] : memref<32x32xf32, #tpu.memory_space<vmem>>, vector<32x32xf32>
    %c96_52 = arith.constant 96 : index
    %c96_53 = arith.constant 96 : index
    %35 = vector.load %arg10[%c96_52, %c96_53] : memref<512x512xf32, #tpu.memory_space<vmem>>, vector<32x32xf32>
    tpu.vector_store %arg10[%c96_52, %c96_53], %34 {strides = array<i32>} : memref<512x512xf32, #tpu.memory_space<vmem>>, vector<32x32xf32>,
    %c0_54 = arith.constant 0 : index
    %c0_55 = arith.constant 0 : index
    %36 = vector.load %arg2[%c0_54, %c0_55] : memref<8x32xf32, #tpu.memory_space<vmem>>, vector<8x32xf32>
    %c32_56 = arith.constant 32 : index
    %c128 = arith.constant 128 : index
    %37 = vector.load %arg9[%c32_56, %c128] : memref<128x1536xf32, #tpu.memory_space<vmem>>, vector<8x32xf32>
    tpu.vector_store %arg9[%c32_56, %c128], %36 {strides = array<i32>} : memref<128x1536xf32, #tpu.memory_space<vmem>>, vector<8x32xf32>,
    %c0_57 = arith.constant 0 : index
    %c0_58 = arith.constant 0 : index
    %38 = vector.load %arg3[%c0_57, %c0_58] : memref<8x32xf32, #tpu.memory_space<vmem>>, vector<8x32xf32>
    %c32_59 = arith.constant 32 : index
    %c640 = arith.constant 640 : index
    %39 = vector.load %arg9[%c32_59, %c640] : memref<128x1536xf32, #tpu.memory_space<vmem>>, vector<8x32xf32>
    tpu.vector_store %arg9[%c32_59, %c640], %38 {strides = array<i32>} : memref<128x1536xf32, #tpu.memory_space<vmem>>, vector<8x32xf32>,
    %c0_60 = arith.constant 0 : index
    %c0_61 = arith.constant 0 : index
    %40 = vector.load %arg4[%c0_60, %c0_61] : memref<8x32xf32, #tpu.memory_space<vmem>>, vector<8x32xf32>
    %c32_62 = arith.constant 32 : index
    %c1152 = arith.constant 1152 : index
    %41 = vector.load %arg9[%c32_62, %c1152] : memref<128x1536xf32, #tpu.memory_space<vmem>>, vector<8x32xf32>
    tpu.vector_store %arg9[%c32_62, %c1152], %40 {strides = array<i32>} : memref<128x1536xf32, #tpu.memory_space<vmem>>, vector<8x32xf32>,
    %c0_63 = arith.constant 0 : index
    %c0_64 = arith.constant 0 : index
    %42 = vector.load %arg5[%c0_63, %c0_64] : memref<32x32xf32, #tpu.memory_space<vmem>>, vector<32x32xf32>
    %c128_65 = arith.constant 128 : index
    %c128_66 = arith.constant 128 : index
    %43 = vector.load %arg10[%c128_65, %c128_66] : memref<512x512xf32, #tpu.memory_space<vmem>>, vector<32x32xf32>
    tpu.vector_store %arg10[%c128_65, %c128_66], %42 {strides = array<i32>} : memref<512x512xf32, #tpu.memory_space<vmem>>, vector<32x32xf32>,
    %c0_67 = arith.constant 0 : index
    %c0_68 = arith.constant 0 : index
    %44 = vector.load %arg2[%c0_67, %c0_68] : memref<8x32xf32, #tpu.memory_space<vmem>>, vector<8x32xf32>
    %c40 = arith.constant 40 : index
    %c160 = arith.constant 160 : index
    %45 = vector.load %arg9[%c40, %c160] : memref<128x1536xf32, #tpu.memory_space<vmem>>, vector<8x32xf32>
    tpu.vector_store %arg9[%c40, %c160], %44 {strides = array<i32>} : memref<128x1536xf32, #tpu.memory_space<vmem>>, vector<8x32xf32>,
    %c0_69 = arith.constant 0 : index
    %c0_70 = arith.constant 0 : index
    %46 = vector.load %arg3[%c0_69, %c0_70] : memref<8x32xf32, #tpu.memory_space<vmem>>, vector<8x32xf32>
    %c40_71 = arith.constant 40 : index
    %c672 = arith.constant 672 : index
    %47 = vector.load %arg9[%c40_71, %c672] : memref<128x1536xf32, #tpu.memory_space<vmem>>, vector<8x32xf32>
    tpu.vector_store %arg9[%c40_71, %c672], %46 {strides = array<i32>} : memref<128x1536xf32, #tpu.memory_space<vmem>>, vector<8x32xf32>,
    %c0_72 = arith.constant 0 : index
    %c0_73 = arith.constant 0 : index
    %48 = vector.load %arg4[%c0_72, %c0_73] : memref<8x32xf32, #tpu.memory_space<vmem>>, vector<8x32xf32>
    %c40_74 = arith.constant 40 : index
    %c1184 = arith.constant 1184 : index
    %49 = vector.load %arg9[%c40_74, %c1184] : memref<128x1536xf32, #tpu.memory_space<vmem>>, vector<8x32xf32>
    tpu.vector_store %arg9[%c40_74, %c1184], %48 {strides = array<i32>} : memref<128x1536xf32, #tpu.memory_space<vmem>>, vector<8x32xf32>,
    %c0_75 = arith.constant 0 : index
    %c0_76 = arith.constant 0 : index
    %50 = vector.load %arg5[%c0_75, %c0_76] : memref<32x32xf32, #tpu.memory_space<vmem>>, vector<32x32xf32>
    %c160_77 = arith.constant 160 : index
    %c160_78 = arith.constant 160 : index
    %51 = vector.load %arg10[%c160_77, %c160_78] : memref<512x512xf32, #tpu.memory_space<vmem>>, vector<32x32xf32>
    tpu.vector_store %arg10[%c160_77, %c160_78], %50 {strides = array<i32>} : memref<512x512xf32, #tpu.memory_space<vmem>>, vector<32x32xf32>,
    %c0_79 = arith.constant 0 : index
    %c0_80 = arith.constant 0 : index
    %52 = vector.load %arg2[%c0_79, %c0_80] : memref<8x32xf32, #tpu.memory_space<vmem>>, vector<8x32xf32>
    %c48 = arith.constant 48 : index
    %c192 = arith.constant 192 : index
    %53 = vector.load %arg9[%c48, %c192] : memref<128x1536xf32, #tpu.memory_space<vmem>>, vector<8x32xf32>
    tpu.vector_store %arg9[%c48, %c192], %52 {strides = array<i32>} : memref<128x1536xf32, #tpu.memory_space<vmem>>, vector<8x32xf32>,
    %c0_81 = arith.constant 0 : index
    %c0_82 = arith.constant 0 : index
    %54 = vector.load %arg3[%c0_81, %c0_82] : memref<8x32xf32, #tpu.memory_space<vmem>>, vector<8x32xf32>
    %c48_83 = arith.constant 48 : index
    %c704 = arith.constant 704 : index
    %55 = vector.load %arg9[%c48_83, %c704] : memref<128x1536xf32, #tpu.memory_space<vmem>>, vector<8x32xf32>
    tpu.vector_store %arg9[%c48_83, %c704], %54 {strides = array<i32>} : memref<128x1536xf32, #tpu.memory_space<vmem>>, vector<8x32xf32>,
    %c0_84 = arith.constant 0 : index
    %c0_85 = arith.constant 0 : index
    %56 = vector.load %arg4[%c0_84, %c0_85] : memref<8x32xf32, #tpu.memory_space<vmem>>, vector<8x32xf32>
    %c48_86 = arith.constant 48 : index
    %c1216 = arith.constant 1216 : index
    %57 = vector.load %arg9[%c48_86, %c1216] : memref<128x1536xf32, #tpu.memory_space<vmem>>, vector<8x32xf32>
    tpu.vector_store %arg9[%c48_86, %c1216], %56 {strides = array<i32>} : memref<128x1536xf32, #tpu.memory_space<vmem>>, vector<8x32xf32>,
    %c0_87 = arith.constant 0 : index
    %c0_88 = arith.constant 0 : index
    %58 = vector.load %arg5[%c0_87, %c0_88] : memref<32x32xf32, #tpu.memory_space<vmem>>, vector<32x32xf32>
    %c192_89 = arith.constant 192 : index
    %c192_90 = arith.constant 192 : index
    %59 = vector.load %arg10[%c192_89, %c192_90] : memref<512x512xf32, #tpu.memory_space<vmem>>, vector<32x32xf32>
    tpu.vector_store %arg10[%c192_89, %c192_90], %58 {strides = array<i32>} : memref<512x512xf32, #tpu.memory_space<vmem>>, vector<32x32xf32>,
    %c0_91 = arith.constant 0 : index
    %c0_92 = arith.constant 0 : index
    %60 = vector.load %arg2[%c0_91, %c0_92] : memref<8x32xf32, #tpu.memory_space<vmem>>, vector<8x32xf32>
    %c56 = arith.constant 56 : index
    %c224 = arith.constant 224 : index
    %61 = vector.load %arg9[%c56, %c224] : memref<128x1536xf32, #tpu.memory_space<vmem>>, vector<8x32xf32>
    tpu.vector_store %arg9[%c56, %c224], %60 {strides = array<i32>} : memref<128x1536xf32, #tpu.memory_space<vmem>>, vector<8x32xf32>,
    %c0_93 = arith.constant 0 : index
    %c0_94 = arith.constant 0 : index
    %62 = vector.load %arg3[%c0_93, %c0_94] : memref<8x32xf32, #tpu.memory_space<vmem>>, vector<8x32xf32>
    %c56_95 = arith.constant 56 : index
    %c736 = arith.constant 736 : index
    %63 = vector.load %arg9[%c56_95, %c736] : memref<128x1536xf32, #tpu.memory_space<vmem>>, vector<8x32xf32>
    tpu.vector_store %arg9[%c56_95, %c736], %62 {strides = array<i32>} : memref<128x1536xf32, #tpu.memory_space<vmem>>, vector<8x32xf32>,
    %c0_96 = arith.constant 0 : index
    %c0_97 = arith.constant 0 : index
    %64 = vector.load %arg4[%c0_96, %c0_97] : memref<8x32xf32, #tpu.memory_space<vmem>>, vector<8x32xf32>
    %c56_98 = arith.constant 56 : index
    %c1248 = arith.constant 1248 : index
    %65 = vector.load %arg9[%c56_98, %c1248] : memref<128x1536xf32, #tpu.memory_space<vmem>>, vector<8x32xf32>
    tpu.vector_store %arg9[%c56_98, %c1248], %64 {strides = array<i32>} : memref<128x1536xf32, #tpu.memory_space<vmem>>, vector<8x32xf32>,
    %c0_99 = arith.constant 0 : index
    %c0_100 = arith.constant 0 : index
    %66 = vector.load %arg5[%c0_99, %c0_100] : memref<32x32xf32, #tpu.memory_space<vmem>>, vector<32x32xf32>
    %c224_101 = arith.constant 224 : index
    %c224_102 = arith.constant 224 : index
    %67 = vector.load %arg10[%c224_101, %c224_102] : memref<512x512xf32, #tpu.memory_space<vmem>>, vector<32x32xf32>
    tpu.vector_store %arg10[%c224_101, %c224_102], %66 {strides = array<i32>} : memref<512x512xf32, #tpu.memory_space<vmem>>, vector<32x32xf32>,
    %c0_103 = arith.constant 0 : index
    %c0_104 = arith.constant 0 : index
    %68 = vector.load %arg2[%c0_103, %c0_104] : memref<8x32xf32, #tpu.memory_space<vmem>>, vector<8x32xf32>
    %c64_105 = arith.constant 64 : index
    %c256 = arith.constant 256 : index
    %69 = vector.load %arg9[%c64_105, %c256] : memref<128x1536xf32, #tpu.memory_space<vmem>>, vector<8x32xf32>
    tpu.vector_store %arg9[%c64_105, %c256], %68 {strides = array<i32>} : memref<128x1536xf32, #tpu.memory_space<vmem>>, vector<8x32xf32>,
    %c0_106 = arith.constant 0 : index
    %c0_107 = arith.constant 0 : index
    %70 = vector.load %arg3[%c0_106, %c0_107] : memref<8x32xf32, #tpu.memory_space<vmem>>, vector<8x32xf32>
    %c64_108 = arith.constant 64 : index
    %c768 = arith.constant 768 : index
    %71 = vector.load %arg9[%c64_108, %c768] : memref<128x1536xf32, #tpu.memory_space<vmem>>, vector<8x32xf32>
    tpu.vector_store %arg9[%c64_108, %c768], %70 {strides = array<i32>} : memref<128x1536xf32, #tpu.memory_space<vmem>>, vector<8x32xf32>,
    %c0_109 = arith.constant 0 : index
    %c0_110 = arith.constant 0 : index
    %72 = vector.load %arg4[%c0_109, %c0_110] : memref<8x32xf32, #tpu.memory_space<vmem>>, vector<8x32xf32>
    %c64_111 = arith.constant 64 : index
    %c1280 = arith.constant 1280 : index
    %73 = vector.load %arg9[%c64_111, %c1280] : memref<128x1536xf32, #tpu.memory_space<vmem>>, vector<8x32xf32>
    tpu.vector_store %arg9[%c64_111, %c1280], %72 {strides = array<i32>} : memref<128x1536xf32, #tpu.memory_space<vmem>>, vector<8x32xf32>,
    %c0_112 = arith.constant 0 : index
    %c0_113 = arith.constant 0 : index
    %74 = vector.load %arg5[%c0_112, %c0_113] : memref<32x32xf32, #tpu.memory_space<vmem>>, vector<32x32xf32>
    %c256_114 = arith.constant 256 : index
    %c256_115 = arith.constant 256 : index
    %75 = vector.load %arg10[%c256_114, %c256_115] : memref<512x512xf32, #tpu.memory_space<vmem>>, vector<32x32xf32>
    tpu.vector_store %arg10[%c256_114, %c256_115], %74 {strides = array<i32>} : memref<512x512xf32, #tpu.memory_space<vmem>>, vector<32x32xf32>,
    %c0_116 = arith.constant 0 : index
    %c0_117 = arith.constant 0 : index
    %76 = vector.load %arg2[%c0_116, %c0_117] : memref<8x32xf32, #tpu.memory_space<vmem>>, vector<8x32xf32>
    %c72 = arith.constant 72 : index
    %c288 = arith.constant 288 : index
    %77 = vector.load %arg9[%c72, %c288] : memref<128x1536xf32, #tpu.memory_space<vmem>>, vector<8x32xf32>
    tpu.vector_store %arg9[%c72, %c288], %76 {strides = array<i32>} : memref<128x1536xf32, #tpu.memory_space<vmem>>, vector<8x32xf32>,
    %c0_118 = arith.constant 0 : index
    %c0_119 = arith.constant 0 : index
    %78 = vector.load %arg3[%c0_118, %c0_119] : memref<8x32xf32, #tpu.memory_space<vmem>>, vector<8x32xf32>
    %c72_120 = arith.constant 72 : index
    %c800 = arith.constant 800 : index
    %79 = vector.load %arg9[%c72_120, %c800] : memref<128x1536xf32, #tpu.memory_space<vmem>>, vector<8x32xf32>
    tpu.vector_store %arg9[%c72_120, %c800], %78 {strides = array<i32>} : memref<128x1536xf32, #tpu.memory_space<vmem>>, vector<8x32xf32>,
    %c0_121 = arith.constant 0 : index
    %c0_122 = arith.constant 0 : index
    %80 = vector.load %arg4[%c0_121, %c0_122] : memref<8x32xf32, #tpu.memory_space<vmem>>, vector<8x32xf32>
    %c72_123 = arith.constant 72 : index
    %c1312 = arith.constant 1312 : index
    %81 = vector.load %arg9[%c72_123, %c1312] : memref<128x1536xf32, #tpu.memory_space<vmem>>, vector<8x32xf32>
    tpu.vector_store %arg9[%c72_123, %c1312], %80 {strides = array<i32>} : memref<128x1536xf32, #tpu.memory_space<vmem>>, vector<8x32xf32>,
    %c0_124 = arith.constant 0 : index
    %c0_125 = arith.constant 0 : index
    %82 = vector.load %arg5[%c0_124, %c0_125] : memref<32x32xf32, #tpu.memory_space<vmem>>, vector<32x32xf32>
    %c288_126 = arith.constant 288 : index
    %c288_127 = arith.constant 288 : index
    %83 = vector.load %arg10[%c288_126, %c288_127] : memref<512x512xf32, #tpu.memory_space<vmem>>, vector<32x32xf32>
    tpu.vector_store %arg10[%c288_126, %c288_127], %82 {strides = array<i32>} : memref<512x512xf32, #tpu.memory_space<vmem>>, vector<32x32xf32>,
    %c0_128 = arith.constant 0 : index
    %c0_129 = arith.constant 0 : index
    %84 = vector.load %arg2[%c0_128, %c0_129] : memref<8x32xf32, #tpu.memory_space<vmem>>, vector<8x32xf32>
    %c80 = arith.constant 80 : index
    %c320 = arith.constant 320 : index
    %85 = vector.load %arg9[%c80, %c320] : memref<128x1536xf32, #tpu.memory_space<vmem>>, vector<8x32xf32>
    tpu.vector_store %arg9[%c80, %c320], %84 {strides = array<i32>} : memref<128x1536xf32, #tpu.memory_space<vmem>>, vector<8x32xf32>,
    %c0_130 = arith.constant 0 : index
    %c0_131 = arith.constant 0 : index
    %86 = vector.load %arg3[%c0_130, %c0_131] : memref<8x32xf32, #tpu.memory_space<vmem>>, vector<8x32xf32>
    %c80_132 = arith.constant 80 : index
    %c832 = arith.constant 832 : index
    %87 = vector.load %arg9[%c80_132, %c832] : memref<128x1536xf32, #tpu.memory_space<vmem>>, vector<8x32xf32>
    tpu.vector_store %arg9[%c80_132, %c832], %86 {strides = array<i32>} : memref<128x1536xf32, #tpu.memory_space<vmem>>, vector<8x32xf32>,
    %c0_133 = arith.constant 0 : index
    %c0_134 = arith.constant 0 : index
    %88 = vector.load %arg4[%c0_133, %c0_134] : memref<8x32xf32, #tpu.memory_space<vmem>>, vector<8x32xf32>
    %c80_135 = arith.constant 80 : index
    %c1344 = arith.constant 1344 : index
    %89 = vector.load %arg9[%c80_135, %c1344] : memref<128x1536xf32, #tpu.memory_space<vmem>>, vector<8x32xf32>
    tpu.vector_store %arg9[%c80_135, %c1344], %88 {strides = array<i32>} : memref<128x1536xf32, #tpu.memory_space<vmem>>, vector<8x32xf32>,
    %c0_136 = arith.constant 0 : index
    %c0_137 = arith.constant 0 : index
    %90 = vector.load %arg5[%c0_136, %c0_137] : memref<32x32xf32, #tpu.memory_space<vmem>>, vector<32x32xf32>
    %c320_138 = arith.constant 320 : index
    %c320_139 = arith.constant 320 : index
    %91 = vector.load %arg10[%c320_138, %c320_139] : memref<512x512xf32, #tpu.memory_space<vmem>>, vector<32x32xf32>
    tpu.vector_store %arg10[%c320_138, %c320_139], %90 {strides = array<i32>} : memref<512x512xf32, #tpu.memory_space<vmem>>, vector<32x32xf32>,
    %c0_140 = arith.constant 0 : index
    %c0_141 = arith.constant 0 : index
    %92 = vector.load %arg2[%c0_140, %c0_141] : memref<8x32xf32, #tpu.memory_space<vmem>>, vector<8x32xf32>
    %c88 = arith.constant 88 : index
    %c352 = arith.constant 352 : index
    %93 = vector.load %arg9[%c88, %c352] : memref<128x1536xf32, #tpu.memory_space<vmem>>, vector<8x32xf32>
    tpu.vector_store %arg9[%c88, %c352], %92 {strides = array<i32>} : memref<128x1536xf32, #tpu.memory_space<vmem>>, vector<8x32xf32>,
    %c0_142 = arith.constant 0 : index
    %c0_143 = arith.constant 0 : index
    %94 = vector.load %arg3[%c0_142, %c0_143] : memref<8x32xf32, #tpu.memory_space<vmem>>, vector<8x32xf32>
    %c88_144 = arith.constant 88 : index
    %c864 = arith.constant 864 : index
    %95 = vector.load %arg9[%c88_144, %c864] : memref<128x1536xf32, #tpu.memory_space<vmem>>, vector<8x32xf32>
    tpu.vector_store %arg9[%c88_144, %c864], %94 {strides = array<i32>} : memref<128x1536xf32, #tpu.memory_space<vmem>>, vector<8x32xf32>,
    %c0_145 = arith.constant 0 : index
    %c0_146 = arith.constant 0 : index
    %96 = vector.load %arg4[%c0_145, %c0_146] : memref<8x32xf32, #tpu.memory_space<vmem>>, vector<8x32xf32>
    %c88_147 = arith.constant 88 : index
    %c1376 = arith.constant 1376 : index
    %97 = vector.load %arg9[%c88_147, %c1376] : memref<128x1536xf32, #tpu.memory_space<vmem>>, vector<8x32xf32>
    tpu.vector_store %arg9[%c88_147, %c1376], %96 {strides = array<i32>} : memref<128x1536xf32, #tpu.memory_space<vmem>>, vector<8x32xf32>,
    %c0_148 = arith.constant 0 : index
    %c0_149 = arith.constant 0 : index
    %98 = vector.load %arg5[%c0_148, %c0_149] : memref<32x32xf32, #tpu.memory_space<vmem>>, vector<32x32xf32>
    %c352_150 = arith.constant 352 : index
    %c352_151 = arith.constant 352 : index
    %99 = vector.load %arg10[%c352_150, %c352_151] : memref<512x512xf32, #tpu.memory_space<vmem>>, vector<32x32xf32>
    tpu.vector_store %arg10[%c352_150, %c352_151], %98 {strides = array<i32>} : memref<512x512xf32, #tpu.memory_space<vmem>>, vector<32x32xf32>,
    %c0_152 = arith.constant 0 : index
    %c0_153 = arith.constant 0 : index
    %100 = vector.load %arg2[%c0_152, %c0_153] : memref<8x32xf32, #tpu.memory_space<vmem>>, vector<8x32xf32>
    %c96_154 = arith.constant 96 : index
    %c384 = arith.constant 384 : index
    %101 = vector.load %arg9[%c96_154, %c384] : memref<128x1536xf32, #tpu.memory_space<vmem>>, vector<8x32xf32>
    tpu.vector_store %arg9[%c96_154, %c384], %100 {strides = array<i32>} : memref<128x1536xf32, #tpu.memory_space<vmem>>, vector<8x32xf32>,
    %c0_155 = arith.constant 0 : index
    %c0_156 = arith.constant 0 : index
    %102 = vector.load %arg3[%c0_155, %c0_156] : memref<8x32xf32, #tpu.memory_space<vmem>>, vector<8x32xf32>
    %c96_157 = arith.constant 96 : index
    %c896 = arith.constant 896 : index
    %103 = vector.load %arg9[%c96_157, %c896] : memref<128x1536xf32, #tpu.memory_space<vmem>>, vector<8x32xf32>
    tpu.vector_store %arg9[%c96_157, %c896], %102 {strides = array<i32>} : memref<128x1536xf32, #tpu.memory_space<vmem>>, vector<8x32xf32>,
    %c0_158 = arith.constant 0 : index
    %c0_159 = arith.constant 0 : index
    %104 = vector.load %arg4[%c0_158, %c0_159] : memref<8x32xf32, #tpu.memory_space<vmem>>, vector<8x32xf32>
    %c96_160 = arith.constant 96 : index
    %c1408 = arith.constant 1408 : index
    %105 = vector.load %arg9[%c96_160, %c1408] : memref<128x1536xf32, #tpu.memory_space<vmem>>, vector<8x32xf32>
    tpu.vector_store %arg9[%c96_160, %c1408], %104 {strides = array<i32>} : memref<128x1536xf32, #tpu.memory_space<vmem>>, vector<8x32xf32>,
    %c0_161 = arith.constant 0 : index
    %c0_162 = arith.constant 0 : index
    %106 = vector.load %arg5[%c0_161, %c0_162] : memref<32x32xf32, #tpu.memory_space<vmem>>, vector<32x32xf32>
    %c384_163 = arith.constant 384 : index
    %c384_164 = arith.constant 384 : index
    %107 = vector.load %arg10[%c384_163, %c384_164] : memref<512x512xf32, #tpu.memory_space<vmem>>, vector<32x32xf32>
    tpu.vector_store %arg10[%c384_163, %c384_164], %106 {strides = array<i32>} : memref<512x512xf32, #tpu.memory_space<vmem>>, vector<32x32xf32>,
    %c0_165 = arith.constant 0 : index
    %c0_166 = arith.constant 0 : index
    %108 = vector.load %arg2[%c0_165, %c0_166] : memref<8x32xf32, #tpu.memory_space<vmem>>, vector<8x32xf32>
    %c104 = arith.constant 104 : index
    %c416 = arith.constant 416 : index
    %109 = vector.load %arg9[%c104, %c416] : memref<128x1536xf32, #tpu.memory_space<vmem>>, vector<8x32xf32>
    tpu.vector_store %arg9[%c104, %c416], %108 {strides = array<i32>} : memref<128x1536xf32, #tpu.memory_space<vmem>>, vector<8x32xf32>,
    %c0_167 = arith.constant 0 : index
    %c0_168 = arith.constant 0 : index
    %110 = vector.load %arg3[%c0_167, %c0_168] : memref<8x32xf32, #tpu.memory_space<vmem>>, vector<8x32xf32>
    %c104_169 = arith.constant 104 : index
    %c928 = arith.constant 928 : index
    %111 = vector.load %arg9[%c104_169, %c928] : memref<128x1536xf32, #tpu.memory_space<vmem>>, vector<8x32xf32>
    tpu.vector_store %arg9[%c104_169, %c928], %110 {strides = array<i32>} : memref<128x1536xf32, #tpu.memory_space<vmem>>, vector<8x32xf32>,
    %c0_170 = arith.constant 0 : index
    %c0_171 = arith.constant 0 : index
    %112 = vector.load %arg4[%c0_170, %c0_171] : memref<8x32xf32, #tpu.memory_space<vmem>>, vector<8x32xf32>
    %c104_172 = arith.constant 104 : index
    %c1440 = arith.constant 1440 : index
    %113 = vector.load %arg9[%c104_172, %c1440] : memref<128x1536xf32, #tpu.memory_space<vmem>>, vector<8x32xf32>
    tpu.vector_store %arg9[%c104_172, %c1440], %112 {strides = array<i32>} : memref<128x1536xf32, #tpu.memory_space<vmem>>, vector<8x32xf32>,
    %c0_173 = arith.constant 0 : index
    %c0_174 = arith.constant 0 : index
    %114 = vector.load %arg5[%c0_173, %c0_174] : memref<32x32xf32, #tpu.memory_space<vmem>>, vector<32x32xf32>
    %c416_175 = arith.constant 416 : index
    %c416_176 = arith.constant 416 : index
    %115 = vector.load %arg10[%c416_175, %c416_176] : memref<512x512xf32, #tpu.memory_space<vmem>>, vector<32x32xf32>
    tpu.vector_store %arg10[%c416_175, %c416_176], %114 {strides = array<i32>} : memref<512x512xf32, #tpu.memory_space<vmem>>, vector<32x32xf32>,
    %c0_177 = arith.constant 0 : index
    %c0_178 = arith.constant 0 : index
    %116 = vector.load %arg2[%c0_177, %c0_178] : memref<8x32xf32, #tpu.memory_space<vmem>>, vector<8x32xf32>
    %c112 = arith.constant 112 : index
    %c448 = arith.constant 448 : index
    %117 = vector.load %arg9[%c112, %c448] : memref<128x1536xf32, #tpu.memory_space<vmem>>, vector<8x32xf32>
    tpu.vector_store %arg9[%c112, %c448], %116 {strides = array<i32>} : memref<128x1536xf32, #tpu.memory_space<vmem>>, vector<8x32xf32>,
    %c0_179 = arith.constant 0 : index
    %c0_180 = arith.constant 0 : index
    %118 = vector.load %arg3[%c0_179, %c0_180] : memref<8x32xf32, #tpu.memory_space<vmem>>, vector<8x32xf32>
    %c112_181 = arith.constant 112 : index
    %c960 = arith.constant 960 : index
    %119 = vector.load %arg9[%c112_181, %c960] : memref<128x1536xf32, #tpu.memory_space<vmem>>, vector<8x32xf32>
    tpu.vector_store %arg9[%c112_181, %c960], %118 {strides = array<i32>} : memref<128x1536xf32, #tpu.memory_space<vmem>>, vector<8x32xf32>,
    %c0_182 = arith.constant 0 : index
    %c0_183 = arith.constant 0 : index
    %120 = vector.load %arg4[%c0_182, %c0_183] : memref<8x32xf32, #tpu.memory_space<vmem>>, vector<8x32xf32>
    %c112_184 = arith.constant 112 : index
    %c1472 = arith.constant 1472 : index
    %121 = vector.load %arg9[%c112_184, %c1472] : memref<128x1536xf32, #tpu.memory_space<vmem>>, vector<8x32xf32>
    tpu.vector_store %arg9[%c112_184, %c1472], %120 {strides = array<i32>} : memref<128x1536xf32, #tpu.memory_space<vmem>>, vector<8x32xf32>,
    %c0_185 = arith.constant 0 : index
    %c0_186 = arith.constant 0 : index
    %122 = vector.load %arg5[%c0_185, %c0_186] : memref<32x32xf32, #tpu.memory_space<vmem>>, vector<32x32xf32>
    %c448_187 = arith.constant 448 : index
    %c448_188 = arith.constant 448 : index
    %123 = vector.load %arg10[%c448_187, %c448_188] : memref<512x512xf32, #tpu.memory_space<vmem>>, vector<32x32xf32>
    tpu.vector_store %arg10[%c448_187, %c448_188], %122 {strides = array<i32>} : memref<512x512xf32, #tpu.memory_space<vmem>>, vector<32x32xf32>,
    %c0_189 = arith.constant 0 : index
    %c0_190 = arith.constant 0 : index
    %124 = vector.load %arg2[%c0_189, %c0_190] : memref<8x32xf32, #tpu.memory_space<vmem>>, vector<8x32xf32>
    %c120 = arith.constant 120 : index
    %c480 = arith.constant 480 : index
    %125 = vector.load %arg9[%c120, %c480] : memref<128x1536xf32, #tpu.memory_space<vmem>>, vector<8x32xf32>
    tpu.vector_store %arg9[%c120, %c480], %124 {strides = array<i32>} : memref<128x1536xf32, #tpu.memory_space<vmem>>, vector<8x32xf32>,
    %c0_191 = arith.constant 0 : index
    %c0_192 = arith.constant 0 : index
    %126 = vector.load %arg3[%c0_191, %c0_192] : memref<8x32xf32, #tpu.memory_space<vmem>>, vector<8x32xf32>
    %c120_193 = arith.constant 120 : index
    %c992 = arith.constant 992 : index
    %127 = vector.load %arg9[%c120_193, %c992] : memref<128x1536xf32, #tpu.memory_space<vmem>>, vector<8x32xf32>
    tpu.vector_store %arg9[%c120_193, %c992], %126 {strides = array<i32>} : memref<128x1536xf32, #tpu.memory_space<vmem>>, vector<8x32xf32>,
    %c0_194 = arith.constant 0 : index
    %c0_195 = arith.constant 0 : index
    %128 = vector.load %arg4[%c0_194, %c0_195] : memref<8x32xf32, #tpu.memory_space<vmem>>, vector<8x32xf32>
    %c120_196 = arith.constant 120 : index
    %c1504 = arith.constant 1504 : index
    %129 = vector.load %arg9[%c120_196, %c1504] : memref<128x1536xf32, #tpu.memory_space<vmem>>, vector<8x32xf32>
    tpu.vector_store %arg9[%c120_196, %c1504], %128 {strides = array<i32>} : memref<128x1536xf32, #tpu.memory_space<vmem>>, vector<8x32xf32>,
    %c0_197 = arith.constant 0 : index
    %c0_198 = arith.constant 0 : index
    %130 = vector.load %arg5[%c0_197, %c0_198] : memref<32x32xf32, #tpu.memory_space<vmem>>, vector<32x32xf32>
    %c480_199 = arith.constant 480 : index
    %c480_200 = arith.constant 480 : index
    %131 = vector.load %arg10[%c480_199, %c480_200] : memref<512x512xf32, #tpu.memory_space<vmem>>, vector<32x32xf32>
    tpu.vector_store %arg10[%c480_199, %c480_200], %130 {strides = array<i32>} : memref<512x512xf32, #tpu.memory_space<vmem>>, vector<32x32xf32>,
    %c0_201 = arith.constant 0 : index
    %c0_202 = arith.constant 0 : index
    %132 = vector.load %arg1[%c0_201, %c0_202] : memref<16x128xf32, #tpu.memory_space<vmem>>, vector<16x128xf32>
    %c0_203 = arith.constant 0 : index
    %c0_204 = arith.constant 0 : index
    %133 = vector.load %arg9[%c0_203, %c0_204] : memref<128x1536xf32, #tpu.memory_space<vmem>>, vector<128x1536xf32>
    %cst_205 = arith.constant dense<0.000000e+00> : vector<16x1536xf32>
    %134 = tpu.matmul %132, %133, %cst_205 {dimension_numbers = #tpu.dot_dimension_numbers<[1], [0], [0], [1], [0, 0, 1, 1], [], []>} : vector<16x128xf32>, vector<128x1536xf32>, vector<16x1536xf32> -> vector<16x1536xf32>
    %135 = vector.extract_strided_slice %134 {offsets = [0, 0], sizes = [16, 512], strides = [1, 1]} : vector<16x1536xf32> to vector<16x512xf32>
    %c0_206 = arith.constant 0 : index
    %c0_207 = arith.constant 0 : index
    %136 = vector.load %arg6[%c0_206, %c0_207] : memref<1x512xf32, #tpu.memory_space<vmem>>, vector<1x512xf32>
    %137 = vector.broadcast %136 : vector<1x512xf32> to vector<16x512xf32>
    %138 = arith.addf %135, %137 : vector<16x512xf32>
    %139 = vector.extract_strided_slice %134 {offsets = [0, 512], sizes = [16, 512], strides = [1, 1]} : vector<16x1536xf32> to vector<16x512xf32>
    %140 = vector.extract_strided_slice %134 {offsets = [0, 1024], sizes = [16, 512], strides = [1, 1]} : vector<16x1536xf32> to vector<16x512xf32>
    %141 = arith.addf %138, %139 : vector<16x512xf32>
    %cst_208 = arith.constant 0.000000e+00 : f32
    %142 = vector.broadcast %cst_208 : f32 to vector<16x512xf32>
    %143 = arith.maximumf %141, %142 : vector<16x512xf32>
    %c32_i32 = arith.constant 32 : i32
    %144 = tpu.dynamic_rotate %139 by %c32_i32 dim 1 : vector<16x512xf32>, i32 -> vector<16x512xf32>
    %145 = arith.addf %138, %144 : vector<16x512xf32>
    %cst_209 = arith.constant 0.000000e+00 : f32
    %146 = vector.broadcast %cst_209 : f32 to vector<16x512xf32>
    %147 = arith.maximumf %145, %146 : vector<16x512xf32>
    %148 = arith.addf %143, %147 : vector<16x512xf32>
    %c64_i32 = arith.constant 64 : i32
    %149 = tpu.dynamic_rotate %139 by %c64_i32 dim 1 : vector<16x512xf32>, i32 -> vector<16x512xf32>
    %150 = arith.addf %138, %149 : vector<16x512xf32>
    %cst_210 = arith.constant 0.000000e+00 : f32
    %151 = vector.broadcast %cst_210 : f32 to vector<16x512xf32>
    %152 = arith.maximumf %150, %151 : vector<16x512xf32>
    %153 = arith.addf %148, %152 : vector<16x512xf32>
    %c96_i32 = arith.constant 96 : i32
    %154 = tpu.dynamic_rotate %139 by %c96_i32 dim 1 : vector<16x512xf32>, i32 -> vector<16x512xf32>
    %155 = arith.addf %138, %154 : vector<16x512xf32>
    %cst_211 = arith.constant 0.000000e+00 : f32
    %156 = vector.broadcast %cst_211 : f32 to vector<16x512xf32>
    %157 = arith.maximumf %155, %156 : vector<16x512xf32>
    %158 = arith.addf %153, %157 : vector<16x512xf32>
    %c128_i32 = arith.constant 128 : i32
    %159 = tpu.dynamic_rotate %139 by %c128_i32 dim 1 : vector<16x512xf32>, i32 -> vector<16x512xf32>
    %160 = arith.addf %138, %159 : vector<16x512xf32>
    %cst_212 = arith.constant 0.000000e+00 : f32
    %161 = vector.broadcast %cst_212 : f32 to vector<16x512xf32>
    %162 = arith.maximumf %160, %161 : vector<16x512xf32>
    %163 = arith.addf %158, %162 : vector<16x512xf32>
    %c160_i32 = arith.constant 160 : i32
    %164 = tpu.dynamic_rotate %139 by %c160_i32 dim 1 : vector<16x512xf32>, i32 -> vector<16x512xf32>
    %165 = arith.addf %138, %164 : vector<16x512xf32>
    %cst_213 = arith.constant 0.000000e+00 : f32
    %166 = vector.broadcast %cst_213 : f32 to vector<16x512xf32>
    %167 = arith.maximumf %165, %166 : vector<16x512xf32>
    %168 = arith.addf %163, %167 : vector<16x512xf32>
    %c192_i32 = arith.constant 192 : i32
    %169 = tpu.dynamic_rotate %139 by %c192_i32 dim 1 : vector<16x512xf32>, i32 -> vector<16x512xf32>
    %170 = arith.addf %138, %169 : vector<16x512xf32>
    %cst_214 = arith.constant 0.000000e+00 : f32
    %171 = vector.broadcast %cst_214 : f32 to vector<16x512xf32>
    %172 = arith.maximumf %170, %171 : vector<16x512xf32>
    %173 = arith.addf %168, %172 : vector<16x512xf32>
    %c224_i32 = arith.constant 224 : i32
    %174 = tpu.dynamic_rotate %139 by %c224_i32 dim 1 : vector<16x512xf32>, i32 -> vector<16x512xf32>
    %175 = arith.addf %138, %174 : vector<16x512xf32>
    %cst_215 = arith.constant 0.000000e+00 : f32
    %176 = vector.broadcast %cst_215 : f32 to vector<16x512xf32>
    %177 = arith.maximumf %175, %176 : vector<16x512xf32>
    %178 = arith.addf %173, %177 : vector<16x512xf32>
    %c256_i32 = arith.constant 256 : i32
    %179 = tpu.dynamic_rotate %139 by %c256_i32 dim 1 : vector<16x512xf32>, i32 -> vector<16x512xf32>
    %180 = arith.addf %138, %179 : vector<16x512xf32>
    %cst_216 = arith.constant 0.000000e+00 : f32
    %181 = vector.broadcast %cst_216 : f32 to vector<16x512xf32>
    %182 = arith.maximumf %180, %181 : vector<16x512xf32>
    %183 = arith.addf %178, %182 : vector<16x512xf32>
    %c288_i32 = arith.constant 288 : i32
    %184 = tpu.dynamic_rotate %139 by %c288_i32 dim 1 : vector<16x512xf32>, i32 -> vector<16x512xf32>
    %185 = arith.addf %138, %184 : vector<16x512xf32>
    %cst_217 = arith.constant 0.000000e+00 : f32
    %186 = vector.broadcast %cst_217 : f32 to vector<16x512xf32>
    %187 = arith.maximumf %185, %186 : vector<16x512xf32>
    %188 = arith.addf %183, %187 : vector<16x512xf32>
    %c320_i32 = arith.constant 320 : i32
    %189 = tpu.dynamic_rotate %139 by %c320_i32 dim 1 : vector<16x512xf32>, i32 -> vector<16x512xf32>
    %190 = arith.addf %138, %189 : vector<16x512xf32>
    %cst_218 = arith.constant 0.000000e+00 : f32
    %191 = vector.broadcast %cst_218 : f32 to vector<16x512xf32>
    %192 = arith.maximumf %190, %191 : vector<16x512xf32>
    %193 = arith.addf %188, %192 : vector<16x512xf32>
    %c352_i32 = arith.constant 352 : i32
    %194 = tpu.dynamic_rotate %139 by %c352_i32 dim 1 : vector<16x512xf32>, i32 -> vector<16x512xf32>
    %195 = arith.addf %138, %194 : vector<16x512xf32>
    %cst_219 = arith.constant 0.000000e+00 : f32
    %196 = vector.broadcast %cst_219 : f32 to vector<16x512xf32>
    %197 = arith.maximumf %195, %196 : vector<16x512xf32>
    %198 = arith.addf %193, %197 : vector<16x512xf32>
    %c384_i32 = arith.constant 384 : i32
    %199 = tpu.dynamic_rotate %139 by %c384_i32 dim 1 : vector<16x512xf32>, i32 -> vector<16x512xf32>
    %200 = arith.addf %138, %199 : vector<16x512xf32>
    %cst_220 = arith.constant 0.000000e+00 : f32
    %201 = vector.broadcast %cst_220 : f32 to vector<16x512xf32>
    %202 = arith.maximumf %200, %201 : vector<16x512xf32>
    %203 = arith.addf %198, %202 : vector<16x512xf32>
    %c416_i32 = arith.constant 416 : i32
    %204 = tpu.dynamic_rotate %139 by %c416_i32 dim 1 : vector<16x512xf32>, i32 -> vector<16x512xf32>
    %205 = arith.addf %138, %204 : vector<16x512xf32>
    %cst_221 = arith.constant 0.000000e+00 : f32
    %206 = vector.broadcast %cst_221 : f32 to vector<16x512xf32>
    %207 = arith.maximumf %205, %206 : vector<16x512xf32>
    %208 = arith.addf %203, %207 : vector<16x512xf32>
    %c448_i32 = arith.constant 448 : i32
    %209 = tpu.dynamic_rotate %139 by %c448_i32 dim 1 : vector<16x512xf32>, i32 -> vector<16x512xf32>
    %210 = arith.addf %138, %209 : vector<16x512xf32>
    %cst_222 = arith.constant 0.000000e+00 : f32
    %211 = vector.broadcast %cst_222 : f32 to vector<16x512xf32>
    %212 = arith.maximumf %210, %211 : vector<16x512xf32>
    %213 = arith.addf %208, %212 : vector<16x512xf32>
    %c480_i32 = arith.constant 480 : i32
    %214 = tpu.dynamic_rotate %139 by %c480_i32 dim 1 : vector<16x512xf32>, i32 -> vector<16x512xf32>
    %215 = arith.addf %138, %214 : vector<16x512xf32>
    %cst_223 = arith.constant 0.000000e+00 : f32
    %216 = vector.broadcast %cst_223 : f32 to vector<16x512xf32>
    %217 = arith.maximumf %215, %216 : vector<16x512xf32>
    %218 = arith.addf %213, %217 : vector<16x512xf32>
    %c0_224 = arith.constant 0 : index
    %c0_225 = arith.constant 0 : index
    %219 = vector.load %arg10[%c0_224, %c0_225] : memref<512x512xf32, #tpu.memory_space<vmem>>, vector<512x512xf32>
    %cst_226 = arith.constant dense<0.000000e+00> : vector<16x512xf32>
    %220 = tpu.matmul %218, %219, %cst_226 {dimension_numbers = #tpu.dot_dimension_numbers<[1], [0], [0], [1], [0, 0, 1, 1], [], []>} : vector<16x512xf32>, vector<512x512xf32>, vector<16x512xf32> -> vector<16x512xf32>
    %221 = arith.addf %140, %220 : vector<16x512xf32>
    %c0_227 = arith.constant 0 : index
    %c0_228 = arith.constant 0 : index
    %222 = vector.load %arg7[%c0_227, %c0_228] : memref<1x512xf32, #tpu.memory_space<vmem>>, vector<1x512xf32>
    %223 = vector.broadcast %222 : vector<1x512xf32> to vector<16x512xf32>
    %224 = arith.addf %221, %223 : vector<16x512xf32>
    %cst_229 = arith.constant 0.000000e+00 : f32
    %225 = vector.broadcast %cst_229 : f32 to vector<16x512xf32>
    %226 = arith.maximumf %224, %225 : vector<16x512xf32>
    %c0_230 = arith.constant 0 : index
    %c0_231 = arith.constant 0 : index
    %227 = vector.load %arg8[%c0_230, %c0_231] : memref<16x512xf32, #tpu.memory_space<vmem>>, vector<16x512xf32>
    tpu.vector_store %arg8[%c0_230, %c0_231], %226 {strides = array<i32>} : memref<16x512xf32, #tpu.memory_space<vmem>>, vector<16x512xf32>,
    return
  }
  func.func @transform_0(%arg0: i32) -> (i32, i32) {
    %c0_i32 = arith.constant 0 : i32
    %c0_i32_0 = arith.constant 0 : i32
    return %arg0, %c0_i32 : i32, i32
  }
  func.func @transform_1(%arg0: i32) -> (i32, i32) {
    %c0_i32 = arith.constant 0 : i32
    %c0_i32_0 = arith.constant 0 : i32
    %c0_i32_1 = arith.constant 0 : i32
    return %c0_i32, %c0_i32_0 : i32, i32
  }
  func.func @transform_2(%arg0: i32) -> (i32, i32) {
    %c0_i32 = arith.constant 0 : i32
    %c0_i32_0 = arith.constant 0 : i32
    %c0_i32_1 = arith.constant 0 : i32
    return %c0_i32, %c0_i32_0 : i32, i32
  }
  func.func @transform_3(%arg0: i32) -> (i32, i32) {
    %c0_i32 = arith.constant 0 : i32
    %c0_i32_0 = arith.constant 0 : i32
    %c0_i32_1 = arith.constant 0 : i32
    return %c0_i32, %c0_i32_0 : i32, i32
  }
  func.func @transform_4(%arg0: i32) -> (i32, i32) {
    %c0_i32 = arith.constant 0 : i32
    %c0_i32_0 = arith.constant 0 : i32
    %c0_i32_1 = arith.constant 0 : i32
    return %c0_i32, %c0_i32_0 : i32, i32
  }
  func.func @transform_5(%arg0: i32) -> (i32, i32) {
    %c0_i32 = arith.constant 0 : i32
    %c0_i32_0 = arith.constant 0 : i32
    %c0_i32_1 = arith.constant 0 : i32
    return %c0_i32, %c0_i32_0 : i32, i32
  }
  func.func @transform_6(%arg0: i32) -> (i32, i32) {
    %c0_i32 = arith.constant 0 : i32
    %c0_i32_0 = arith.constant 0 : i32
    %c0_i32_1 = arith.constant 0 : i32
    return %c0_i32, %c0_i32_0 : i32, i32
  }
  func.func @transform_7(%arg0: i32) -> (i32, i32) {
    %c0_i32 = arith.constant 0 : i32
    %c0_i32_0 = arith.constant 0 : i32
    return %arg0, %c0_i32 : i32, i32
  }
}

</mosaic_0001>

<bundles_post_ra>
// kernel: tpu_custom_call.1
= control target key start
LH: loop header
LB: loop body
LE: loop exit
PB: predicated region body
PF: predicated region fallthrough
CT: control target
= control target key end

     0   :  { %12 = vsyncpa [#allocation5], 0  ;;  %s4487_s0 = inlined_call_operand.hbm [shape: f32[16,128], index: 0, kind: input, shape index: {}]   ;;  %s4488_s1 = inlined_call_operand.hbm [shape: f32[8,32], index: 1, kind: input, shape index: {}]   ;;  %s4489_s2 = inlined_call_operand.hbm [shape: f32[8,32], index: 2, kind: input, shape index: {}]   ;;  %s4490_s3 = inlined_call_operand.hbm [shape: f32[8,32], index: 3, kind: input, shape index: {}]   ;;  %s4491_s4 = inlined_call_operand.hbm [shape: f32[32,32], index: 4, kind: input, shape index: {}]   ;;  %s4492_s5 = inlined_call_operand.vmem [shape: f32[1,512], index: 5, kind: input, shape index: {}]   ;;  %s4493_s6 = inlined_call_operand.vmem [shape: f32[1,512], index: 6, kind: input, shape index: {}]   ;;  %s4494_s7 = inlined_call_operand.hbm [shape: f32[16,512], index: 7, kind: output, shape index: {}]  }
   0x1   :  { %13 = vsyncpa [#allocation8], 0 }
   0x2   :  { %14 = vsyncpa [#allocation11], 0 }
   0x3   :  { %15 = vsyncpa [#allocation6], 0  ;;  %s3021_s24 = smov [#allocation7]   ;;  %s3022_s26 = smov [#allocation10]  }
   0x4   :  { %s34_s25 = sshll.u32 %s3021_s24, 4  ;;  %s54_s27 = sshll.u32 %s3022_s26, 4  ;;  %s35_s25 = int_to_ptr.vmem [resolvable:$true] %s34_s25  ;;  %s55_s27 = int_to_ptr.vmem [resolvable:$true] %s54_s27 }
   0x5   :  { %s2901_s28 = scalar_lea.vmem %s35_s25, 128  ;;  %p2906_p1 = scmp.lt.s32.totalorder %s35_s25, %s35_s25 }
   0x6   :  { %p2902_p0 = scmp.ne.s32.totalorder %s35_s25, %s2901_s28  ;;  %p2907_p2 = scmp.lt.s32.totalorder %s2901_s28, %s2901_s28 }
   0x8   :  { %p2908_p3 = por %p2907_p2, %p2906_p1 }
   0xa   :  { %p2909_p4 = pnand %p2908_p3, %p2902_p0 }
   0xc   :  { %2912 = shalt.err (!%p2909_p4)
}
   0xd   :  { %37 = dma.hbm_to_vmem [thread:$0]  %s4488_s1, 128, %s35_s25, [#allocation8]  }
   0xe   :  { %s2921_s8 = scalar_lea.vmem %s55_s27, 128  ;;  %p2926_p6 = scmp.lt.s32.totalorder %s55_s27, %s55_s27 }
   0xf   :  { %p2922_p5 = scmp.ne.s32.totalorder %s55_s27, %s2921_s8  ;;  %p2927_p7 = scmp.lt.s32.totalorder %s2921_s8, %s2921_s8 }
  0x11   :  { %p2928_p8 = por %p2927_p7, %p2926_p6 }
  0x13   :  { %p2929_p9 = pnand %p2928_p8, %p2922_p5 }
  0x15   :  { %2932 = shalt.err (!%p2929_p9)
}
  0x16   :  { %57 = dma.hbm_to_vmem [thread:$0]  %s4490_s3, 128, %s55_s27, [#allocation11]  }
  0x17   :  { %s3023_s11 = smov [#allocation4]  }
  0x18   :  { %s21_s12 = sshll.u32 %s3023_s11, 4  ;;  %s22_s12 = int_to_ptr.vmem [resolvable:$true] %s21_s12 }
  0x19   :  { %s2941_s13 = scalar_lea.vmem %s22_s12, 256  ;;  %p2946_p11 = scmp.lt.s32.totalorder %s22_s12, %s22_s12 }
  0x1a   :  { %p2942_p10 = scmp.ne.s32.totalorder %s22_s12, %s2941_s13  ;;  %p2947_p12 = scmp.lt.s32.totalorder %s2941_s13, %s2941_s13 }
  0x1c   :  { %p2948_p13 = por %p2947_p12, %p2946_p11 }
  0x1e   :  { %p2949_p0 = pnand %p2948_p13, %p2942_p10 }
  0x20   :  { %2952 = shalt.err (!%p2949_p0)
}
  0x21   :  { %s3024_s1 = smov 128   ;;  %s3025_s14 = smov 8  }
  0x22   :  { %27 = dma.hbm_to_vmem [thread:$0]  %s4487_s0, 256, %s22_s12, [#allocation5], %s3024_s1, %s3024_s1, %s3025_s14  }
  0x23   :  { %s3026_s17 = smov [#allocation9]   ;;  %s3027_s3 = smov [#allocation12]  }
  0x24   :  { %s44_s18 = sshll.u32 %s3026_s17, 4  ;;  %s63_s19 = sshll.u32 %s3027_s3, 4  ;;  %s45_s18 = int_to_ptr.vmem [resolvable:$true] %s44_s18  ;;  %s64_s19 = int_to_ptr.vmem [resolvable:$true] %s63_s19 }
  0x25   :  { %s2961_s20 = scalar_lea.vmem %s45_s18, 128  ;;  %p2966_p2 = scmp.lt.s32.totalorder %s45_s18, %s45_s18 }
  0x26   :  { %p2962_p1 = scmp.ne.s32.totalorder %s45_s18, %s2961_s20  ;;  %p2967_p3 = scmp.lt.s32.totalorder %s2961_s20, %s2961_s20 }
  0x28   :  { %p2968_p4 = por %p2967_p3, %p2966_p2 }
  0x2a   :  { %p2969_p5 = pnand %p2968_p4, %p2962_p1 }
  0x2c   :  { %2972 = shalt.err (!%p2969_p5)
}
  0x2d   :  { %47 = dma.hbm_to_vmem [thread:$0]  %s4489_s2, 128, %s45_s18, [#allocation8]  }
  0x2e   :  { %s2981_s23 = scalar_lea.vmem %s64_s19, 512  ;;  %p2986_p7 = scmp.lt.s32.totalorder %s64_s19, %s64_s19 }
  0x2f   :  { %p2982_p6 = scmp.ne.s32.totalorder %s64_s19, %s2981_s23  ;;  %p2987_p8 = scmp.lt.s32.totalorder %s2981_s23, %s2981_s23 }
  0x31   :  { %p2988_p9 = por %p2987_p8, %p2986_p7 }
  0x33   :  { %p2989_p10 = pnand %p2988_p9, %p2982_p6 }
  0x35   :  { %2992 = shalt.err (!%p2989_p10)
}
  0x36   :  { %69 = dma.hbm_to_vmem [thread:$0]  %s4491_s4, 512, %s64_s19, [#allocation11], %s3024_s1, %s3024_s1, %s3025_s14  }
  0x37   :  { %3013 = dma.done.wait [#allocation5], 256  }
  0x38   :  { %3014 = vsyncadd [#allocation5], 4294967040 }
  0x39   :  { %3015 = dma.done.wait [#allocation8], 256  }
  0x3a   :  { %3016 = vsyncadd [#allocation8], 4294967040 }
  0x3b   :  { %3017 = dma.done.wait [#allocation11], 640  }
  0x3c   :  { %3018 = vsyncadd [#allocation11], 4294966656  ;;  %v3028_v0 = vmov 0.0   ;;  %vm538_vm0 = vcmask 261120   ;;  %v1059_v1 = vld [vmem:[#allocation7] sm:$0xff]  ;;  %s3029_s2 = smov 96  }
  0x3d   :  { %272 = vst [vmem:[#allocation2 + $0x5b8] sm:$0xff] %v3028_v0  ;;  %89 = vst [vmem:[#allocation2] sm:$0xff] %v3028_v0  ;;  %1295 = vmatprep.subr.mxu0 %v3028_v0  ;;  %1359 = vmatprep.mubr.f32.mxu0 %v3028_v0  ;;  %v961_v2 = vld [vmem:[#allocation7] sm:$0xff]  ;;  %s3030_s4 = smov 32   ;;  %s3031_s25 = smov 64   ;;  %v1065_v3 = vld [vmem:[#allocation9] sm:$0xff] }
  0x3e   :  { %90 = vst [vmem:[#allocation2 + $0x8] sm:$0xff] %v3028_v0  ;;  %93 = vst [vmem:[#allocation2 + $0x20] sm:$0xff] %v3028_v0  ;;  %1296 = vmatpush1.msra.mxu0 %v3028_v0  ;;  %1436 = vmatprep.mubr.f32.mxu1 %v3028_v0  ;;  %v963_v4 = vld [vmem:[#allocation9] sm:$0xff]  ;;  %v1071_v5 = vld [vmem:[#allocation10] sm:$0xff]  ;;  %vm643_vm1 = vcmask 1048320   ;;  %vm557_vm2 = vcmask 523520  }
  0x3f   :  { %97 = vst [vmem:[#allocation2 + $0x40] sm:$0xff] %v3028_v0  ;;  %101 = vst [vmem:[#allocation2 + $0x60] sm:$0xff] %v3028_v0  ;;  %1297 = vmatprep.subr.mxu0 %v3028_v0  ;;  %1061 = vrot.lane.b32.xlu0 %v1059_v1, %s3029_s2  ;;  %v3252_v6 = vld [vmem:[#allocation12 + $0x18] sm:$0xff]  ;;  %v3254_v7 = vld [vmem:[#allocation12 + $0x10] sm:$0xff]  ;;  %vm600_vm3 = vcmask 785920  }
  0x40   :  { %105 = vst [vmem:[#allocation2 + $0x80] sm:$0xff] %v3028_v0  ;;  %109 = vst [vmem:[#allocation2 + $0xa0] sm:$0xff] %v3028_v0  ;;  %1298 = vmatpush1.msra.mxu0 %v3028_v0  ;;  %977 = vrot.lane.b32.xlu1 %v1059_v1, %s3030_s4  ;;  %v3258_v8 = vld [vmem:[#allocation12 + $0x8] sm:$0xff]  ;;  %v3260_v9 = vld [vmem:[#allocation12] sm:$0xff] }
  0x41   :  { %113 = vst [vmem:[#allocation2 + $0xc0] sm:$0xff] %v3028_v0  ;;  %117 = vst [vmem:[#allocation2 + $0xe0] sm:$0xff] %v3028_v0  ;;  %1299 = vmatprep.subr.mxu0 %v3028_v0  ;;  %v3369_v45 = vld [vmem:[#allocation4] sm:$0xff] }
  0x42   :  { %121 = vst [vmem:[#allocation2 + $0x100] sm:$0xff] %v3028_v0  ;;  %125 = vst [vmem:[#allocation2 + $0x120] sm:$0xff] %v3028_v0  ;;  %1300 = vmatpush1.msra.mxu0 %v3028_v0 }
  0x43   :  { %129 = vst [vmem:[#allocation2 + $0x140] sm:$0xff] %v3028_v0  ;;  %133 = vst [vmem:[#allocation2 + $0x160] sm:$0xff] %v3028_v0  ;;  %1301 = vmatprep.subr.mxu0 %v3028_v0  ;;  %1019 = vrot.lane.b32.xlu0 %v1059_v1, %s3031_s25 }
  0x44   :  { %138 = vst [vmem:[#allocation2 + $0x188] sm:$0xff] %v3028_v0  ;;  %142 = vst [vmem:[#allocation2 + $0x1a8] sm:$0xff] %v3028_v0  ;;  %1302 = vmatpush1.msra.mxu0 %v3028_v0  ;;  %921 = vrot.lane.b32.xlu1 %v1059_v1, %s3029_s2 }
  0x45   :  { %146 = vst [vmem:[#allocation2 + $0x1c8] sm:$0xff] %v3028_v0  ;;  %150 = vst [vmem:[#allocation2 + $0x1e8] sm:$0xff] %v3028_v0  ;;  %1303 = vmatprep.subr.mxu0 %v3028_v0  ;;  %v3322_v17 = vld [vmem:[#allocation2 + $0x8] sm:$0xff] }
  0x46   :  { %154 = vst [vmem:[#allocation2 + $0x208] sm:$0xff] %v3028_v0  ;;  %158 = vst [vmem:[#allocation2 + $0x228] sm:$0xff] %v3028_v0  ;;  %1304 = vmatpush1.msra.mxu0 %v3028_v0 }
  0x47   :  { %162 = vst [vmem:[#allocation2 + $0x248] sm:$0xff] %v3028_v0  ;;  %166 = vst [vmem:[#allocation2 + $0x268] sm:$0xff] %v3028_v0  ;;  %1305 = vmatprep.subr.mxu0 %v3028_v0  ;;  %879 = vrot.lane.b32.xlu0 %v1059_v1, %s3031_s25 }
  0x48   :  { %170 = vst [vmem:[#allocation2 + $0x288] sm:$0xff] %v3028_v0  ;;  %174 = vst [vmem:[#allocation2 + $0x2a8] sm:$0xff] %v3028_v0  ;;  %1306 = vmatpush1.msra.mxu0 %v3028_v0  ;;  %837 = vrot.lane.b32.xlu1 %v1059_v1, %s3030_s4 }
  0x49   :  { %178 = vst [vmem:[#allocation2 + $0x2c8] sm:$0xff] %v3028_v0  ;;  %182 = vst [vmem:[#allocation2 + $0x2e8] sm:$0xff] %v3028_v0  ;;  %1307 = vmatprep.subr.mxu0 %v3028_v0 }
  0x4a   :  { %187 = vst [vmem:[#allocation2 + $0x310] sm:$0xff] %v3028_v0  ;;  %191 = vst [vmem:[#allocation2 + $0x330] sm:$0xff] %v3028_v0  ;;  %1308 = vmatpush1.msra.mxu0 %v3028_v0 }
  0x4b   :  { %195 = vst [vmem:[#allocation2 + $0x350] sm:$0xff] %v3028_v0  ;;  %199 = vst [vmem:[#allocation2 + $0x370] sm:$0xff] %v3028_v0  ;;  %1309 = vmatprep.subr.mxu0 %v3028_v0  ;;  %781 = vrot.lane.b32.xlu0 %v1059_v1, %s3029_s2 }
  0x4c   :  { %203 = vst [vmem:[#allocation2 + $0x390] sm:$0xff] %v3028_v0  ;;  %207 = vst [vmem:[#allocation2 + $0x3b0] sm:$0xff] %v3028_v0  ;;  %1310 = vmatpush1.msra.mxu0 %v3028_v0  ;;  %739 = vrot.lane.b32.xlu1 %v1059_v1, %s3031_s25 }
  0x4d   :  { %211 = vst [vmem:[#allocation2 + $0x3d0] sm:$0xff] %v3028_v0  ;;  %215 = vst [vmem:[#allocation2 + $0x3f0] sm:$0xff] %v3028_v0 }
  0x4e   :  { %219 = vst [vmem:[#allocation2 + $0x410] sm:$0xff] %v3028_v0  ;;  %223 = vst [vmem:[#allocation2 + $0x430] sm:$0xff] %v3028_v0 }
  0x4f   :  { %227 = vst [vmem:[#allocation2 + $0x450] sm:$0xff] %v3028_v0  ;;  %231 = vst [vmem:[#allocation2 + $0x470] sm:$0xff] %v3028_v0  ;;  %697 = vrot.lane.b32.xlu0 %v1059_v1, %s3030_s4 }
  0x50   :  { %236 = vst [vmem:[#allocation2 + $0x498] sm:$0xff] %v3028_v0  ;;  %240 = vst [vmem:[#allocation2 + $0x4b8] sm:$0xff] %v3028_v0  ;;  %640 = vrot.lane.b32.xlu1 %v1059_v1, %s3029_s2 }
  0x51   :  { %244 = vst [vmem:[#allocation2 + $0x4d8] sm:$0xff] %v3028_v0  ;;  %248 = vst [vmem:[#allocation2 + $0x4f8] sm:$0xff] %v3028_v0 }
  0x52   :  { %252 = vst [vmem:[#allocation2 + $0x518] sm:$0xff] %v3028_v0  ;;  %256 = vst [vmem:[#allocation2 + $0x538] sm:$0xff] %v3028_v0 }
  0x53   :  { %260 = vst [vmem:[#allocation2 + $0x558] sm:$0xff] %v3028_v0  ;;  %264 = vst [vmem:[#allocation2 + $0x578] sm:$0xff] %v3028_v0  ;;  %597 = vrot.lane.b32.xlu0 %v1059_v1, %s3031_s25 }
  0x54   :  { %268 = vst [vmem:[#allocation2 + $0x598] sm:$0xff] %v3028_v0  ;;  %276 = vst [vmem:[#allocation2 + $0x5d8] sm:$0xff] %v3028_v0  ;;  %554 = vrot.lane.b32.xlu1 %v1059_v1, %s3030_s4  ;;  %v3418_v1 = vld [vmem:[#allocation4 + $0x8] sm:$0xff] }
  0x55   :  { %280 = vst [vmem:[#allocation2 + $0x5f8] sm:$0xff] %v3028_v0  ;;  %281 = vst [vmem:[#allocation3] sm:$0xff] %v3028_v0 }
  0x56   :  { %285 = vst [vmem:[#allocation3 + $0x20] sm:$0xff] %v3028_v0  ;;  %289 = vst [vmem:[#allocation3 + $0x40] sm:$0xff] %v3028_v0 }
  0x57   :  { %293 = vst [vmem:[#allocation3 + $0x60] sm:$0xff] %v3028_v0  ;;  %297 = vst [vmem:[#allocation3 + $0x80] sm:$0xff] %v3028_v0  ;;  %1067 = vrot.lane.b32.xlu0 %v1065_v3, %s3029_s2 }
  0x58   :  { %301 = vst [vmem:[#allocation3 + $0xa0] sm:$0xff] %v3028_v0  ;;  %305 = vst [vmem:[#allocation3 + $0xc0] sm:$0xff] %v3028_v0  ;;  %1025 = vrot.lane.b32.xlu1 %v1065_v3, %s3031_s25 }
  0x59   :  { %309 = vst [vmem:[#allocation3 + $0xe0] sm:$0xff] %v3028_v0  ;;  %313 = vst [vmem:[#allocation3 + $0x100] sm:$0xff] %v3028_v0 }
  0x5a   :  { %317 = vst [vmem:[#allocation3 + $0x120] sm:$0xff] %v3028_v0  ;;  %321 = vst [vmem:[#allocation3 + $0x140] sm:$0xff] %v3028_v0 }
  0x5b   :  { %325 = vst [vmem:[#allocation3 + $0x160] sm:$0xff] %v3028_v0  ;;  %329 = vst [vmem:[#allocation3 + $0x180] sm:$0xff] %v3028_v0  ;;  %983 = vrot.lane.b32.xlu0 %v1065_v3, %s3030_s4 }
  0x5c   :  { %333 = vst [vmem:[#allocation3 + $0x1a0] sm:$0xff] %v3028_v0  ;;  %337 = vst [vmem:[#allocation3 + $0x1c0] sm:$0xff] %v3028_v0  ;;  %927 = vrot.lane.b32.xlu1 %v1065_v3, %s3029_s2 }
  0x5d   :  { %341 = vst [vmem:[#allocation3 + $0x1e0] sm:$0xff] %v3028_v0  ;;  %346 = vst [vmem:[#allocation3 + $0x208] sm:$0xff] %v3028_v0 }
  0x5e   :  { %350 = vst [vmem:[#allocation3 + $0x228] sm:$0xff] %v3028_v0  ;;  %354 = vst [vmem:[#allocation3 + $0x248] sm:$0xff] %v3028_v0 }
  0x5f   :  { %358 = vst [vmem:[#allocation3 + $0x268] sm:$0xff] %v3028_v0  ;;  %362 = vst [vmem:[#allocation3 + $0x288] sm:$0xff] %v3028_v0  ;;  %885 = vrot.lane.b32.xlu0 %v1065_v3, %s3031_s25 }
  0x60   :  { %366 = vst [vmem:[#allocation3 + $0x2a8] sm:$0xff] %v3028_v0  ;;  %370 = vst [vmem:[#allocation3 + $0x2c8] sm:$0xff] %v3028_v0  ;;  %843 = vrot.lane.b32.xlu1 %v1065_v3, %s3030_s4 }
  0x61   :  { %374 = vst [vmem:[#allocation3 + $0x2e8] sm:$0xff] %v3028_v0  ;;  %378 = vst [vmem:[#allocation3 + $0x308] sm:$0xff] %v3028_v0 }
  0x62   :  { %382 = vst [vmem:[#allocation3 + $0x328] sm:$0xff] %v3028_v0  ;;  %386 = vst [vmem:[#allocation3 + $0x348] sm:$0xff] %v3028_v0 }
  0x63   :  { %390 = vst [vmem:[#allocation3 + $0x368] sm:$0xff] %v3028_v0  ;;  %394 = vst [vmem:[#allocation3 + $0x388] sm:$0xff] %v3028_v0  ;;  %787 = vrot.lane.b32.xlu0 %v1065_v3, %s3029_s2 }
  0x64   :  { %398 = vst [vmem:[#allocation3 + $0x3a8] sm:$0xff] %v3028_v0  ;;  %402 = vst [vmem:[#allocation3 + $0x3c8] sm:$0xff] %v3028_v0  ;;  %745 = vrot.lane.b32.xlu1 %v1065_v3, %s3031_s25 }
  0x65   :  { %406 = vst [vmem:[#allocation3 + $0x3e8] sm:$0xff] %v3028_v0  ;;  %411 = vst [vmem:[#allocation3 + $0x410] sm:$0xff] %v3028_v0 }
  0x66   :  { %415 = vst [vmem:[#allocation3 + $0x430] sm:$0xff] %v3028_v0  ;;  %419 = vst [vmem:[#allocation3 + $0x450] sm:$0xff] %v3028_v0 }
  0x67   :  { %423 = vst [vmem:[#allocation3 + $0x470] sm:$0xff] %v3028_v0  ;;  %427 = vst [vmem:[#allocation3 + $0x490] sm:$0xff] %v3028_v0  ;;  %703 = vrot.lane.b32.xlu0 %v1065_v3, %s3030_s4 }
  0x68   :  { %431 = vst [vmem:[#allocation3 + $0x4b0] sm:$0xff] %v3028_v0  ;;  %435 = vst [vmem:[#allocation3 + $0x4d0] sm:$0xff] %v3028_v0  ;;  %647 = vrot.lane.b32.xlu1 %v1065_v3, %s3029_s2 }
  0x69   :  { %439 = vst [vmem:[#allocation3 + $0x4f0] sm:$0xff] %v3028_v0  ;;  %443 = vst [vmem:[#allocation3 + $0x510] sm:$0xff] %v3028_v0 }
  0x6a   :  { %447 = vst [vmem:[#allocation3 + $0x530] sm:$0xff] %v3028_v0  ;;  %451 = vst [vmem:[#allocation3 + $0x550] sm:$0xff] %v3028_v0 }
  0x6b   :  { %455 = vst [vmem:[#allocation3 + $0x570] sm:$0xff] %v3028_v0  ;;  %459 = vst [vmem:[#allocation3 + $0x590] sm:$0xff] %v3028_v0  ;;  %604 = vrot.lane.b32.xlu0 %v1065_v3, %s3031_s25 }
  0x6c   :  { %463 = vst [vmem:[#allocation3 + $0x5b0] sm:$0xff] %v3028_v0  ;;  %467 = vst [vmem:[#allocation3 + $0x5d0] sm:$0xff] %v3028_v0  ;;  %561 = vrot.lane.b32.xlu1 %v1065_v3, %s3030_s4 }
  0x6d   :  { %471 = vst [vmem:[#allocation3 + $0x5f0] sm:$0xff] %v3028_v0  ;;  %476 = vst [vmem:[#allocation3 + $0x618] sm:$0xff] %v3028_v0 }
  0x6e   :  { %480 = vst [vmem:[#allocation3 + $0x638] sm:$0xff] %v3028_v0  ;;  %484 = vst [vmem:[#allocation3 + $0x658] sm:$0xff] %v3028_v0 }
  0x6f   :  { %488 = vst [vmem:[#allocation3 + $0x678] sm:$0xff] %v3028_v0  ;;  %492 = vst [vmem:[#allocation3 + $0x698] sm:$0xff] %v3028_v0  ;;  %1073 = vrot.lane.b32.xlu0 %v1071_v5, %s3029_s2 }
  0x70   :  { %496 = vst [vmem:[#allocation3 + $0x6b8] sm:$0xff] %v3028_v0  ;;  %500 = vst [vmem:[#allocation3 + $0x6d8] sm:$0xff] %v3028_v0  ;;  %1031 = vrot.lane.b32.xlu1 %v1071_v5, %s3031_s25 }
  0x71   :  { %504 = vst [vmem:[#allocation3 + $0x6f8] sm:$0xff] %v3028_v0  ;;  %508 = vst [vmem:[#allocation3 + $0x718] sm:$0xff] %v3028_v0 }
  0x72   :  { %512 = vst [vmem:[#allocation3 + $0x738] sm:$0xff] %v3028_v0  ;;  %516 = vst [vmem:[#allocation3 + $0x758] sm:$0xff] %v3028_v0 }
  0x73   :  { %520 = vst [vmem:[#allocation3 + $0x778] sm:$0xff] %v3028_v0  ;;  %524 = vst [vmem:[#allocation3 + $0x798] sm:$0xff] %v3028_v0  ;;  %989 = vrot.lane.b32.xlu0 %v1071_v5, %s3030_s4 }
  0x74   :  { %528 = vst [vmem:[#allocation3 + $0x7b8] sm:$0xff] %v3028_v0  ;;  %532 = vst [vmem:[#allocation3 + $0x7d8] sm:$0xff] %v3028_v0  ;;  %933 = vrot.lane.b32.xlu1 %v1071_v5, %s3029_s2 }
  0x75   :  { %536 = vst [vmem:[#allocation3 + $0x7f8] sm:$0xff] %v3028_v0  ;;  %962 = vst.msk [vmem:[#allocation2 + $0x498] sm:$0xff] %vm538_vm0, %v961_v2 }
  0x76   :  { %822 = vst.msk [vmem:[#allocation2 + $0x310] sm:$0xff] %vm538_vm0, %v961_v2  ;;  %682 = vst.msk [vmem:[#allocation2 + $0x188] sm:$0xff] %vm538_vm0, %v961_v2 }
  0x77   :  { %539 = vst.msk [vmem:[#allocation2] sm:$0xff] %vm538_vm0, %v961_v2  ;;  %964 = vst.msk [vmem:[#allocation2 + $0x4b8] sm:$0xff] %vm538_vm0, %v963_v4  ;;  %891 = vrot.lane.b32.xlu0 %v1071_v5, %s3031_s25 }
  0x78   :  { %824 = vst.msk [vmem:[#allocation2 + $0x330] sm:$0xff] %vm538_vm0, %v963_v4  ;;  %684 = vst.msk [vmem:[#allocation2 + $0x1a8] sm:$0xff] %vm538_vm0, %v963_v4  ;;  %849 = vrot.lane.b32.xlu1 %v1071_v5, %s3030_s4 }
  0x79   :  { %541 = vst.msk [vmem:[#allocation2 + $0x20] sm:$0xff] %vm538_vm0, %v963_v4  ;;  %966 = vst.msk [vmem:[#allocation2 + $0x4d8] sm:$0xff] %vm538_vm0, %v1071_v5 }
  0x7a   :  { %686 = vst.msk [vmem:[#allocation2 + $0x1c8] sm:$0xff] %vm538_vm0, %v1071_v5  ;;  %543 = vst.msk [vmem:[#allocation2 + $0x40] sm:$0xff] %vm538_vm0, %v1071_v5 }
  0x7b   :  { %826 = vst.msk [vmem:[#allocation2 + $0x350] sm:$0xff] %vm538_vm0, %v1071_v5  ;;  %551 = vst.msk [vmem:[#allocation3 + $0x60] sm:$0xff] %vm538_vm0, %v3252_v6  ;;  %793 = vrot.lane.b32.xlu0 %v1071_v5, %s3029_s2 }
  0x7c   :  { %550 = vst.msk [vmem:[#allocation3 + $0x40] sm:$0xff] %vm538_vm0, %v3254_v7  ;;  %549 = vst.msk [vmem:[#allocation3 + $0x20] sm:$0xff] %vm538_vm0, %v3258_v8  ;;  %751 = vrot.lane.b32.xlu1 %v1071_v5, %s3031_s25  ;;  %v1250_v22 = vld [vmem:[#allocation2 + $0x498] sm:$0xff] }
  0x7d   :  { %548 = vst.msk [vmem:[#allocation3] sm:$0xff] %vm538_vm0, %v3260_v9  ;;  %v1201_v32 = vld [vmem:[#allocation2 + $0x310] sm:$0xff]  ;;  %v1152_v34 = vld [vmem:[#allocation2 + $0x188] sm:$0xff] }
  0x7e   :  { %v1103_v44 = vld [vmem:[#allocation2] sm:$0xff]  ;;  %v1254_v55 = vld [vmem:[#allocation2 + $0x4b8] sm:$0xff] }
  0x7f   :  { %709 = vrot.lane.b32.xlu0 %v1071_v5, %s3030_s4  ;;  %v1205_v62 = vld [vmem:[#allocation2 + $0x330] sm:$0xff]  ;;  %v1156_v63 = vld [vmem:[#allocation2 + $0x1a8] sm:$0xff] }
  0x80   :  { %653 = vrot.lane.b32.xlu1 %v1071_v5, %s3029_s2  ;;  %v1107_v4 = vld [vmem:[#allocation2 + $0x20] sm:$0xff] }
  0x83   :  { %610 = vrot.lane.b32.xlu0 %v1071_v5, %s3031_s25 }
  0x84   :  { %567 = vrot.lane.b32.xlu1 %v1071_v5, %s3030_s4 }
  0x87   :  { %671 = vrot.lane.b32.xlu0 %v3252_v6, %s3029_s2 }
  0x88   :  { %669 = vrot.lane.b32.xlu1 %v3254_v7, %s3029_s2 }
  0x8b   :  { %667 = vrot.lane.b32.xlu0 %v3258_v8, %s3029_s2 }
  0x8c   :  { %665 = vrot.lane.b32.xlu1 %v3260_v9, %s3029_s2 }
  0x8f   :  { %628 = vrot.lane.b32.xlu0 %v3252_v6, %s3031_s25 }
  0x90   :  { %626 = vrot.lane.b32.xlu1 %v3254_v7, %s3031_s25 }
  0x93   :  { %624 = vrot.lane.b32.xlu0 %v3258_v8, %s3031_s25 }
  0x94   :  { %622 = vrot.lane.b32.xlu1 %v3260_v9, %s3031_s25 }
  0x97   :  { %585 = vrot.lane.b32.xlu0 %v3252_v6, %s3030_s4 }
  0x98   :  { %583 = vrot.lane.b32.xlu1 %v3254_v7, %s3030_s4 }
  0x9b   :  { %581 = vrot.lane.b32.xlu0 %v3258_v8, %s3030_s4 }
  0x9c   :  { %579 = vrot.lane.b32.xlu1 %v3260_v9, %s3030_s4 }
  0x9f   :  { %811 = vrot.lane.b32.xlu0 %v3252_v6, %s3029_s2 }
  0xa0   :  { %809 = vrot.lane.b32.xlu1 %v3254_v7, %s3029_s2 }
  0xa3   :  { %807 = vrot.lane.b32.xlu0 %v3258_v8, %s3029_s2 }
  0xa4   :  { %805 = vrot.lane.b32.xlu1 %v3260_v9, %s3029_s2 }
  0xa7   :  { %769 = vrot.lane.b32.xlu0 %v3252_v6, %s3031_s25 }
  0xa8   :  { %767 = vrot.lane.b32.xlu1 %v3254_v7, %s3031_s25 }
  0xab   :  { %765 = vrot.lane.b32.xlu0 %v3258_v8, %s3031_s25 }
  0xac   :  { %763 = vrot.lane.b32.xlu1 %v3260_v9, %s3031_s25 }
  0xaf   :  { %727 = vrot.lane.b32.xlu0 %v3252_v6, %s3030_s4 }
  0xb1   :  { %v1062_v10 = vpop.permute.xlu0 %1061 }
  0xb2   :  { %v978_v11 = vpop.permute.xlu1 %977  ;;  %1064 = vst.msk [vmem:[#allocation2 + $0x5b8] sm:$0xff] %vm643_vm1, %v1062_v10 }
  0xb3   :  { %980 = vst.msk [vmem:[#allocation2 + $0x4f8] sm:$0xff] %vm557_vm2, %v978_v11 }
  0xb5   :  { %v1020_v12 = vpop.permute.xlu0 %1019 }
  0xb6   :  { %v922_v13 = vpop.permute.xlu1 %921  ;;  %1022 = vst.msk [vmem:[#allocation2 + $0x558] sm:$0xff] %vm600_vm3, %v1020_v12 }
  0xb7   :  { %924 = vst.msk [vmem:[#allocation2 + $0x430] sm:$0xff] %vm643_vm1, %v922_v13 }
  0xb9   :  { %v880_v14 = vpop.permute.xlu0 %879  ;;  %v1286_v15 = vld [vmem:[#allocation2 + $0x5b8] sm:$0xff] }
  0xba   :  { %v838_v16 = vpop.permute.xlu1 %837  ;;  %882 = vst.msk [vmem:[#allocation2 + $0x3d0] sm:$0xff] %vm600_vm3, %v880_v14  ;;  %1372 = vmatprep.subr.mxu1 %v1286_v15  ;;  %v1262_v21 = vld [vmem:[#allocation2 + $0x4f8] sm:$0xff] }
  0xbb   :  { %840 = vst.msk [vmem:[#allocation2 + $0x370] sm:$0xff] %vm557_vm2, %v838_v16  ;;  %1373 = vmatpush1.msra.mxu1 %v3322_v17 }
  0xbd   :  { %v782_v18 = vpop.permute.xlu0 %781  ;;  %v1274_v19 = vld [vmem:[#allocation2 + $0x558] sm:$0xff] }
  0xbe   :  { %v740_v20 = vpop.permute.xlu1 %739  ;;  %784 = vst.msk [vmem:[#allocation2 + $0x2a8] sm:$0xff] %vm643_vm1, %v782_v18  ;;  %1374 = vmatprep.subr.mxu1 %v1274_v19  ;;  %v1237_v25 = vld [vmem:[#allocation2 + $0x430] sm:$0xff] }
  0xbf   :  { %742 = vst.msk [vmem:[#allocation2 + $0x248] sm:$0xff] %vm600_vm3, %v740_v20  ;;  %1375 = vmatpush1.msra.mxu1 %v3322_v17 }
  0xc0   :  { %1376 = vmatprep.subr.mxu1 %v1262_v21 }
  0xc1   :  { %v698_v23 = vpop.permute.xlu0 %697  ;;  %1377 = vmatpush1.msra.mxu1 %v3322_v17  ;;  %v1225_v30 = vld [vmem:[#allocation2 + $0x3d0] sm:$0xff] }
  0xc2   :  { %v641_v24 = vpop.permute.xlu1 %640  ;;  %700 = vst.msk [vmem:[#allocation2 + $0x1e8] sm:$0xff] %vm557_vm2, %v698_v23  ;;  %1378 = vmatprep.subr.mxu1 %v1250_v22  ;;  %v1213_v31 = vld [vmem:[#allocation2 + $0x370] sm:$0xff] }
  0xc3   :  { %644 = vst.msk [vmem:[#allocation2 + $0x120] sm:$0xff] %vm643_vm1, %v641_v24  ;;  %1379 = vmatpush1.msra.mxu1 %v3322_v17 }
  0xc4   :  { %1380 = vmatprep.subr.mxu1 %v3322_v17 }
  0xc5   :  { %1381 = vmatpush1.msra.mxu1 %v1237_v25  ;;  %v1188_v26 = vld [vmem:[#allocation2 + $0x2a8] sm:$0xff]  ;;  %v598_v27 = vpop.permute.xlu0 %597 }
  0xc6   :  { %v1176_v28 = vld [vmem:[#allocation2 + $0x248] sm:$0xff]  ;;  %v555_v29 = vpop.permute.xlu1 %554  ;;  %1311 = vmatprep.subr.mxu0 %v1188_v26  ;;  %1382 = vmatprep.subr.mxu1 %v3322_v17  ;;  %601 = vst.msk [vmem:[#allocation2 + $0xc0] sm:$0xff] %vm600_vm3, %v598_v27  ;;  %v1258_v26 = vld [vmem:[#allocation2 + $0x4d8] sm:$0xff] }
  0xc7   :  { %558 = vst.msk [vmem:[#allocation2 + $0x60] sm:$0xff] %vm557_vm2, %v555_v29  ;;  %1312 = vmatpush1.msra.mxu0 %v3322_v17  ;;  %1383 = vmatpush1.msra.mxu1 %v1225_v30  ;;  %v1160_v29 = vld [vmem:[#allocation2 + $0x1c8] sm:$0xff] }
  0xc8   :  { %1313 = vmatprep.subr.mxu0 %v1176_v28  ;;  %1384 = vmatprep.subr.mxu1 %v3322_v17 }
  0xc9   :  { %1314 = vmatpush1.msra.mxu0 %v3322_v17  ;;  %1385 = vmatpush1.msra.mxu1 %v1213_v31  ;;  %v1164_v33 = vld [vmem:[#allocation2 + $0x1e8] sm:$0xff]  ;;  %v1068_v35 = vpop.permute.xlu0 %1067 }
  0xca   :  { %v1026_v36 = vpop.permute.xlu1 %1025  ;;  %1315 = vmatprep.subr.mxu0 %v1164_v33  ;;  %1386 = vmatprep.subr.mxu1 %v3322_v17  ;;  %1070 = vst.msk [vmem:[#allocation2 + $0x5d8] sm:$0xff] %vm643_vm1, %v1068_v35  ;;  %v1139_v37 = vld [vmem:[#allocation2 + $0x120] sm:$0xff] }
  0xcb   :  { %1028 = vst.msk [vmem:[#allocation2 + $0x578] sm:$0xff] %vm600_vm3, %v1026_v36  ;;  %1316 = vmatpush1.msra.mxu0 %v3322_v17  ;;  %1387 = vmatpush1.msra.mxu1 %v1201_v32 }
  0xcc   :  { %1317 = vmatprep.subr.mxu0 %v1152_v34  ;;  %1388 = vmatprep.subr.mxu1 %v3322_v17 }
  0xcd   :  { %1318 = vmatpush1.msra.mxu0 %v3322_v17  ;;  %1389 = vmatpush1.msra.mxu1 %v3322_v17  ;;  %v984_v38 = vpop.permute.xlu0 %983  ;;  %v1127_v40 = vld [vmem:[#allocation2 + $0xc0] sm:$0xff] }
  0xce   :  { %v928_v39 = vpop.permute.xlu1 %927  ;;  %1319 = vmatprep.subr.mxu0 %v3322_v17  ;;  %1390 = vmatprep.subr.mxu1 %v3322_v17  ;;  %986 = vst.msk [vmem:[#allocation2 + $0x518] sm:$0xff] %vm557_vm2, %v984_v38  ;;  %v1115_v41 = vld [vmem:[#allocation2 + $0x60] sm:$0xff] }
  0xcf   :  { %930 = vst.msk [vmem:[#allocation2 + $0x450] sm:$0xff] %vm643_vm1, %v928_v39  ;;  %1320 = vmatpush1.msra.mxu0 %v1139_v37  ;;  %1391 = vmatpush1.msra.mxu1 %v3322_v17 }
  0xd0   :  { %1321 = vmatprep.subr.mxu0 %v3322_v17  ;;  %1392 = vmatprep.subr.mxu1 %v3322_v17 }
  0xd1   :  { %1322 = vmatpush1.msra.mxu0 %v1127_v40  ;;  %1393 = vmatpush1.msra.mxu1 %v3322_v17  ;;  %v886_v42 = vpop.permute.xlu0 %885  ;;  %v1290_v50 = vld [vmem:[#allocation2 + $0x5d8] sm:$0xff]  ;;  %v1111_v40 = vld [vmem:[#allocation2 + $0x40] sm:$0xff] }
  0xd2   :  { %v844_v43 = vpop.permute.xlu1 %843  ;;  %1323 = vmatprep.subr.mxu0 %v3322_v17  ;;  %1394 = vmatprep.subr.mxu1 %v3322_v17  ;;  %888 = vst.msk [vmem:[#allocation2 + $0x3f0] sm:$0xff] %vm600_vm3, %v886_v42  ;;  %v1278_v53 = vld [vmem:[#allocation2 + $0x578] sm:$0xff] }
  0xd3   :  { %846 = vst.msk [vmem:[#allocation2 + $0x390] sm:$0xff] %vm557_vm2, %v844_v43  ;;  %1324 = vmatpush1.msra.mxu0 %v1115_v41  ;;  %1395 = vmatpush1.msra.mxu1 %v3322_v17 }
  0xd4   :  { %1325 = vmatprep.subr.mxu0 %v3322_v17  ;;  %1396 = vmatprep.subr.mxu1 %v3322_v17 }
  0xd5   :  { %1326 = vmatpush1.msra.mxu0 %v1103_v44  ;;  %1397 = vmatpush1.msra.mxu1 %v3322_v17  ;;  %v788_v46 = vpop.permute.xlu0 %787  ;;  %v1266_v54 = vld [vmem:[#allocation2 + $0x518] sm:$0xff] }
  0xd6   :  { %v746_v47 = vpop.permute.xlu1 %745  ;;  %1360 = vmatmul.mubr.f32.vlgmr.msra.gmra.mxu0 %v3369_v45  ;;  %1398 = vmatprep.subr.mxu1 %v3322_v17  ;;  %790 = vst.msk [vmem:[#allocation2 + $0x2c8] sm:$0xff] %vm643_vm1, %v788_v46  ;;  %v1241_v57 = vld [vmem:[#allocation2 + $0x450] sm:$0xff] }
  0xd7   :  { %748 = vst.msk [vmem:[#allocation2 + $0x268] sm:$0xff] %vm600_vm3, %v746_v47  ;;  %1449 = vmatprep.subr.mxu0 %v3322_v17  ;;  %1399 = vmatpush1.msra.mxu1 %v3322_v17 }
  0xd8   :  { %1450 = vmatpush1.msra.mxu0 %v3322_v17  ;;  %1400 = vmatprep.subr.mxu1 %v3322_v17 }
  0xd9   :  { %1451 = vmatprep.subr.mxu0 %v3322_v17  ;;  %1401 = vmatpush1.msra.mxu1 %v3322_v17  ;;  %v704_v48 = vpop.permute.xlu0 %703  ;;  %v1229_v59 = vld [vmem:[#allocation2 + $0x3f0] sm:$0xff] }
  0xda   :  { %v648_v49 = vpop.permute.xlu1 %647  ;;  %1452 = vmatpush1.msra.mxu0 %v3322_v17  ;;  %1402 = vmatprep.subr.mxu1 %v3322_v17  ;;  %706 = vst.msk [vmem:[#allocation2 + $0x208] sm:$0xff] %vm557_vm2, %v704_v48  ;;  %v1217_v61 = vld [vmem:[#allocation2 + $0x390] sm:$0xff] }
  0xdb   :  { %650 = vst.msk [vmem:[#allocation2 + $0x140] sm:$0xff] %vm643_vm1, %v648_v49  ;;  %1453 = vmatprep.subr.mxu0 %v3322_v17  ;;  %1403 = vmatpush1.msra.mxu1 %v3322_v17 }
  0xdc   :  { %1454 = vmatpush1.msra.mxu0 %v3322_v17  ;;  %1526 = vmatprep.subr.mxu1 %v1290_v50 }
  0xdd   :  { %1455 = vmatprep.subr.mxu0 %v3322_v17  ;;  %1437 = vmatmul.mubr.f32.vlgmr.msra.gmra.mxu1 %v3369_v45  ;;  %v605_v51 = vpop.permute.xlu0 %604  ;;  %v1192_v56 = vld [vmem:[#allocation2 + $0x2c8] sm:$0xff] }
  0xde   :  { %v562_v52 = vpop.permute.xlu1 %561  ;;  %1456 = vmatpush1.msra.mxu0 %v3322_v17  ;;  %1527 = vmatpush1.msra.mxu1 %v3322_v17  ;;  %607 = vst.msk [vmem:[#allocation2 + $0xe0] sm:$0xff] %vm600_vm3, %v605_v51  ;;  %v1180_v58 = vld [vmem:[#allocation2 + $0x268] sm:$0xff] }
  0xdf   :  { %564 = vst.msk [vmem:[#allocation2 + $0x80] sm:$0xff] %vm557_vm2, %v562_v52  ;;  %1457 = vmatprep.subr.mxu0 %v3322_v17  ;;  %1528 = vmatprep.subr.mxu1 %v1278_v53 }
  0xe0   :  { %1458 = vmatpush1.msra.mxu0 %v3322_v17  ;;  %1529 = vmatpush1.msra.mxu1 %v3322_v17 }
  0xe1   :  { %1459 = vmatprep.subr.mxu0 %v3322_v17  ;;  %1530 = vmatprep.subr.mxu1 %v1266_v54  ;;  %v1168_v60 = vld [vmem:[#allocation2 + $0x208] sm:$0xff]  ;;  %v1074_v5 = vpop.permute.xlu0 %1073 }
  0xe2   :  { %1460 = vmatpush1.msra.mxu0 %v3322_v17  ;;  %1531 = vmatpush1.msra.mxu1 %v3322_v17  ;;  %v1143_v0 = vld [vmem:[#allocation2 + $0x140] sm:$0xff]  ;;  %1076 = vst.msk [vmem:[#allocation2 + $0x5f8] sm:$0xff] %vm643_vm1, %v1074_v5  ;;  %v1032_v10 = vpop.permute.xlu1 %1031 }
  0xe3   :  { %1461 = vmatprep.subr.mxu0 %v3322_v17  ;;  %1532 = vmatprep.subr.mxu1 %v1254_v55  ;;  %1034 = vst.msk [vmem:[#allocation2 + $0x598] sm:$0xff] %vm600_vm3, %v1032_v10  ;;  %v2244_v10 = vld [vmem:[#allocation3 + $0x20] sm:$0xff] }
  0xe4   :  { %1462 = vmatpush1.msra.mxu0 %v3322_v17  ;;  %1533 = vmatpush1.msra.mxu1 %v3322_v17 }
  0xe5   :  { %1463 = vmatprep.subr.mxu0 %v3322_v17  ;;  %1534 = vmatprep.subr.mxu1 %v3322_v17  ;;  %v1131_v2 = vld [vmem:[#allocation2 + $0xe0] sm:$0xff]  ;;  %v990_v11 = vpop.permute.xlu0 %989 }
  0xe6   :  { %1464 = vmatpush1.msra.mxu0 %v3322_v17  ;;  %1535 = vmatpush1.msra.mxu1 %v1241_v57  ;;  %v1119_v3 = vld [vmem:[#allocation2 + $0x80] sm:$0xff]  ;;  %992 = vst.msk [vmem:[#allocation2 + $0x538] sm:$0xff] %vm557_vm2, %v990_v11  ;;  %v934_v12 = vpop.permute.xlu1 %933  ;;  %v1209_v57 = vld [vmem:[#allocation2 + $0x350] sm:$0xff] }
  0xe7   :  { %1465 = vmatprep.subr.mxu0 %v1192_v56  ;;  %1536 = vmatprep.subr.mxu1 %v3322_v17  ;;  %936 = vst.msk [vmem:[#allocation2 + $0x470] sm:$0xff] %vm643_vm1, %v934_v12  ;;  %v2240_v12 = vld [vmem:[#allocation3] sm:$0xff] }
  0xe8   :  { %1466 = vmatpush1.msra.mxu0 %v3322_v17  ;;  %1537 = vmatpush1.msra.mxu1 %v1229_v59 }
  0xe9   :  { %1467 = vmatprep.subr.mxu0 %v1180_v58  ;;  %1538 = vmatprep.subr.mxu1 %v3322_v17  ;;  %v892_v13 = vpop.permute.xlu0 %891  ;;  %v1294_v19 = vld [vmem:[#allocation2 + $0x5f8] sm:$0xff] }
  0xea   :  { %1468 = vmatpush1.msra.mxu0 %v3322_v17  ;;  %1539 = vmatpush1.msra.mxu1 %v1217_v61  ;;  %894 = vst.msk [vmem:[#allocation2 + $0x410] sm:$0xff] %vm600_vm3, %v892_v13  ;;  %v850_v14 = vpop.permute.xlu1 %849  ;;  %v1282_v20 = vld [vmem:[#allocation2 + $0x598] sm:$0xff] }
  0xeb   :  { %1469 = vmatprep.subr.mxu0 %v1168_v60  ;;  %1540 = vmatprep.subr.mxu1 %v3322_v17  ;;  %852 = vst.msk [vmem:[#allocation2 + $0x3b0] sm:$0xff] %vm557_vm2, %v850_v14 }
  0xec   :  { %1470 = vmatpush1.msra.mxu0 %v3322_v17  ;;  %1541 = vmatpush1.msra.mxu1 %v1205_v62 }
  0xed   :  { %1471 = vmatprep.subr.mxu0 %v1156_v63  ;;  %1542 = vmatprep.subr.mxu1 %v3322_v17  ;;  %v794_v15 = vpop.permute.xlu0 %793  ;;  %v1270_v23 = vld [vmem:[#allocation2 + $0x538] sm:$0xff] }
  0xee   :  { %1472 = vmatpush1.msra.mxu0 %v3322_v17  ;;  %1543 = vmatpush1.msra.mxu1 %v3322_v17  ;;  %796 = vst.msk [vmem:[#allocation2 + $0x2e8] sm:$0xff] %vm643_vm1, %v794_v15  ;;  %v752_v16 = vpop.permute.xlu1 %751  ;;  %v1245_v30 = vld [vmem:[#allocation2 + $0x470] sm:$0xff] }
  0xef   :  { %1473 = vmatprep.subr.mxu0 %v3322_v17  ;;  %1544 = vmatprep.subr.mxu1 %v3322_v17  ;;  %754 = vst.msk [vmem:[#allocation2 + $0x288] sm:$0xff] %vm600_vm3, %v752_v16 }
  0xf0   :  { %1365 = vmatprep.mubr.f32.mxu0 %v3322_v17  ;;  %1474 = vmatpush1.msra.mxu0 %v1143_v0 }
  0xf1   :  { %1545 = vmatpush1.msra.mxu1 %v3322_v17  ;;  %1366 = vmatmul.mubr.f32.gmra.mxu0 %v3418_v1  ;;  %v710_v18 = vpop.permute.xlu0 %709  ;;  %v1233_v32 = vld [vmem:[#allocation2 + $0x410] sm:$0xff] }
  0xf2   :  { %1475 = vmatprep.subr.mxu0 %v3322_v17  ;;  %1546 = vmatprep.subr.mxu1 %v3322_v17  ;;  %712 = vst.msk [vmem:[#allocation2 + $0x228] sm:$0xff] %vm557_vm2, %v710_v18  ;;  %v654_v21 = vpop.permute.xlu1 %653  ;;  %v1221_v35 = vld [vmem:[#allocation2 + $0x3b0] sm:$0xff] }
  0xf3   :  { %1476 = vmatpush1.msra.mxu0 %v1131_v2  ;;  %1547 = vmatpush1.msra.mxu1 %v3322_v17  ;;  %656 = vst.msk [vmem:[#allocation2 + $0x160] sm:$0xff] %vm643_vm1, %v654_v21  ;;  %v1759_v21 = vlaneseq }
  0xf4   :  { %1477 = vmatprep.subr.mxu0 %v3322_v17  ;;  %1548 = vmatprep.subr.mxu1 %v3322_v17 }
  0xf5   :  { %1478 = vmatpush1.msra.mxu0 %v1119_v3  ;;  %1549 = vmatpush1.msra.mxu1 %v3322_v17  ;;  %v1196_v22 = vld [vmem:[#allocation2 + $0x2e8] sm:$0xff]  ;;  %v611_v24 = vpop.permute.xlu0 %610  ;;  %v2252_v3 = vld [vmem:[#allocation3 + $0x60] sm:$0xff] }
  0xf6   :  { %1479 = vmatprep.subr.mxu0 %v3322_v17  ;;  %1550 = vmatprep.subr.mxu1 %v3322_v17  ;;  %v1184_v25 = vld [vmem:[#allocation2 + $0x288] sm:$0xff]  ;;  %613 = vst.msk [vmem:[#allocation2 + $0x100] sm:$0xff] %vm600_vm3, %v611_v24  ;;  %v568_v27 = vpop.permute.xlu1 %567 }
  0xf7   :  { %1480 = vmatpush1.msra.mxu0 %v1107_v4  ;;  %1513 = vmatprep.mubr.f32.mxu0 %v3322_v17  ;;  %570 = vst.msk [vmem:[#allocation2 + $0xa0] sm:$0xff] %vm557_vm2, %v568_v27  ;;  %v2248_v4 = vld [vmem:[#allocation3 + $0x40] sm:$0xff] }
  0xf8   :  { %1551 = vmatpush1.msra.mxu1 %v3322_v17  ;;  %1514 = vmatmul.mubr.f32.vlgmr.msra.gmra.mxu0 %v3369_v45 }
  0xf9   :  { %1552 = vmatprep.subr.mxu1 %v3322_v17  ;;  %1442 = vmatprep.mubr.f32.mxu1 %v3322_v17  ;;  %v1172_v28 = vld [vmem:[#allocation2 + $0x228] sm:$0xff]  ;;  %v672_v31 = vpop.permute.xlu0 %671 }
  0xfa   :  { %1553 = vmatpush1.msra.mxu1 %v3322_v17  ;;  %1519 = vmatprep.mubr.f32.mxu0 %v3322_v17  ;;  %v1147_v33 = vld [vmem:[#allocation2 + $0x160] sm:$0xff]  ;;  %v670_v34 = vpop.permute.xlu1 %669  ;;  %680 = vst.msk [vmem:[#allocation3 + $0x1e0] sm:$0xff] %vm643_vm1, %v672_v31 }
  0xfb   :  { %1443 = vmatmul.mubr.f32.gmra.mxu1 %v3418_v1  ;;  %1554 = vmatprep.subr.mxu1 %v3322_v17  ;;  %679 = vst.msk [vmem:[#allocation3 + $0x1c0] sm:$0xff] %vm643_vm1, %v670_v34 }
  0xfc   :  { %1555 = vmatpush1.msra.mxu1 %v3322_v17  ;;  %1520 = vmatmul.mubr.f32.gmra.mxu0 %v3418_v1 }
  0xfd   :  { %1556 = vmatprep.subr.mxu1 %v3322_v17  ;;  %1590 = vmatprep.mubr.f32.mxu1 %v3322_v17  ;;  %v1135_v36 = vld [vmem:[#allocation2 + $0x100] sm:$0xff]  ;;  %v668_v37 = vpop.permute.xlu0 %667 }
  0xfe   :  { %1557 = vmatpush1.msra.mxu1 %v3322_v17  ;;  %1603 = vmatprep.subr.mxu0 %v3322_v17  ;;  %v1123_v38 = vld [vmem:[#allocation2 + $0xa0] sm:$0xff]  ;;  %v666_v39 = vpop.permute.xlu1 %665  ;;  %678 = vst.msk [vmem:[#allocation3 + $0x1a0] sm:$0xff] %vm643_vm1, %v668_v37 }
  0xff   :  { %1591 = vmatmul.mubr.f32.vlgmr.msra.gmra.mxu1 %v3369_v45  ;;  %1604 = vmatpush1.msra.mxu0 %v3322_v17  ;;  %677 = vst.msk [vmem:[#allocation3 + $0x180] sm:$0xff] %vm643_vm1, %v666_v39 }
 0x100   :  { %1596 = vmatprep.mubr.f32.mxu1 %v3322_v17  ;;  %1605 = vmatprep.subr.mxu0 %v3322_v17 }
 0x101   :  { %1606 = vmatpush1.msra.mxu0 %v3322_v17  ;;  %1667 = vmatprep.mubr.f32.mxu0 %v3322_v17  ;;  %v629_v41 = vpop.permute.xlu0 %628  ;;  %v2300_v42 = vld [vmem:[#allocation3 + $0x1e0] sm:$0xff] }
 0x102   :  { %1607 = vmatprep.subr.mxu0 %v3322_v17  ;;  %1680 = vmatprep.subr.mxu1 %v1294_v19  ;;  %v627_v43 = vpop.permute.xlu1 %626  ;;  %637 = vst.msk [vmem:[#allocation3 + $0x160] sm:$0xff] %vm600_vm3, %v629_v41  ;;  %v2296_v44 = vld [vmem:[#allocation3 + $0x1c0] sm:$0xff] }
 0x103   :  { %1597 = vmatmul.mubr.f32.gmra.mxu1 %v3418_v1  ;;  %1608 = vmatpush1.msra.mxu0 %v3322_v17  ;;  %636 = vst.msk [vmem:[#allocation3 + $0x140] sm:$0xff] %vm600_vm3, %v627_v43 }
 0x104   :  { %1609 = vmatprep.subr.mxu0 %v3322_v17  ;;  %1744 = vmatprep.mubr.f32.mxu1 %v3322_v17 }
 0x105   :  { %1610 = vmatpush1.msra.mxu0 %v3322_v17  ;;  %1681 = vmatpush1.msra.mxu1 %v3322_v17  ;;  %v625_v46 = vpop.permute.xlu0 %624  ;;  %v2292_v47 = vld [vmem:[#allocation3 + $0x1a0] sm:$0xff] }
 0x106   :  { %1611 = vmatprep.subr.mxu0 %v3322_v17  ;;  %1682 = vmatprep.subr.mxu1 %v1282_v20  ;;  %v623_v48 = vpop.permute.xlu1 %622  ;;  %635 = vst.msk [vmem:[#allocation3 + $0x120] sm:$0xff] %vm600_vm3, %v625_v46  ;;  %v2288_v49 = vld [vmem:[#allocation3 + $0x180] sm:$0xff] }
 0x107   :  { %1612 = vmatpush1.msra.mxu0 %v3322_v17  ;;  %1683 = vmatpush1.msra.mxu1 %v3322_v17  ;;  %634 = vst.msk [vmem:[#allocation3 + $0x100] sm:$0xff] %vm600_vm3, %v623_v48 }
 0x108   :  { %1613 = vmatprep.subr.mxu0 %v3322_v17  ;;  %1684 = vmatprep.subr.mxu1 %v1270_v23  ;;  %v3569_v23 = vshrl.u32 %v1759_v21, 7 }
 0x109   :  { %1614 = vmatpush1.msra.mxu0 %v3322_v17  ;;  %1685 = vmatpush1.msra.mxu1 %v3322_v17  ;;  %v586_v50 = vpop.permute.xlu0 %585  ;;  %v2284_v51 = vld [vmem:[#allocation3 + $0x160] sm:$0xff] }
 0x10a   :  { %1615 = vmatprep.subr.mxu0 %v3322_v17  ;;  %1686 = vmatprep.subr.mxu1 %v1258_v26  ;;  %v584_v52 = vpop.permute.xlu1 %583  ;;  %594 = vst.msk [vmem:[#allocation3 + $0xe0] sm:$0xff] %vm557_vm2, %v586_v50  ;;  %v2280_v53 = vld [vmem:[#allocation3 + $0x140] sm:$0xff]  ;;  %4505 = vst [vmem:[#allocation18_spill] sm:$0xff] %v3569_v23  ;;  %v4498_v27 = vsub.s32 0, %v3569_v23 }
 0x10b   :  { %1616 = vmatpush1.msra.mxu0 %v3322_v17  ;;  %1687 = vmatpush1.msra.mxu1 %v3322_v17  ;;  %593 = vst.msk [vmem:[#allocation3 + $0xc0] sm:$0xff] %vm557_vm2, %v584_v52 }
 0x10c   :  { %1617 = vmatprep.subr.mxu0 %v3322_v17  ;;  %1688 = vmatprep.subr.mxu1 %v3322_v17 }
 0x10d   :  { %1618 = vmatpush1.msra.mxu0 %v3322_v17  ;;  %1689 = vmatpush1.msra.mxu1 %v1245_v30  ;;  %v582_v54 = vpop.permute.xlu0 %581  ;;  %v2276_v55 = vld [vmem:[#allocation3 + $0x120] sm:$0xff] }
 0x10e   :  { %1619 = vmatprep.subr.mxu0 %v1196_v22  ;;  %1690 = vmatprep.subr.mxu1 %v3322_v17  ;;  %v580_v56 = vpop.permute.xlu1 %579  ;;  %592 = vst.msk [vmem:[#allocation3 + $0xa0] sm:$0xff] %vm557_vm2, %v582_v54  ;;  %v2272_v58 = vld [vmem:[#allocation3 + $0x100] sm:$0xff] }
 0x10f   :  { %1620 = vmatpush1.msra.mxu0 %v3322_v17  ;;  %1691 = vmatpush1.msra.mxu1 %v1233_v32  ;;  %591 = vst.msk [vmem:[#allocation3 + $0x80] sm:$0xff] %vm557_vm2, %v580_v56  ;;  %v1757_v30 = vld [vmem:[%s4492_s5] sm:$0xf]  ;;  %v4495_v32 = vsub.s32 3, %v3569_v23 }
 0x110   :  { %1621 = vmatprep.subr.mxu0 %v1184_v25  ;;  %1692 = vmatprep.subr.mxu1 %v3322_v17  ;;  %v1762_v37 = vrot.slane %v1757_v30, %v4498_v27 }
 0x111   :  { %1622 = vmatpush1.msra.mxu0 %v3322_v17  ;;  %1693 = vmatpush1.msra.mxu1 %v1221_v35  ;;  %v2268_v59 = vld [vmem:[#allocation3 + $0xe0] sm:$0xff]  ;;  %v812_v61 = vpop.permute.xlu0 %811 }
 0x112   :  { %1623 = vmatprep.subr.mxu0 %v1172_v28  ;;  %1694 = vmatprep.subr.mxu1 %v3322_v17  ;;  %v2264_v60 = vld [vmem:[#allocation3 + $0xc0] sm:$0xff]  ;;  %820 = vst.msk [vmem:[#allocation3 + $0x3e8] sm:$0xff] %vm643_vm1, %v812_v61  ;;  %v810_v2 = vpop.permute.xlu1 %809  ;;  %v4497_v28 = vsub.s32 1, %v3569_v23 }
 0x113   :  { %1624 = vmatpush1.msra.mxu0 %v3322_v17  ;;  %1695 = vmatpush1.msra.mxu1 %v1209_v57  ;;  %819 = vst.msk [vmem:[#allocation3 + $0x3c8] sm:$0xff] %vm643_vm1, %v810_v2 }
 0x114   :  { %1625 = vmatprep.subr.mxu0 %v1160_v29  ;;  %1696 = vmatprep.subr.mxu1 %v3322_v17  ;;  %v4496_v29 = vsub.s32 2, %v3569_v23 }
 0x115   :  { %1626 = vmatpush1.msra.mxu0 %v3322_v17  ;;  %1697 = vmatpush1.msra.mxu1 %v3322_v17  ;;  %v2260_v62 = vld [vmem:[#allocation3 + $0xa0] sm:$0xff]  ;;  %v808_v0 = vpop.permute.xlu0 %807 }
 0x116   :  { %1627 = vmatprep.subr.mxu0 %v3322_v17  ;;  %1698 = vmatprep.subr.mxu1 %v3322_v17  ;;  %v2256_v63 = vld [vmem:[#allocation3 + $0x80] sm:$0xff]  ;;  %818 = vst.msk [vmem:[#allocation3 + $0x3a8] sm:$0xff] %vm643_vm1, %v808_v0  ;;  %v806_v11 = vpop.permute.xlu1 %805  ;;  %v1770_v39 = vrot.slane %v1757_v30, %v4496_v29 }
 0x117   :  { %1628 = vmatpush1.msra.mxu0 %v1147_v33  ;;  %1699 = vmatpush1.msra.mxu1 %v3322_v17  ;;  %817 = vst.msk [vmem:[#allocation3 + $0x388] sm:$0xff] %vm643_vm1, %v806_v11 }
 0x118   :  { %1629 = vmatprep.subr.mxu0 %v3322_v17  ;;  %1700 = vmatprep.subr.mxu1 %v3322_v17 }
 0x119   :  { %1630 = vmatpush1.msra.mxu0 %v1135_v36  ;;  %1701 = vmatpush1.msra.mxu1 %v3322_v17  ;;  %v770_v5 = vpop.permute.xlu0 %769  ;;  %v2365_v13 = vld [vmem:[#allocation3 + $0x3e8] sm:$0xff] }
 0x11a   :  { %1631 = vmatprep.subr.mxu0 %v3322_v17  ;;  %1702 = vmatprep.subr.mxu1 %v3322_v17  ;;  %778 = vst.msk [vmem:[#allocation3 + $0x368] sm:$0xff] %vm600_vm3, %v770_v5  ;;  %v2361_v15 = vld [vmem:[#allocation3 + $0x3c8] sm:$0xff]  ;;  %v768_v16 = vpop.permute.xlu1 %767 }
 0x11b   :  { %1632 = vmatpush1.msra.mxu0 %v1123_v38  ;;  %1703 = vmatpush1.msra.mxu1 %v3322_v17  ;;  %777 = vst.msk [vmem:[#allocation3 + $0x348] sm:$0xff] %vm600_vm3, %v768_v16  ;;  %v1766_v38 = vrot.slane %v1757_v30, %v4497_v28 }
 0x11c   :  { %1633 = vmatprep.subr.mxu0 %v3322_v17  ;;  %1704 = vmatprep.subr.mxu1 %v3322_v17 }
 0x11d   :  { %1634 = vmatpush1.msra.mxu0 %v1111_v40  ;;  %1705 = vmatpush1.msra.mxu1 %v3322_v17  ;;  %v766_v14 = vpop.permute.xlu0 %765  ;;  %v1774_v40 = vrot.slane %v1757_v30, %v4495_v32 }
 0x11e   :  { %2496 = vmatprep.subr.mxu0 %v3322_v17  ;;  %1668 = vmatmul.mubr.f32.vlgmr.msra.gmra.mxu0 %v3369_v45  ;;  %776 = vst.msk [vmem:[#allocation3 + $0x328] sm:$0xff] %vm600_vm3, %v766_v14  ;;  %v764_v19 = vpop.permute.xlu1 %763  ;;  %v2353_v20 = vld [vmem:[#allocation3 + $0x388] sm:$0xff] }
 0x11f   :  { %2497 = vmatpush1.msra.mxu0 %v2300_v42  ;;  %1673 = vmatprep.mubr.f32.mxu0 %v3322_v17  ;;  %775 = vst.msk [vmem:[#allocation3 + $0x308] sm:$0xff] %vm600_vm3, %v764_v19  ;;  %v690_v19 = vld [vmem:[#allocation12 + $0x18] sm:$0xff] }
 0x120   :  { %2498 = vmatprep.subr.mxu0 %v3322_v17  ;;  %1706 = vmatprep.subr.mxu1 %v3322_v17  ;;  %694 = vst.msk [vmem:[#allocation3 + $0x268] sm:$0xff] %vm538_vm0, %v690_v19  ;;  %834 = vst.msk [vmem:[#allocation3 + $0x470] sm:$0xff] %vm538_vm0, %v690_v19 }
 0x121   :  { %2499 = vmatpush1.msra.mxu0 %v2296_v44  ;;  %1707 = vmatpush1.msra.mxu1 %v3322_v17  ;;  %v728_v18 = vpop.permute.xlu0 %727  ;;  %v2349_v22 = vld [vmem:[#allocation3 + $0x368] sm:$0xff] }
 0x122   :  { %2500 = vmatprep.subr.mxu0 %v3322_v17  ;;  %1674 = vmatmul.mubr.f32.gmra.mxu0 %v3418_v1  ;;  %736 = vst.msk [vmem:[#allocation3 + $0x2e8] sm:$0xff] %vm557_vm2, %v728_v18  ;;  %v2345_v24 = vld [vmem:[#allocation3 + $0x348] sm:$0xff] }
 0x123   :  { %2501 = vmatpush1.msra.mxu0 %v2292_v47  ;;  %1708 = vmatprep.subr.mxu1 %v3322_v17 }
 0x124   :  { %2502 = vmatprep.subr.mxu0 %v3322_v17  ;;  %1709 = vmatpush1.msra.mxu1 %v3322_v17 }
 0x125   :  { %2503 = vmatpush1.msra.mxu0 %v2288_v49  ;;  %1710 = vmatprep.subr.mxu1 %v3322_v17  ;;  %v2341_v25 = vld [vmem:[#allocation3 + $0x328] sm:$0xff] }
 0x126   :  { %2504 = vmatprep.subr.mxu0 %v3322_v17  ;;  %1711 = vmatpush1.msra.mxu1 %v3322_v17  ;;  %v2337_v33 = vld [vmem:[#allocation3 + $0x308] sm:$0xff] }
 0x127   :  { %2505 = vmatpush1.msra.mxu0 %v2284_v51  ;;  %1745 = vmatmul.mubr.f32.vlgmr.msra.gmra.mxu1 %v3369_v45  ;;  %v2357_v45 = vld [vmem:[#allocation3 + $0x3a8] sm:$0xff] }
 0x128   :  { %2506 = vmatprep.subr.mxu0 %v3322_v17  ;;  %2573 = vmatprep.subr.mxu1 %v3322_v17 }
 0x129   :  { %2507 = vmatpush1.msra.mxu0 %v2280_v53  ;;  %2574 = vmatpush1.msra.mxu1 %v3322_v17  ;;  %v2333_v36 = vld [vmem:[#allocation3 + $0x2e8] sm:$0xff] }
 0x12a   :  { %2508 = vmatprep.subr.mxu0 %v3322_v17  ;;  %2575 = vmatprep.subr.mxu1 %v3322_v17 }
 0x12b   :  { %2509 = vmatpush1.msra.mxu0 %v2276_v55  ;;  %2576 = vmatpush1.msra.mxu1 %v3322_v17 }
 0x12c   :  { %2510 = vmatprep.subr.mxu0 %v3322_v17  ;;  %2577 = vmatprep.subr.mxu1 %v3322_v17 }
 0x12d   :  { %2511 = vmatpush1.msra.mxu0 %v2272_v58  ;;  %2578 = vmatpush1.msra.mxu1 %v3322_v17 }
 0x12e   :  { %2512 = vmatprep.subr.mxu0 %v3322_v17  ;;  %2579 = vmatprep.subr.mxu1 %v3322_v17 }
 0x12f   :  { %2513 = vmatpush1.msra.mxu0 %v2268_v59  ;;  %2580 = vmatpush1.msra.mxu1 %v3322_v17 }
 0x130   :  { %2514 = vmatprep.subr.mxu0 %v3322_v17  ;;  %2581 = vmatprep.subr.mxu1 %v3322_v17 }
 0x131   :  { %2515 = vmatpush1.msra.mxu0 %v2264_v60  ;;  %2582 = vmatpush1.msra.mxu1 %v3322_v17 }
 0x132   :  { %2516 = vmatprep.subr.mxu0 %v3322_v17  ;;  %2583 = vmatprep.subr.mxu1 %v3322_v17 }
 0x133   :  { %2517 = vmatpush1.msra.mxu0 %v2260_v62  ;;  %2584 = vmatpush1.msra.mxu1 %v3322_v17 }
 0x134   :  { %2518 = vmatprep.subr.mxu0 %v3322_v17  ;;  %2585 = vmatprep.subr.mxu1 %v3322_v17 }
 0x135   :  { %2519 = vmatpush1.msra.mxu0 %v2256_v63  ;;  %2586 = vmatpush1.msra.mxu1 %v3322_v17 }
 0x136   :  { %2520 = vmatprep.subr.mxu0 %v3322_v17  ;;  %2587 = vmatprep.subr.mxu1 %v3322_v17 }
 0x137   :  { %2521 = vmatpush1.msra.mxu0 %v2252_v3  ;;  %2588 = vmatpush1.msra.mxu1 %v3322_v17 }
 0x138   :  { %2522 = vmatprep.subr.mxu0 %v3322_v17  ;;  %2589 = vmatprep.subr.mxu1 %v3322_v17 }
 0x139   :  { %2523 = vmatpush1.msra.mxu0 %v2248_v4  ;;  %1750 = vmatprep.mubr.f32.mxu1 %v3322_v17 }
 0x13a   :  { %2524 = vmatprep.subr.mxu0 %v3322_v17  ;;  %2590 = vmatpush1.msra.mxu1 %v3322_v17 }
 0x13b   :  { %2525 = vmatpush1.msra.mxu0 %v2244_v10  ;;  %2591 = vmatprep.subr.mxu1 %v3322_v17 }
 0x13c   :  { %2526 = vmatprep.subr.mxu0 %v3322_v17  ;;  %2592 = vmatpush1.msra.mxu1 %v3322_v17 }
 0x13d   :  { %2527 = vmatpush1.msra.mxu0 %v2240_v12  ;;  %2593 = vmatprep.subr.mxu1 %v3322_v17 }
 0x13e   :  { %2528 = vmatprep.subr.mxu0 %v2365_v13  ;;  %2594 = vmatpush1.msra.mxu1 %v3322_v17 }
 0x13f   :  { %2529 = vmatpush2.msra.mxu0 %v3322_v17  ;;  %2595 = vmatprep.subr.mxu1 %v3322_v17 }
 0x140   :  { %2530 = vmatprep.subr.mxu0 %v2361_v15  ;;  %1751 = vmatmul.mubr.f32.gmra.mxu1 %v3418_v1 }
 0x141   :  { %2531 = vmatpush2.msra.mxu0 %v3322_v17  ;;  %2596 = vmatpush1.msra.mxu1 %v3322_v17 }
 0x142   :  { %2532 = vmatprep.subr.mxu0 %v2357_v45  ;;  %2597 = vmatprep.subr.mxu1 %v3322_v17 }
 0x143   :  { %2533 = vmatpush2.msra.mxu0 %v3322_v17  ;;  %2598 = vmatpush1.msra.mxu1 %v3322_v17 }
 0x144   :  { %2534 = vmatprep.subr.mxu0 %v2353_v20  ;;  %2599 = vmatprep.subr.mxu1 %v3322_v17  ;;  %v689_v20 = vld [vmem:[#allocation12 + $0x10] sm:$0xff] }
 0x145   :  { %2535 = vmatpush2.msra.mxu0 %v3322_v17  ;;  %2600 = vmatpush1.msra.mxu1 %v3322_v17  ;;  %693 = vst.msk [vmem:[#allocation3 + $0x248] sm:$0xff] %vm538_vm0, %v689_v20  ;;  %833 = vst.msk [vmem:[#allocation3 + $0x450] sm:$0xff] %vm538_vm0, %v689_v20 }
 0x146   :  { %2536 = vmatprep.subr.mxu0 %v2349_v22  ;;  %2601 = vmatprep.subr.mxu1 %v3322_v17  ;;  %v688_v22 = vld [vmem:[#allocation12 + $0x8] sm:$0xff]  ;;  %973 = vst.msk [vmem:[#allocation3 + $0x658] sm:$0xff] %vm538_vm0, %v689_v20 }
 0x147   :  { %2537 = vmatpush2.msra.mxu0 %v3322_v17  ;;  %2602 = vmatpush1.msra.mxu1 %v3322_v17  ;;  %692 = vst.msk [vmem:[#allocation3 + $0x228] sm:$0xff] %vm538_vm0, %v688_v22  ;;  %832 = vst.msk [vmem:[#allocation3 + $0x430] sm:$0xff] %vm538_vm0, %v688_v22 }
 0x148   :  { %2538 = vmatprep.subr.mxu0 %v2345_v24  ;;  %2603 = vmatprep.subr.mxu1 %v3322_v17  ;;  %v687_v24 = vld [vmem:[#allocation12] sm:$0xff] }
 0x149   :  { %2539 = vmatpush2.msra.mxu0 %v3322_v17  ;;  %691 = vst.msk [vmem:[#allocation3 + $0x208] sm:$0xff] %vm538_vm0, %v687_v24  ;;  %831 = vst.msk [vmem:[#allocation3 + $0x410] sm:$0xff] %vm538_vm0, %v687_v24 }
 0x14a   :  { %2540 = vmatprep.subr.mxu0 %v2341_v25 }
 0x14b   :  { %2541 = vmatpush2.msra.mxu0 %v3322_v17 }
 0x14c   :  { %2542 = vmatprep.subr.mxu0 %v2337_v33  ;;  %v968_v33 = vld [vmem:[#allocation12 + $0x8] sm:$0xff] }
 0x14d   :  { %2543 = vmatpush2.msra.mxu0 %v3322_v17  ;;  %972 = vst.msk [vmem:[#allocation3 + $0x638] sm:$0xff] %vm538_vm0, %v968_v33 }
 0x14e   :  { %2544 = vmatprep.subr.mxu0 %v2333_v36 }
 0x14f   :  { %2545 = vmatpush2.msra.mxu0 %v3322_v17  ;;  %v3689_v17 = vld [vmem:[#allocation2 + $0x8] sm:$0xff] }
 0x150   :  { %2604 = vmatpush1.msra.mxu1 %v3689_v17 }
 0x151   :  { %2605 = vmatprep.subr.mxu1 %v3689_v17 }
 0x152   :  { %2606 = vmatpush2.msra.mxu1 %v3689_v17 }
 0x153   :  { %2607 = vmatprep.subr.mxu1 %v3689_v17 }
 0x154   :  { %2608 = vmatpush2.msra.mxu1 %v3689_v17 }
 0x155   :  { %2609 = vmatprep.subr.mxu1 %v3689_v17 }
 0x156   :  { %2610 = vmatpush2.msra.mxu1 %v3689_v17 }
 0x157   :  { %2611 = vmatprep.subr.mxu1 %v3689_v17 }
 0x158   :  { %2612 = vmatpush2.msra.mxu1 %v3689_v17 }
 0x159   :  { %2613 = vmatprep.subr.mxu1 %v3689_v17 }
 0x15a   :  { %2614 = vmatpush2.msra.mxu1 %v3689_v17 }
 0x15b   :  { %2615 = vmatprep.subr.mxu1 %v3689_v17 }
 0x15c   :  { %2616 = vmatpush2.msra.mxu1 %v3689_v17 }
 0x15d   :  { %2617 = vmatprep.subr.mxu1 %v3689_v17 }
 0x15e   :  { %2618 = vmatpush2.msra.mxu1 %v3689_v17 }
 0x15f   :  { %2619 = vmatprep.subr.mxu1 %v3689_v17 }
 0x160   :  { %2620 = vmatpush2.msra.mxu1 %v3689_v17 }
 0x161   :  { %2621 = vmatprep.subr.mxu1 %v3689_v17 }
 0x162   :  { %2622 = vmatpush2.msra.mxu1 %v3689_v17 }
 0x163   :  { %2623 = vmatprep.subr.mxu1 %v3689_v17 }
 0x164   :  { %2624 = vmatpush2.msra.mxu1 %v3689_v17 }
 0x165   :  { %2625 = vmatprep.subr.mxu1 %v3689_v17 }
 0x166   :  { %2626 = vmatpush2.msra.mxu1 %v3689_v17 }
 0x167   :  { %2627 = vmatprep.subr.mxu1 %v3689_v17 }
 0x168   :  { %2628 = vmatpush2.msra.mxu1 %v3689_v17 }
 0x169   :  { %2629 = vmatprep.subr.mxu1 %v3689_v17 }
 0x16a   :  { %2630 = vmatpush2.msra.mxu1 %v3689_v17 }
 0x16b   :  { %2631 = vmatprep.subr.mxu1 %v3689_v17 }
 0x16c   :  { %2632 = vmatpush2.msra.mxu1 %v3689_v17 }
 0x16d   :  { %2633 = vmatprep.subr.mxu1 %v3689_v17 }
 0x16e   :  { %2634 = vmatpush2.msra.mxu1 %v3689_v17 }
 0x16f   :  { %2635 = vmatprep.subr.mxu1 %v3689_v17 }
 0x170   :  { %2636 = vmatpush2.msra.mxu1 %v3689_v17 }
 0x171   :  { %2727 = vmatprep.subr.mxu1 %v3689_v17 }
 0x196   :  { %v1361_v26 = vpop.f32.mrf.mxu0 }
 0x197   :  { %v3605_v43 = vadd.f32 %v1762_v37, %v1361_v26 }
 0x198   :  { %v1363_v31 = vpop.f32.mrf.mxu0 }
 0x199   :  { %v3607_v44 = vadd.f32 %v1766_v38, %v1363_v31  ;;  %v970_v31 = vld [vmem:[#allocation12 + $0x18] sm:$0xff] }
 0x19a   :  { %974 = vst.msk [vmem:[#allocation3 + $0x678] sm:$0xff] %vm538_vm0, %v970_v31 }
 0x19d   :  { %v1438_v34 = vpop.f32.mrf.mxu1 }
 0x19e   :  { %v3609_v46 = vadd.f32 %v1770_v39, %v1438_v34  ;;  %v3838_v34 = vand.u32 127, %v1759_v21 }
 0x19f   :  { %v1440_v41 = vpop.f32.mrf.mxu1 }
 0x1a0   :  { %v3612_v47 = vadd.f32 %v1774_v40, %v1440_v41  ;;  %vm1821_vm4 = vcmp.lt.s32.totalorder %v3838_v34, 32  ;;  %vm1870_vm5 = vcmp.lt.s32.totalorder %v3838_v34, 64  ;;  %vm1919_vm6 = vcmp.lt.s32.totalorder %v3838_v34, 96 }
 0x1b1   :  { %v1367_v35 = vpop.f32.mrf.mxu0 }
 0x1b2   :  { %v3643_v58 = vadd.f32 %v1762_v37, %v1367_v35  ;;  %v967_v35 = vld [vmem:[#allocation12] sm:$0xff] }
 0x1b3   :  { %v1369_v42 = vpop.f32.mrf.mxu0  ;;  %971 = vst.msk [vmem:[#allocation3 + $0x618] sm:$0xff] %vm538_vm0, %v967_v35 }
 0x1b4   :  { %4506 = vst [vmem:[#allocation19_spill] sm:$0xff] %v3643_v58  ;;  %v3645_v59 = vadd.f32 %v1766_v38, %v1369_v42 }
 0x1b8   :  { %v1515_v48 = vpop.f32.mrf.mxu0 }
 0x1b9   :  { %1854 = vrot.lane.b32.xlu0 %v1515_v48, %s3031_s25  ;;  %1803 = vrot.lane.b32.xlu1 %v1515_v48, %s3030_s4  ;;  %v3618_v49 = vadd.f32 %v3605_v43, %v1515_v48  ;;  %v3621_v1 = vadd.f32 %v3607_v44, %v1515_v48  ;;  %v3624_v50 = vadd.f32 %v3609_v46, %v1515_v48 }
 0x1ba   :  { %v1517_v51 = vpop.f32.mrf.mxu0  ;;  %v3628_v52 = vadd.f32 %v3612_v47, %v1515_v48 }
 0x1bb   :  { %v1444_v53 = vpop.f32.mrf.mxu1  ;;  %v3631_v54 = vadd.f32 %v3612_v47, %v1517_v51  ;;  %v3634_v55 = vadd.f32 %v3605_v43, %v1517_v51  ;;  %v3637_v56 = vadd.f32 %v3607_v44, %v1517_v51  ;;  %v3641_v57 = vadd.f32 %v3609_v46, %v1517_v51 }
 0x1bc   :  { %v3647_v60 = vadd.f32 %v1770_v39, %v1444_v53  ;;  %v3649_v61 = vpop.f32.mrf.mxu0 }
 0x1bd   :  { %v1446_v62 = vpop.f32.mrf.mxu1  ;;  %1903 = vrot.lane.b32.xlu1 %v1515_v48, %s3029_s2  ;;  %1807 = vrot.lane.b32.xlu0 %v1517_v51, %s3030_s4  ;;  %v3657_v63 = vadd.f32 %v3643_v58, %v3649_v61  ;;  %v3661_v0 = vadd.f32 %v3645_v59, %v3649_v61  ;;  %v1796_v37 = vmax.f32 %v3637_v56, 0.0 }
 0x1be   :  { %v3666_v3 = vadd.f32 %v3647_v60, %v3649_v61  ;;  %v3699_v45 = vadd.f32 %v1774_v40, %v1446_v62  ;;  %v3784_v25 = vpop.f32.mrf.mxu0 }
 0x1bf   :  { %4507 = vst [vmem:[#allocation20_spill] sm:$0xff] %v3657_v63  ;;  %4508 = vst [vmem:[#allocation21_spill] sm:$0xff] %v3661_v0  ;;  %v1592_v2 = vpop.f32.mrf.mxu1 }
 0x1c0   :  { %4509 = vst [vmem:[#allocation22_spill] sm:$0xff] %v3666_v3  ;;  %v3669_v4 = vadd.f32 %v3609_v46, %v1592_v2  ;;  %v3673_v5 = vadd.f32 %v3612_v47, %v1592_v2  ;;  %v3676_v10 = vadd.f32 %v3605_v43, %v1592_v2  ;;  %v3681_v12 = vadd.f32 %v3607_v44, %v1592_v2 }
 0x1c1   :  { %v1594_v11 = vpop.f32.mrf.mxu1  ;;  %1858 = vrot.lane.b32.xlu1 %v1517_v51, %s3031_s25  ;;  %1907 = vrot.lane.b32.xlu0 %v1517_v51, %s3029_s2  ;;  %v3709_v18 = vadd.f32 %v3699_v45, %v3649_v61 }
 0x1c2   :  { %v3684_v13 = vadd.f32 %v3612_v47, %v1594_v11  ;;  %v3687_v14 = vadd.f32 %v3605_v43, %v1594_v11  ;;  %v3693_v15 = vadd.f32 %v3607_v44, %v1594_v11  ;;  %v3696_v16 = vadd.f32 %v3609_v46, %v1594_v11 }
 0x1c3   :  { %4510 = vst [vmem:[#allocation23_spill] sm:$0xff] %v3709_v18  ;;  %v3802_v26 = vpop.f32.mrf.mxu1 }
 0x1c5   :  { %1811 = vrot.lane.b32.xlu1 %v1592_v2, %s3030_s4  ;;  %1862 = vrot.lane.b32.xlu0 %v1592_v2, %s3031_s25  ;;  %v3808_v30 = vpop.f32.mrf.mxu1 }
 0x1c9   :  { %1911 = vrot.lane.b32.xlu1 %v1592_v2, %s3029_s2  ;;  %1815 = vrot.lane.b32.xlu0 %v1594_v11, %s3030_s4 }
 0x1cd   :  { %1866 = vrot.lane.b32.xlu1 %v1594_v11, %s3031_s25  ;;  %1915 = vrot.lane.b32.xlu0 %v1594_v11, %s3029_s2 }
 0x1d1   :  { %725 = vrot.lane.b32.xlu1 %v3254_v7, %s3030_s4  ;;  %723 = vrot.lane.b32.xlu0 %v3258_v8, %s3030_s4 }
 0x1d5   :  { %721 = vrot.lane.b32.xlu1 %v3260_v9, %s3030_s4  ;;  %951 = vrot.lane.b32.xlu0 %v3252_v6, %s3029_s2 }
 0x1d9   :  { %949 = vrot.lane.b32.xlu1 %v3254_v7, %s3029_s2  ;;  %947 = vrot.lane.b32.xlu0 %v3258_v8, %s3029_s2 }
 0x1dd   :  { %945 = vrot.lane.b32.xlu1 %v3260_v9, %s3029_s2  ;;  %909 = vrot.lane.b32.xlu0 %v3252_v6, %s3031_s25 }
 0x1e1   :  { %907 = vrot.lane.b32.xlu1 %v3254_v7, %s3031_s25  ;;  %905 = vrot.lane.b32.xlu0 %v3258_v8, %s3031_s25 }
 0x1e5   :  { %903 = vrot.lane.b32.xlu1 %v3260_v9, %s3031_s25  ;;  %867 = vrot.lane.b32.xlu0 %v3252_v6, %s3030_s4 }
 0x1e9   :  { %865 = vrot.lane.b32.xlu1 %v3254_v7, %s3030_s4  ;;  %863 = vrot.lane.b32.xlu0 %v3258_v8, %s3030_s4 }
 0x1ed   :  { %861 = vrot.lane.b32.xlu1 %v3260_v9, %s3030_s4  ;;  %1091 = vrot.lane.b32.xlu0 %v3252_v6, %s3029_s2 }
 0x1f1   :  { %1805 = vrot.lane.b32.xlu1 %v3649_v61, %s3030_s4  ;;  %1809 = vrot.lane.b32.xlu0 %v3784_v25, %s3030_s4 }
 0x1f5   :  { %1089 = vrot.lane.b32.xlu1 %v3254_v7, %s3029_s2  ;;  %1856 = vrot.lane.b32.xlu0 %v3649_v61, %s3031_s25 }
 0x1f9   :  { %1860 = vrot.lane.b32.xlu1 %v3784_v25, %s3031_s25  ;;  %1087 = vrot.lane.b32.xlu0 %v3258_v8, %s3029_s2 }
 0x1fd   :  { %1905 = vrot.lane.b32.xlu1 %v3649_v61, %s3029_s2  ;;  %1909 = vrot.lane.b32.xlu0 %v3784_v25, %s3029_s2 }
 0x201   :  { %1813 = vrot.lane.b32.xlu1 %v3802_v26, %s3030_s4  ;;  %1864 = vrot.lane.b32.xlu0 %v3802_v26, %s3031_s25 }
 0x205   :  { %1913 = vrot.lane.b32.xlu1 %v3802_v26, %s3029_s2  ;;  %1817 = vrot.lane.b32.xlu0 %v3808_v30, %s3030_s4 }
 0x209   :  { %1868 = vrot.lane.b32.xlu1 %v3808_v30, %s3031_s25  ;;  %1917 = vrot.lane.b32.xlu0 %v3808_v30, %s3029_s2 }
 0x20d   :  { %1085 = vrot.lane.b32.xlu1 %v3260_v9, %s3029_s2  ;;  %1049 = vrot.lane.b32.xlu0 %v3252_v6, %s3031_s25 }
 0x211   :  { %1047 = vrot.lane.b32.xlu1 %v3254_v7, %s3031_s25  ;;  %1045 = vrot.lane.b32.xlu0 %v3258_v8, %s3031_s25 }
 0x215   :  { %1043 = vrot.lane.b32.xlu1 %v3260_v9, %s3031_s25  ;;  %1007 = vrot.lane.b32.xlu0 %v3252_v6, %s3030_s4 }
 0x219   :  { %1005 = vrot.lane.b32.xlu1 %v3254_v7, %s3030_s4  ;;  %1003 = vrot.lane.b32.xlu0 %v3258_v8, %s3030_s4 }
 0x21d   :  { %1001 = vrot.lane.b32.xlu1 %v3260_v9, %s3030_s4 }
 0x22b   :  { %v3841_v6 = vpop.permute.xlu0 %1854  ;;  %v1804_v36 = vpop.permute.xlu1 %1803 }
 0x22f   :  { %v3845_v7 = vpop.permute.xlu1 %1903  ;;  %v1808_v8 = vpop.permute.xlu0 %1807 }
 0x230   :  { %v3849_v9 = vsel %vm1821_vm4, %v1804_v36, %v1808_v8 }
 0x231   :  { %v1831_v21 = vadd.f32 %v3849_v9, %v3607_v44 }
 0x233   :  { %v1839_v38 = vmax.f32 %v1831_v21, 0.0  ;;  %v1859_v39 = vpop.permute.xlu1 %1858  ;;  %v1908_v40 = vpop.permute.xlu0 %1907  ;;  %v1797_v21 = vmax.f32 %v3669_v4, 0.0 }
 0x234   :  { %v3859_v41 = vsel %vm1870_vm5, %v3841_v6, %v1859_v39  ;;  %v3864_v42 = vsel %vm1919_vm6, %v3845_v7, %v1908_v40 }
 0x235   :  { %v1847_v48 = vadd.f32 %v1839_v38, %v1796_v37  ;;  %v1880_v51 = vadd.f32 %v3859_v41, %v3607_v44  ;;  %v1929_v53 = vadd.f32 %v3864_v42, %v3607_v44  ;;  %v2002_v38 = vadd.f32 %v3859_v41, %v3609_v46 }
 0x237   :  { %v1888_v56 = vmax.f32 %v1880_v51, 0.0  ;;  %v1812_v61 = vpop.permute.xlu1 %1811  ;;  %v1863_v62 = vpop.permute.xlu0 %1862  ;;  %v1937_v11 = vmax.f32 %v1929_v53, 0.0 }
 0x238   :  { %v3872_v19 = vsel %vm1821_vm4, %v1808_v8, %v1812_v61  ;;  %v3876_v20 = vsel %vm1870_vm5, %v1859_v39, %v1863_v62  ;;  %v1795_v8 = vmax.f32 %v3618_v49, 0.0  ;;  %v1961_v39 = vmax.f32 %v3621_v1, 0.0 }
 0x239   :  { %v1896_v2 = vadd.f32 %v1888_v56, %v1847_v48  ;;  %v1832_v22 = vadd.f32 %v3872_v19, %v3609_v46  ;;  %v1881_v31 = vadd.f32 %v3876_v20, %v3609_v46  ;;  %v1962_v1 = vmax.f32 %v3641_v57, 0.0 }
 0x23a   :  { %v3933_v51 = vadd.f32 %v3872_v19, %v3612_v47 }
 0x23b   :  { %v1945_v24 = vadd.f32 %v1937_v11, %v1896_v2  ;;  %v3882_v33 = vpop.permute.xlu1 %1911  ;;  %v1816_v35 = vpop.permute.xlu0 %1815  ;;  %v1840_v37 = vmax.f32 %v1832_v22, 0.0  ;;  %v1889_v48 = vmax.f32 %v1881_v31, 0.0 }
 0x23c   :  { %v3892_v56 = vsel %vm1919_vm6, %v1908_v40, %v3882_v33  ;;  %v3896_v2 = vsel %vm1821_vm4, %v1812_v61, %v1816_v35  ;;  %v3900_v49 = vsel %vm1821_vm4, %v1816_v35, %v1804_v36  ;;  %v1798_v61 = vmax.f32 %v3684_v13, 0.0 }
 0x23d   :  { %v1848_v53 = vadd.f32 %v1840_v37, %v1797_v21  ;;  %v1930_v4 = vadd.f32 %v3892_v56, %v3609_v46  ;;  %v1830_v37 = vadd.f32 %v3900_v49, %v3605_v43  ;;  %v1833_v36 = vadd.f32 %v3896_v2, %v3612_v47 }
 0x23e   :  { %v1978_v35 = vadd.f32 %v3849_v9, %v3609_v46  ;;  %v1969_v32 = vadd.f32 %v1961_v39, %v1945_v24  ;;  %v2170_v0 = vadd.f32 %v3896_v2, %v3609_v46 }
 0x23f   :  { %v1867_v11 = vpop.permute.xlu1 %1866  ;;  %v3907_v40 = vpop.permute.xlu0 %1915  ;;  %v1897_v21 = vadd.f32 %v1889_v48, %v1848_v53  ;;  %v1938_v57 = vmax.f32 %v1930_v4, 0.0  ;;  %v1838_v28 = vmax.f32 %v1830_v37, 0.0  ;;  %v1841_v27 = vmax.f32 %v1833_v36, 0.0 }
 0x240   :  { %v1977_v48 = vadd.f32 %v3900_v49, %v3607_v44  ;;  %v3922_v53 = vadd.f32 %v3849_v9, %v3612_v47  ;;  %v2026_v37 = vadd.f32 %v3864_v42, %v3609_v46  ;;  %v1986_v13 = vmax.f32 %v1978_v35, 0.0 }
 0x241   :  { %v1946_v31 = vadd.f32 %v1938_v57, %v1897_v21  ;;  %v1846_v36 = vadd.f32 %v1838_v28, %v1795_v8  ;;  %v1849_v22 = vadd.f32 %v1841_v27, %v1798_v61  ;;  %v3938_v4 = vadd.f32 %v3876_v20, %v3612_v47 }
 0x242   :  { %v1985_v29 = vmax.f32 %v1977_v48, 0.0  ;;  %v3942_v27 = vsel %vm1870_vm5, %v1863_v62, %v1867_v11  ;;  %v3947_v28 = vsel %vm1870_vm5, %v1867_v11, %v3841_v6  ;;  %v2010_v8 = vmax.f32 %v2002_v38, 0.0 }
 0x243   :  { %v726_v24 = vpop.permute.xlu1 %725  ;;  %v724_v39 = vpop.permute.xlu0 %723  ;;  %v1970_v21 = vadd.f32 %v1962_v1, %v1946_v31  ;;  %v1879_v1 = vadd.f32 %v3947_v28, %v3605_v43  ;;  %v1882_v31 = vadd.f32 %v3942_v27, %v3612_v47  ;;  %v2034_v62 = vmax.f32 %v2026_v37, 0.0 }
 0x244   :  { %735 = vst.msk [vmem:[#allocation3 + $0x2c8] sm:$0xff] %vm557_vm2, %v726_v24  ;;  %734 = vst.msk [vmem:[#allocation3 + $0x2a8] sm:$0xff] %vm557_vm2, %v724_v39  ;;  %v1993_v23 = vadd.f32 %v1985_v29, %v1969_v32  ;;  %v3956_v32 = vadd.f32 %v3859_v41, %v3612_v47  ;;  %v2001_v6 = vadd.f32 %v3947_v28, %v3607_v44 }
 0x245   :  { %v1994_v61 = vadd.f32 %v1986_v13, %v1970_v21  ;;  %v2074_v11 = vadd.f32 %v3900_v49, %v3609_v46  ;;  %v1887_v13 = vmax.f32 %v1879_v1, 0.0  ;;  %v1890_v24 = vmax.f32 %v1882_v31, 0.0 }
 0x246   :  { %v3967_v21 = vadd.f32 %v3872_v19, %v3605_v43  ;;  %v2009_v29 = vmax.f32 %v2001_v6, 0.0  ;;  %v1976_v31 = vadd.f32 %v3896_v2, %v3605_v43  ;;  %v1920_v37 = vsel %vm1919_vm6, %v3882_v33, %v3907_v40 }
 0x247   :  { %v722_v35 = vpop.permute.xlu1 %721  ;;  %v952_v48 = vpop.permute.xlu0 %951  ;;  %v2018_v38 = vadd.f32 %v2010_v8, %v1994_v61  ;;  %v1895_v18 = vadd.f32 %v1887_v13, %v1846_v36  ;;  %v2098_v8 = vadd.f32 %v3947_v28, %v3609_v46  ;;  %v4511_v36 = vmax.f32 %v3624_v50, 0.0 }
 0x248   :  { %733 = vst.msk [vmem:[#allocation3 + $0x288] sm:$0xff] %vm557_vm2, %v722_v35  ;;  %v1898_v35 = vadd.f32 %v1890_v24, %v1849_v22  ;;  %v2017_v39 = vadd.f32 %v2009_v29, %v1993_v23  ;;  %v3982_v22 = vsel %vm1919_vm6, %v3907_v40, %v3845_v7  ;;  %v2082_v23 = vmax.f32 %v2074_v11, 0.0 }
 0x249   :  { %960 = vst.msk [vmem:[#allocation3 + $0x5f0] sm:$0xff] %vm643_vm1, %v952_v48  ;;  %v2042_v57 = vadd.f32 %v2034_v62, %v2018_v38  ;;  %v1928_v29 = vadd.f32 %v3982_v22, %v3605_v43  ;;  %v1931_v33 = vadd.f32 %v1920_v37, %v3612_v47  ;;  %v3994_v7 = vadd.f32 %v3892_v56, %v3612_v47 }
 0x24a   :  { %v2073_v40 = vadd.f32 %v3896_v2, %v3607_v44  ;;  %v2122_v50 = vadd.f32 %v3982_v22, %v3609_v46  ;;  %v2106_v6 = vmax.f32 %v2098_v8, 0.0  ;;  %v2000_v58 = vadd.f32 %v3942_v27, %v3605_v43 }
 0x24b   :  { %v950_v61 = vpop.permute.xlu1 %949  ;;  %v948_v48 = vpop.permute.xlu0 %947  ;;  %v2329_v3 = vld [vmem:[#allocation3 + $0x2c8] sm:$0xff]  ;;  %v2066_v62 = vadd.f32 %v4511_v36, %v2042_v57  ;;  %v1936_v38 = vmax.f32 %v1928_v29, 0.0  ;;  %v1939_v11 = vmax.f32 %v1931_v33, 0.0  ;;  %v1984_v36 = vmax.f32 %v1976_v31, 0.0 }
 0x24c   :  { %v2325_v1 = vld [vmem:[#allocation3 + $0x2a8] sm:$0xff]  ;;  %959 = vst.msk [vmem:[#allocation3 + $0x5d0] sm:$0xff] %vm643_vm1, %v950_v61  ;;  %958 = vst.msk [vmem:[#allocation3 + $0x5b0] sm:$0xff] %vm643_vm1, %v948_v48  ;;  %2546 = vmatprep.subr.mxu0 %v2329_v3  ;;  %v2025_v3 = vadd.f32 %v3982_v22, %v3607_v44  ;;  %v2081_v31 = vmax.f32 %v2073_v40, 0.0  ;;  %v2097_v2 = vadd.f32 %v3942_v27, %v3607_v44 }
 0x24d   :  { %2547 = vmatpush2.msra.mxu0 %v3689_v17  ;;  %v2090_v57 = vadd.f32 %v2082_v23, %v2066_v62  ;;  %v2317_v48 = vld [vmem:[#allocation3 + $0x268] sm:$0xff]  ;;  %v1947_v62 = vadd.f32 %v1939_v11, %v1898_v35  ;;  %v2130_v23 = vmax.f32 %v2122_v50, 0.0  ;;  %v2194_v33 = vadd.f32 %v3942_v27, %v3609_v46 }
 0x24e   :  { %2548 = vmatprep.subr.mxu0 %v2325_v1  ;;  %v2033_v63 = vmax.f32 %v2025_v3, 0.0  ;;  %v1944_v1 = vadd.f32 %v1936_v38, %v1895_v18  ;;  %v2313_v29 = vld [vmem:[#allocation3 + $0x248] sm:$0xff]  ;;  %v2024_v35 = vadd.f32 %v1920_v37, %v3605_v43  ;;  %v2178_v11 = vmax.f32 %v2170_v0, 0.0 }
 0x24f   :  { %v946_v13 = vpop.permute.xlu1 %945  ;;  %2549 = vmatpush2.msra.mxu0 %v3689_v17  ;;  %v910_v24 = vpop.permute.xlu0 %909  ;;  %v2321_v61 = vld [vmem:[#allocation3 + $0x288] sm:$0xff]  ;;  %v2114_v8 = vadd.f32 %v2106_v6, %v2090_v57  ;;  %v4513_v57 = vmax.f32 %v3673_v5, 0.0  ;;  %v4514_v27 = vmax.f32 %v3693_v15, 0.0  ;;  %v2218_v0 = vadd.f32 %v1920_v37, %v3609_v46 }
 0x250   :  { %957 = vst.msk [vmem:[#allocation3 + $0x590] sm:$0xff] %vm643_vm1, %v946_v13  ;;  %2550 = vmatprep.subr.mxu0 %v2321_v61  ;;  %v2041_v3 = vadd.f32 %v2033_v63, %v2017_v39  ;;  %v4512_v13 = vmax.f32 %v3687_v14, 0.0  ;;  %v2309_v40 = vld [vmem:[#allocation3 + $0x228] sm:$0xff]  ;;  %v2008_v61 = vmax.f32 %v2000_v58, 0.0  ;;  %v2121_v39 = vadd.f32 %v1920_v37, %v3607_v44 }
 0x251   :  { %918 = vst.msk [vmem:[#allocation3 + $0x570] sm:$0xff] %vm600_vm3, %v910_v24  ;;  %2551 = vmatpush2.msra.mxu0 %v3689_v17  ;;  %v1971_v18 = vadd.f32 %v4513_v57, %v1947_v62  ;;  %v2138_v50 = vadd.f32 %v2130_v23, %v2114_v8  ;;  %v4515_v14 = vmax.f32 %v3933_v51, 0.0  ;;  %v4516_v8 = vmax.f32 %v3696_v16, 0.0  ;;  %v2305_v58 = vld [vmem:[#allocation3 + $0x208] sm:$0xff] }
 0x252   :  { %2552 = vmatprep.subr.mxu0 %v2317_v48  ;;  %v1968_v24 = vadd.f32 %v4512_v13, %v1944_v1  ;;  %v2065_v63 = vadd.f32 %v4514_v27, %v2041_v3  ;;  %v2035_v15 = vmax.f32 %v3994_v7, 0.0  ;;  %v2105_v62 = vmax.f32 %v2097_v2, 0.0 }
 0x253   :  { %v908_v6 = vpop.permute.xlu1 %907  ;;  %v906_v38 = vpop.permute.xlu0 %905  ;;  %2553 = vmatpush2.msra.mxu0 %v3689_v17  ;;  %v1995_v48 = vadd.f32 %v4515_v14, %v1971_v18  ;;  %v2162_v1 = vadd.f32 %v4516_v8, %v2138_v50  ;;  %v2202_v23 = vmax.f32 %v2194_v33, 0.0  ;;  %v2032_v51 = vmax.f32 %v2024_v35, 0.0 }
 0x254   :  { %917 = vst.msk [vmem:[#allocation3 + $0x550] sm:$0xff] %vm600_vm3, %v908_v6  ;;  %916 = vst.msk [vmem:[#allocation3 + $0x530] sm:$0xff] %vm600_vm3, %v906_v38  ;;  %2554 = vmatprep.subr.mxu0 %v2313_v29  ;;  %v1992_v5 = vadd.f32 %v1984_v36, %v1968_v24  ;;  %v2089_v3 = vadd.f32 %v2081_v31, %v2065_v63  ;;  %v4517_v36 = vmax.f32 %v3938_v4, 0.0  ;;  %v2129_v2 = vmax.f32 %v2121_v39, 0.0 }
 0x255   :  { %2555 = vmatpush2.msra.mxu0 %v3689_v17  ;;  %v2186_v24 = vadd.f32 %v2178_v11, %v2162_v1  ;;  %v2169_v46 = vadd.f32 %v3872_v19, %v3607_v44  ;;  %v2096_v37 = vadd.f32 %v3876_v20, %v3605_v43  ;;  %v2226_v18 = vmax.f32 %v2218_v0, 0.0 }
 0x256   :  { %2556 = vmatprep.subr.mxu0 %v2309_v40  ;;  %v2016_v13 = vadd.f32 %v2008_v61, %v1992_v5  ;;  %v2019_v29 = vadd.f32 %v4517_v36, %v1995_v48  ;;  %v2113_v7 = vadd.f32 %v2105_v62, %v2089_v3  ;;  %v2123_v35 = vadd.f32 %v3864_v42, %v3612_v47 }
 0x257   :  { %v904_v57 = vpop.permute.xlu1 %903  ;;  %v868_v16 = vpop.permute.xlu0 %867  ;;  %2557 = vmatpush2.msra.mxu0 %v3689_v17  ;;  %v2210_v33 = vadd.f32 %v2202_v23, %v2186_v24  ;;  %v2080_v19 = vmax.f32 %v3967_v21, 0.0  ;;  %v2193_v50 = vadd.f32 %v3876_v20, %v3607_v44  ;;  %v2120_v38 = vadd.f32 %v3892_v56, %v3605_v43 }
 0x258   :  { %915 = vst.msk [vmem:[#allocation3 + $0x510] sm:$0xff] %vm600_vm3, %v904_v57  ;;  %2558 = vmatprep.subr.mxu0 %v2305_v58  ;;  %v2040_v4 = vadd.f32 %v2032_v51, %v2016_v13  ;;  %v2043_v31 = vadd.f32 %v2035_v15, %v2019_v29  ;;  %v2137_v6 = vadd.f32 %v2129_v2, %v2113_v7  ;;  %v4518_v40 = vmax.f32 %v3676_v10, 0.0 }
 0x259   :  { %876 = vst.msk [vmem:[#allocation3 + $0x4f0] sm:$0xff] %vm557_vm2, %v868_v16  ;;  %2559 = vmatpush2.msra.mxu0 %v3689_v17  ;;  %v4052_v61 = vadd.f32 %v2226_v18, %v2210_v33  ;;  %v4519_v39 = vmax.f32 %v3631_v54, 0.0  ;;  %v2177_v21 = vmax.f32 %v2169_v46, 0.0  ;;  %v2217_v20 = vadd.f32 %v3892_v56, %v3607_v44 }
 0x25a   :  { %2650 = vmatprep.subr.mxu0 %v3689_v17  ;;  %v2064_v11 = vadd.f32 %v4518_v40, %v2040_v4  ;;  %v4520_v14 = vmax.f32 %v3681_v12, 0.0  ;;  %v2107_v10 = vmax.f32 %v3956_v32, 0.0  ;;  %v2104_v8 = vmax.f32 %v2096_v37, 0.0 }
 0x25b   :  { %v866_v27 = vpop.permute.xlu1 %865  ;;  %v864_v63 = vpop.permute.xlu0 %863  ;;  %v2067_v5 = vadd.f32 %v4519_v39, %v2043_v31  ;;  %v4521_v0 = vmax.f32 %v3922_v53, 0.0  ;;  %v2168_v54 = vadd.f32 %v3849_v9, %v3605_v43  ;;  %v2131_v15 = vmax.f32 %v2123_v35, 0.0 }
 0x25c   :  { %v2161_v48 = vadd.f32 %v4520_v14, %v2137_v6  ;;  %875 = vst.msk [vmem:[#allocation3 + $0x4d0] sm:$0xff] %vm557_vm2, %v866_v27  ;;  %874 = vst.msk [vmem:[#allocation3 + $0x4b0] sm:$0xff] %vm557_vm2, %v864_v63  ;;  %v2088_v1 = vadd.f32 %v2080_v19, %v2064_v11  ;;  %v2201_v62 = vmax.f32 %v2193_v50, 0.0  ;;  %v2128_v56 = vmax.f32 %v2120_v38, 0.0  ;;  %v2430_v27 = vld [vmem:[#allocation3 + $0x5f0] sm:$0xff] }
 0x25d   :  { %v2091_v58 = vadd.f32 %v4521_v0, %v2067_v5  ;;  %v2171_v12 = vadd.f32 %v3900_v49, %v3612_v47  ;;  %v2152_v32 = vmax.f32 %v3634_v55, 0.0  ;;  %v2225_v51 = vmax.f32 %v2217_v20, 0.0  ;;  %v2426_v5 = vld [vmem:[#allocation3 + $0x5d0] sm:$0xff] }
 0x25e   :  { %v2185_v44 = vadd.f32 %v2177_v21, %v2161_v48  ;;  %v2112_v23 = vadd.f32 %v2104_v8, %v2088_v1  ;;  %v2155_v9 = vmax.f32 %v3628_v52, 0.0  ;;  %v2192_v53 = vadd.f32 %v3859_v41, %v3605_v43 }
 0x25f   :  { %v862_v3 = vpop.permute.xlu1 %861  ;;  %v1092_v13 = vpop.permute.xlu0 %1091  ;;  %v2115_v36 = vadd.f32 %v2107_v10, %v2091_v58  ;;  %v2195_v49 = vadd.f32 %v3947_v28, %v3612_v47  ;;  %v2176_v16 = vmax.f32 %v2168_v54, 0.0  ;;  %v2216_v55 = vadd.f32 %v3864_v42, %v3605_v43  ;;  %v2422_v10 = vld [vmem:[#allocation3 + $0x5b0] sm:$0xff] }
 0x260   :  { %v2209_v29 = vadd.f32 %v2201_v62, %v2185_v44  ;;  %873 = vst.msk [vmem:[#allocation3 + $0x490] sm:$0xff] %vm557_vm2, %v862_v3  ;;  %v2136_v24 = vadd.f32 %v2128_v56, %v2112_v23  ;;  %v2179_v37 = vmax.f32 %v2171_v12, 0.0  ;;  %v2219_v7 = vadd.f32 %v3982_v22, %v3612_v47  ;;  %v2418_v58 = vld [vmem:[#allocation3 + $0x590] sm:$0xff] }
 0x261   :  { %1100 = vst.msk [vmem:[#allocation3 + $0x7f8] sm:$0xff] %vm643_vm1, %v1092_v13  ;;  %v2139_v57 = vadd.f32 %v2131_v15, %v2115_v36  ;;  %v2200_v28 = vmax.f32 %v2192_v53, 0.0  ;;  %v2203_v31 = vmax.f32 %v2195_v49, 0.0  ;;  %v2224_v35 = vmax.f32 %v2216_v55, 0.0  ;;  %v2414_v3 = vld [vmem:[#allocation3 + $0x570] sm:$0xff] }
 0x262   :  { %v4079_v46 = vadd.f32 %v2225_v51, %v2209_v29  ;;  %v2160_v2 = vadd.f32 %v2152_v32, %v2136_v24  ;;  %v2227_v42 = vmax.f32 %v2219_v7, 0.0  ;;  %v1792_v21 = vadd.f32 %v3645_v59, %v3784_v25 }
 0x263   :  { %v2163_v52 = vadd.f32 %v2155_v9, %v2139_v57  ;;  %v4083_v4 = vpop.permute.xlu1 %1805  ;;  %v1810_v41 = vpop.permute.xlu0 %1809  ;;  %v1793_v62 = vadd.f32 %v3647_v60, %v3802_v26  ;;  %v4139_v12 = vadd.f32 %v3647_v60, %v3784_v25  ;;  %v4143_v23 = vadd.f32 %v3699_v45, %v3784_v25  ;;  %v2410_v9 = vld [vmem:[#allocation3 + $0x550] sm:$0xff] }
 0x264   :  { %2560 = vmatprep.mubr.f32.mxu0 %v4079_v46  ;;  %v2184_v33 = vadd.f32 %v2176_v16, %v2160_v2  ;;  %v4096_v38 = vsel %vm1821_vm4, %v4083_v4, %v1810_v41  ;;  %v1800_v54 = vmax.f32 %v1792_v21, 0.0  ;;  %v2406_v2 = vld [vmem:[#allocation3 + $0x530] sm:$0xff] }
 0x265   :  { %v2187_v18 = vadd.f32 %v2179_v37, %v2163_v52  ;;  %v1835_v39 = vadd.f32 %v4096_v38, %v3645_v59  ;;  %v1801_v24 = vmax.f32 %v1793_v62, 0.0  ;;  %v1966_v55 = vmax.f32 %v4139_v12, 0.0 }
 0x266   :  { %v2208_v19 = vadd.f32 %v2200_v28, %v2184_v33  ;;  %v2063_v7 = vmax.f32 %v4143_v23, 0.0  ;;  %v4172_v52 = vadd.f32 %v3699_v45, %v3808_v30 }
 0x267   :  { %v2211_v43 = vadd.f32 %v2203_v31, %v2187_v18  ;;  %v1090_v50 = vpop.permute.xlu1 %1089  ;;  %v4086_v6 = vpop.permute.xlu0 %1856  ;;  %v1843_v1 = vmax.f32 %v1835_v39, 0.0  ;;  %v4523_v31 = vld [vmem:[#allocation19_spill] sm:$0xff] }
 0x268   :  { %1099 = vst.msk [vmem:[#allocation3 + $0x7d8] sm:$0xff] %vm643_vm1, %v1090_v50  ;;  %v4089_v47 = vadd.f32 %v2224_v35, %v2208_v19  ;;  %v4177_v33 = vadd.f32 %v4523_v31, %v3808_v30  ;;  %v4196_v39 = vadd.f32 %v4523_v31, %v3802_v26 }
 0x269   :  { %v4091_v22 = vadd.f32 %v2227_v42, %v2211_v43  ;;  %v1851_v32 = vadd.f32 %v1843_v1, %v1800_v54  ;;  %v2402_v42 = vld [vmem:[#allocation3 + $0x510] sm:$0xff]  ;;  %v4204_v1 = vadd.f32 %v3645_v59, %v3808_v30 }
 0x26a   :  { %2561 = vmatmul.mubr.f32.vlgmr.msra.gmra.mxu0 %v4089_v47 }
 0x26b   :  { %2637 = vmatprep.mubr.f32.mxu1 %v4091_v22  ;;  %v1861_v40 = vpop.permute.xlu1 %1860  ;;  %v1088_v11 = vpop.permute.xlu0 %1087  ;;  %2651 = vmatpush1.msra.mxu0 %v3689_v17 }
 0x26c   :  { %2638 = vmatmul.mubr.f32.vlgmr.msra.gmra.mxu1 %v4052_v61  ;;  %v4105_v63 = vsel %vm1870_vm5, %v4086_v6, %v1861_v40  ;;  %1098 = vst.msk [vmem:[#allocation3 + $0x7b8] sm:$0xff] %vm643_vm1, %v1088_v11  ;;  %2652 = vmatprep.subr.mxu0 %v3689_v17 }
 0x26d   :  { %2728 = vmatpush1.msra.mxu1 %v2430_v27  ;;  %2653 = vmatpush1.msra.mxu0 %v3689_v17  ;;  %v1884_v20 = vadd.f32 %v4105_v63, %v3645_v59  ;;  %v4192_v27 = vadd.f32 %v3699_v45, %v3802_v26 }
 0x26e   :  { %2729 = vmatprep.subr.mxu1 %v3689_v17  ;;  %2654 = vmatprep.subr.mxu0 %v3689_v17 }
 0x26f   :  { %2730 = vmatpush1.msra.mxu1 %v2426_v5  ;;  %v4118_v14 = vpop.permute.xlu1 %1905  ;;  %v1910_v48 = vpop.permute.xlu0 %1909  ;;  %2655 = vmatpush1.msra.mxu0 %v3689_v17  ;;  %v1892_v15 = vmax.f32 %v1884_v20, 0.0  ;;  %v1982_v5 = vadd.f32 %v4096_v38, %v3647_v60  ;;  %v4525_v20 = vld [vmem:[#allocation22_spill] sm:$0xff] }
 0x270   :  { %2731 = vmatprep.subr.mxu1 %v3689_v17  ;;  %v4125_v8 = vsel %vm1919_vm6, %v4118_v14, %v1910_v48  ;;  %2656 = vmatprep.subr.mxu0 %v3689_v17 }
 0x271   :  { %2732 = vmatpush1.msra.mxu1 %v2422_v10  ;;  %v1933_v0 = vadd.f32 %v4125_v8, %v3645_v59  ;;  %2657 = vmatpush1.msra.mxu0 %v3689_v17  ;;  %v1900_v49 = vadd.f32 %v1892_v15, %v1851_v32  ;;  %v1802_v32 = vmax.f32 %v4172_v52, 0.0 }
 0x272   :  { %2733 = vmatprep.subr.mxu1 %v3689_v17  ;;  %2658 = vmatprep.subr.mxu0 %v3689_v17 }
 0x273   :  { %2734 = vmatpush1.msra.mxu1 %v2418_v58  ;;  %v1814_v44 = vpop.permute.xlu1 %1813  ;;  %v4135_v56 = vpop.permute.xlu0 %1864  ;;  %2659 = vmatpush1.msra.mxu0 %v3689_v17  ;;  %v1941_v29 = vmax.f32 %v1933_v0, 0.0  ;;  %v2398_v58 = vld [vmem:[#allocation3 + $0x4f0] sm:$0xff] }
 0x274   :  { %2735 = vmatprep.subr.mxu1 %v3689_v17  ;;  %v4149_v13 = vsel %vm1821_vm4, %v1810_v41, %v1814_v44  ;;  %v4154_v36 = vsel %vm1870_vm5, %v1861_v40, %v4135_v56  ;;  %2660 = vmatprep.subr.mxu0 %v3689_v17  ;;  %v4522_v41 = vld [vmem:[#allocation20_spill] sm:$0xff]  ;;  %v4524_v40 = vld [vmem:[#allocation21_spill] sm:$0xff] }
 0x275   :  { %2736 = vmatpush1.msra.mxu1 %v2414_v3  ;;  %v1836_v51 = vadd.f32 %v4149_v13, %v3647_v60  ;;  %2661 = vmatpush1.msra.mxu0 %v3689_v17  ;;  %v1885_v53 = vadd.f32 %v4154_v36, %v3647_v60  ;;  %v1799_v28 = vmax.f32 %v4522_v41, 0.0  ;;  %v1949_v18 = vadd.f32 %v1941_v29, %v1900_v49 }
 0x276   :  { %2737 = vmatprep.subr.mxu1 %v3689_v17  ;;  %2662 = vmatprep.subr.mxu0 %v3689_v17  ;;  %v1965_v11 = vmax.f32 %v4524_v40, 0.0  ;;  %v4221_v3 = vadd.f32 %v3645_v59, %v3802_v26  ;;  %v2394_v26 = vld [vmem:[#allocation3 + $0x4d0] sm:$0xff]  ;;  %v1964_v49 = vmax.f32 %v4177_v33, 0.0 }
 0x277   :  { %2738 = vmatpush1.msra.mxu1 %v2410_v9  ;;  %v1844_v57 = vmax.f32 %v1836_v51, 0.0  ;;  %v4164_v16 = vpop.permute.xlu1 %1913  ;;  %v1818_v37 = vpop.permute.xlu0 %1817  ;;  %2663 = vmatpush1.msra.mxu0 %v3689_v17  ;;  %v1893_v19 = vmax.f32 %v1885_v53, 0.0 }
 0x278   :  { %2739 = vmatprep.subr.mxu1 %v3689_v17  ;;  %2664 = vmatprep.subr.mxu0 %v3689_v17  ;;  %v4183_v43 = vsel %vm1919_vm6, %v1910_v48, %v4164_v16  ;;  %v2062_v48 = vmax.f32 %v4525_v20, 0.0  ;;  %v4212_v15 = vsel %vm1821_vm4, %v1814_v44, %v1818_v37  ;;  %v4217_v62 = vsel %vm1821_vm4, %v1818_v37, %v4083_v4 }
 0x279   :  { %2740 = vmatpush1.msra.mxu1 %v2406_v2  ;;  %v1852_v35 = vadd.f32 %v1844_v57, %v1801_v24  ;;  %2665 = vmatpush1.msra.mxu0 %v3689_v17  ;;  %v1934_v50 = vadd.f32 %v4183_v43, %v3647_v60  ;;  %v1834_v29 = vadd.f32 %v4217_v62, %v4523_v31  ;;  %v1990_v24 = vmax.f32 %v1982_v5, 0.0 }
 0x27a   :  { %2741 = vmatprep.subr.mxu1 %v3689_v17  ;;  %2666 = vmatprep.subr.mxu0 %v3689_v17  ;;  %v1973_v51 = vadd.f32 %v1965_v11, %v1949_v18  ;;  %v4229_v44 = vadd.f32 %v3647_v60, %v3808_v30  ;;  %v2006_v4 = vadd.f32 %v4105_v63, %v3647_v60 }
 0x27b   :  { %2742 = vmatpush1.msra.mxu1 %v2402_v42  ;;  %v1901_v21 = vadd.f32 %v1893_v19, %v1852_v35  ;;  %v1869_v10 = vpop.permute.xlu1 %1868  ;;  %v4206_v0 = vpop.permute.xlu0 %1917  ;;  %2667 = vmatpush1.msra.mxu0 %v3689_v17  ;;  %v1942_v54 = vmax.f32 %v1934_v50, 0.0  ;;  %v1981_v53 = vadd.f32 %v4217_v62, %v3645_v59  ;;  %v4240_v57 = vadd.f32 %v4096_v38, %v3699_v45  ;;  %v2390_v42 = vld [vmem:[#allocation3 + $0x4b0] sm:$0xff] }
 0x27c   :  { %2743 = vmatprep.subr.mxu1 %v3689_v17  ;;  %2668 = vmatprep.subr.mxu0 %v3689_v17  ;;  %v1837_v30 = vadd.f32 %v4212_v15, %v3699_v45  ;;  %v1842_v37 = vmax.f32 %v1834_v29, 0.0  ;;  %v4247_v35 = vadd.f32 %v4105_v63, %v3699_v45  ;;  %v2030_v19 = vadd.f32 %v4125_v8, %v3647_v60 }
 0x27d   :  { %2744 = vmatpush1.msra.mxu1 %v2398_v58  ;;  %2669 = vmatpush1.msra.mxu0 %v3689_v17  ;;  %v1950_v9 = vadd.f32 %v1942_v54, %v1901_v21  ;;  %v1989_v40 = vmax.f32 %v1981_v53, 0.0  ;;  %v4259_v11 = vadd.f32 %v4125_v8, %v3699_v45  ;;  %v4263_v5 = vadd.f32 %v4149_v13, %v3699_v45 }
 0x27e   :  { %2745 = vmatprep.subr.mxu1 %v3689_v17  ;;  %2670 = vmatprep.subr.mxu0 %v3689_v17  ;;  %v1850_v12 = vadd.f32 %v1842_v37, %v1799_v28  ;;  %v2014_v21 = vmax.f32 %v2006_v4, 0.0  ;;  %v4271_v58 = vadd.f32 %v4149_v13, %v4523_v31  ;;  %v1845_v53 = vmax.f32 %v1837_v30, 0.0 }
 0x27f   :  { %2746 = vmatpush1.msra.mxu1 %v2394_v26  ;;  %v1086_v2 = vpop.permute.xlu1 %1085  ;;  %v1050_v18 = vpop.permute.xlu0 %1049  ;;  %2671 = vmatpush1.msra.mxu0 %v3689_v17  ;;  %v1974_v50 = vadd.f32 %v1966_v55, %v1950_v9  ;;  %v1967_v55 = vmax.f32 %v4192_v27, 0.0  ;;  %v1997_v29 = vadd.f32 %v1989_v40, %v1973_v51  ;;  %v2386_v26 = vld [vmem:[#allocation3 + $0x490] sm:$0xff]  ;;  %v2078_v41 = vadd.f32 %v4217_v62, %v3647_v60 }
 0x280   :  { %2747 = vmatprep.subr.mxu1 %v3689_v17  ;;  %1097 = vst.msk [vmem:[#allocation3 + $0x798] sm:$0xff] %vm643_vm1, %v1086_v2  ;;  %2672 = vmatprep.subr.mxu0 %v3689_v17  ;;  %v2382_v9 = vld [vmem:[#allocation3 + $0x470] sm:$0xff]  ;;  %v4281_v28 = vsel %vm1870_vm5, %v4135_v56, %v1869_v10  ;;  %v4286_v51 = vsel %vm1870_vm5, %v1869_v10, %v4086_v6  ;;  %v2038_v37 = vmax.f32 %v2030_v19, 0.0  ;;  %v4288_v2 = vld [vmem:[#allocation2 + $0x8] sm:$0xff] }
 0x281   :  { %1058 = vst.msk [vmem:[#allocation3 + $0x778] sm:$0xff] %vm600_vm3, %v1050_v18  ;;  %2748 = vmatpush1.msra.mxu1 %v2390_v42  ;;  %v1998_v54 = vadd.f32 %v1990_v24, %v1974_v50  ;;  %2673 = vmatpush1.msra.mxu0 %v3689_v17  ;;  %v1886_v56 = vadd.f32 %v4281_v28, %v3699_v45  ;;  %v2378_v18 = vld [vmem:[#allocation3 + $0x450] sm:$0xff]  ;;  %v2060_v42 = vmax.f32 %v4196_v39, 0.0 }
 0x282   :  { %2749 = vmatprep.subr.mxu1 %v3689_v17  ;;  %2674 = vmatprep.subr.mxu0 %v3689_v17  ;;  %v1883_v17 = vadd.f32 %v4286_v51, %v4523_v31  ;;  %v4300_v6 = vadd.f32 %v4149_v13, %v3645_v59  ;;  %v4304_v10 = vadd.f32 %v4154_v36, %v3699_v45 }
 0x283   :  { %2750 = vmatpush1.msra.mxu1 %v2386_v26  ;;  %v1048_v4 = vpop.permute.xlu1 %1047  ;;  %v1046_v24 = vpop.permute.xlu0 %1045  ;;  %v2022_v30 = vadd.f32 %v2014_v21, %v1998_v54  ;;  %2675 = vmatpush1.msra.mxu0 %v4288_v2  ;;  %v2005_v19 = vadd.f32 %v4286_v51, %v3645_v59  ;;  %v1894_v21 = vmax.f32 %v1886_v56, 0.0  ;;  %v2102_v13 = vadd.f32 %v4286_v51, %v3647_v60  ;;  %v2374_v54 = vld [vmem:[#allocation3 + $0x430] sm:$0xff] }
 0x284   :  { %2751 = vmatprep.subr.mxu1 %v4288_v2  ;;  %1057 = vst.msk [vmem:[#allocation3 + $0x758] sm:$0xff] %vm600_vm3, %v1048_v4  ;;  %1056 = vst.msk [vmem:[#allocation3 + $0x738] sm:$0xff] %vm600_vm3, %v1046_v24  ;;  %2676 = vmatprep.subr.mxu0 %v4288_v2  ;;  %v1891_v40 = vmax.f32 %v1883_v17, 0.0  ;;  %v4316_v26 = vadd.f32 %v4183_v43, %v3699_v45  ;;  %v4324_v24 = vsel %vm1919_vm6, %v4164_v16, %v4206_v0  ;;  %v2370_v16 = vld [vmem:[#allocation3 + $0x410] sm:$0xff] }
 0x285   :  { %2752 = vmatpush1.msra.mxu1 %v2382_v9  ;;  %v2046_v50 = vadd.f32 %v2038_v37, %v2022_v30  ;;  %2677 = vmatpush1.msra.mxu0 %v4288_v2  ;;  %v1853_v9 = vadd.f32 %v1845_v53, %v1802_v32  ;;  %v2013_v4 = vmax.f32 %v2005_v19, 0.0  ;;  %v4329_v17 = vadd.f32 %v4212_v15, %v4523_v31 }
 0x286   :  { %2753 = vmatprep.subr.mxu1 %v4288_v2  ;;  %2678 = vmatprep.subr.mxu0 %v4288_v2  ;;  %v2086_v32 = vmax.f32 %v2078_v41, 0.0  ;;  %v1899_v53 = vadd.f32 %v1891_v40, %v1850_v12  ;;  %v2061_v19 = vmax.f32 %v4204_v1, 0.0  ;;  %v4342_v20 = vsel %vm1919_vm6, %v4206_v0, %v4118_v14  ;;  %v2495_v0 = vld [vmem:[#allocation3 + $0x7f8] sm:$0xff] }
 0x287   :  { %2754 = vmatpush1.msra.mxu1 %v2378_v18  ;;  %v1044_v37 = vpop.permute.xlu1 %1043  ;;  %v1008_v30 = vpop.permute.xlu0 %1007  ;;  %v2070_v52 = vadd.f32 %v2062_v48, %v2046_v50  ;;  %2679 = vmatpush1.msra.mxu0 %v4288_v2  ;;  %v1902_v56 = vadd.f32 %v1894_v21, %v1853_v9  ;;  %v2021_v18 = vadd.f32 %v2013_v4, %v1997_v29  ;;  %v2110_v12 = vmax.f32 %v2102_v13, 0.0 }
 0x288   :  { %2755 = vmatprep.subr.mxu1 %v4288_v2  ;;  %1055 = vst.msk [vmem:[#allocation3 + $0x718] sm:$0xff] %vm600_vm3, %v1044_v37  ;;  %2680 = vmatprep.subr.mxu0 %v4288_v2  ;;  %v1932_v41 = vadd.f32 %v4342_v20, %v4523_v31  ;;  %v1935_v50 = vadd.f32 %v4324_v24, %v3699_v45  ;;  %v2158_v21 = vmax.f32 %v4229_v44, 0.0  ;;  %v2479_v33 = vld [vmem:[#allocation3 + $0x778] sm:$0xff] }
 0x289   :  { %1016 = vst.msk [vmem:[#allocation3 + $0x6f8] sm:$0xff] %vm557_vm2, %v1008_v30  ;;  %2756 = vmatpush1.msra.mxu1 %v2374_v54  ;;  %v2094_v48 = vadd.f32 %v2086_v32, %v2070_v52  ;;  %v2077_v1 = vadd.f32 %v4212_v15, %v3645_v59  ;;  %v2029_v34 = vadd.f32 %v4342_v20, %v3645_v59  ;;  %v1991_v32 = vmax.f32 %v4263_v5, 0.0  ;;  %v2487_v5 = vld [vmem:[#allocation3 + $0x7b8] sm:$0xff] }
 0x28a   :  { %2757 = vmatprep.subr.mxu1 %v4288_v2  ;;  %v2126_v14 = vadd.f32 %v4342_v20, %v3647_v60  ;;  %2681 = vmatpush1.msra.mxu0 %v4288_v2  ;;  %v2174_v13 = vadd.f32 %v4212_v15, %v3647_v60  ;;  %v1940_v9 = vmax.f32 %v1932_v41, 0.0  ;;  %v1943_v4 = vmax.f32 %v1935_v50, 0.0  ;;  %v2491_v15 = vld [vmem:[#allocation3 + $0x7d8] sm:$0xff] }
 0x28b   :  { %2758 = vmatpush1.msra.mxu1 %v2370_v16  ;;  %v1006_v29 = vpop.permute.xlu1 %1005  ;;  %v1004_v40 = vpop.permute.xlu0 %1003  ;;  %v2118_v54 = vadd.f32 %v2110_v12, %v2094_v48  ;;  %2682 = vmatprep.subr.mxu0 %v4288_v2  ;;  %v2004_v37 = vadd.f32 %v4281_v28, %v4523_v31  ;;  %v2101_v30 = vadd.f32 %v4281_v28, %v3645_v59  ;;  %v2037_v44 = vmax.f32 %v2029_v34, 0.0 }
 0x28c   :  { %2759 = vmatprep.subr.mxu1 %v2495_v0  ;;  %1015 = vst.msk [vmem:[#allocation3 + $0x6d8] sm:$0xff] %vm557_vm2, %v1006_v29  ;;  %1014 = vst.msk [vmem:[#allocation3 + $0x6b8] sm:$0xff] %vm557_vm2, %v1004_v40  ;;  %v2134_v52 = vmax.f32 %v2126_v14, 0.0  ;;  %2683 = vmatpush2.msra.mxu0 %v4288_v2  ;;  %v2198_v16 = vadd.f32 %v4281_v28, %v3647_v60  ;;  %v1948_v48 = vadd.f32 %v1940_v9, %v1899_v53  ;;  %v2483_v0 = vld [vmem:[#allocation3 + $0x798] sm:$0xff] }
 0x28d   :  { %2760 = vmatpush2.msra.mxu1 %v4288_v2  ;;  %v1951_v12 = vadd.f32 %v1943_v4, %v1902_v56  ;;  %2684 = vmatprep.subr.mxu0 %v4288_v2  ;;  %v1988_v41 = vmax.f32 %v4329_v17, 0.0  ;;  %v2028_v50 = vadd.f32 %v4324_v24, %v4523_v31  ;;  %v2045_v34 = vadd.f32 %v2037_v44, %v2021_v18 }
 0x28e   :  { %2761 = vmatprep.subr.mxu1 %v2491_v15  ;;  %v2142_v14 = vadd.f32 %v2134_v52, %v2118_v54  ;;  %2685 = vmatpush2.msra.mxu0 %v4288_v2  ;;  %v2085_v28 = vmax.f32 %v2077_v1, 0.0  ;;  %v1972_v53 = vadd.f32 %v1964_v49, %v1948_v48  ;;  %v2125_v17 = vadd.f32 %v4324_v24, %v3645_v59 }
 0x28f   :  { %2762 = vmatpush2.msra.mxu1 %v4288_v2  ;;  %v1002_v29 = vpop.permute.xlu1 %1001  ;;  %v1975_v56 = vadd.f32 %v1967_v55, %v1951_v12  ;;  %2686 = vmatprep.subr.mxu0 %v4288_v2  ;;  %v2182_v18 = vmax.f32 %v2174_v13, 0.0  ;;  %v2069_v40 = vadd.f32 %v2061_v19, %v2045_v34  ;;  %v2222_v54 = vadd.f32 %v4324_v24, %v3647_v60  ;;  %v2475_v60 = vld [vmem:[#allocation3 + $0x758] sm:$0xff] }
 0x290   :  { %2763 = vmatprep.subr.mxu1 %v2487_v5  ;;  %1013 = vst.msk [vmem:[#allocation3 + $0x698] sm:$0xff] %vm557_vm2, %v1002_v29  ;;  %2687 = vmatpush2.msra.mxu0 %v4288_v2  ;;  %v2166_v27 = vadd.f32 %v2158_v21, %v2142_v14  ;;  %v2015_v49 = vmax.f32 %v4304_v10, 0.0  ;;  %v2012_v55 = vmax.f32 %v2004_v37, 0.0  ;;  %v1996_v1 = vadd.f32 %v1988_v41, %v1972_v53  ;;  %v2467_v5 = vld [vmem:[#allocation3 + $0x718] sm:$0xff] }
 0x291   :  { %2764 = vmatpush2.msra.mxu1 %v4288_v2  ;;  %v1999_v9 = vadd.f32 %v1991_v32, %v1975_v56  ;;  %2688 = vmatprep.subr.mxu0 %v4288_v2  ;;  %v2109_v4 = vmax.f32 %v2101_v30, 0.0  ;;  %v2206_v13 = vmax.f32 %v2198_v16, 0.0  ;;  %v2093_v19 = vadd.f32 %v2085_v28, %v2069_v40  ;;  %v2471_v30 = vld [vmem:[#allocation3 + $0x738] sm:$0xff] }
 0x292   :  { %2765 = vmatprep.subr.mxu1 %v2483_v0  ;;  %2689 = vmatpush2.msra.mxu0 %v4288_v2  ;;  %v2190_v24 = vadd.f32 %v2182_v18, %v2166_v27  ;;  %v2039_v44 = vmax.f32 %v4316_v26, 0.0  ;;  %v2020_v21 = vadd.f32 %v2012_v55, %v1996_v1  ;;  %v2036_v10 = vmax.f32 %v2028_v50, 0.0 }
 0x293   :  { %2766 = vmatpush2.msra.mxu1 %v4288_v2  ;;  %v2023_v52 = vadd.f32 %v2015_v49, %v1999_v9  ;;  %2690 = vmatprep.subr.mxu0 %v4288_v2  ;;  %v2117_v37 = vadd.f32 %v2109_v4, %v2093_v19  ;;  %v2133_v15 = vmax.f32 %v2125_v17, 0.0  ;;  %v2230_v16 = vmax.f32 %v2222_v54, 0.0  ;;  %v2455_v49 = vld [vmem:[#allocation3 + $0x6b8] sm:$0xff]  ;;  %v4526_v4 = vld [vmem:[#allocation23_spill] sm:$0xff] }
 0x294   :  { %2767 = vmatprep.subr.mxu1 %v2479_v33  ;;  %2691 = vmatpush2.msra.mxu0 %v4288_v2  ;;  %v2214_v32 = vadd.f32 %v2206_v13, %v2190_v24  ;;  %v2100_v48 = vadd.f32 %v4154_v36, %v4523_v31  ;;  %v2044_v12 = vadd.f32 %v2036_v10, %v2020_v21  ;;  %v2157_v41 = vmax.f32 %v4221_v3, 0.0 }
 0x295   :  { %2768 = vmatpush2.msra.mxu1 %v4288_v2  ;;  %v2047_v26 = vadd.f32 %v2039_v44, %v2023_v52  ;;  %2692 = vmatprep.subr.mxu0 %v4288_v2  ;;  %v2087_v50 = vmax.f32 %v4240_v57, 0.0  ;;  %v2197_v34 = vadd.f32 %v4154_v36, %v3645_v59  ;;  %v2141_v14 = vadd.f32 %v2133_v15, %v2117_v37 }
 0x296   :  { %2769 = vmatprep.subr.mxu1 %v2475_v60  ;;  %2693 = vmatpush2.msra.mxu0 %v4288_v2  ;;  %v4407_v0 = vadd.f32 %v2230_v16, %v2214_v32  ;;  %v2084_v29 = vmax.f32 %v4271_v58, 0.0  ;;  %v2124_v28 = vadd.f32 %v4183_v43, %v4523_v31  ;;  %v2068_v3 = vadd.f32 %v2060_v42, %v2044_v12  ;;  %v2463_v58 = vld [vmem:[#allocation3 + $0x6f8] sm:$0xff] }
 0x297   :  { %2770 = vmatpush2.msra.mxu1 %v4288_v2  ;;  %2694 = vmatprep.subr.mxu0 %v4288_v2  ;;  %v2071_v36 = vadd.f32 %v2063_v7, %v2047_v26  ;;  %v2181_v57 = vmax.f32 %v4300_v6, 0.0  ;;  %v2221_v53 = vadd.f32 %v4183_v43, %v3645_v59  ;;  %v2165_v56 = vadd.f32 %v2157_v41, %v2141_v14  ;;  %v2459_v6 = vld [vmem:[#allocation3 + $0x6d8] sm:$0xff] }
 0x298   :  { %2771 = vmatprep.subr.mxu1 %v2471_v30  ;;  %2695 = vmatpush2.msra.mxu0 %v4288_v2  ;;  %v2148_v39 = vadd.f32 %v4523_v31, %v3784_v25  ;;  %v2111_v42 = vmax.f32 %v4247_v35, 0.0  ;;  %v2108_v17 = vmax.f32 %v2100_v48, 0.0  ;;  %v2092_v18 = vadd.f32 %v2084_v29, %v2068_v3  ;;  %v2451_v44 = vld [vmem:[#allocation3 + $0x698] sm:$0xff] }
 0x299   :  { %2772 = vmatpush2.msra.mxu1 %v4288_v2  ;;  %2696 = vmatprep.subr.mxu0 %v4288_v2  ;;  %v2095_v23 = vadd.f32 %v2087_v50, %v2071_v36  ;;  %v2172_v59 = vadd.f32 %v4096_v38, %v4523_v31  ;;  %v2135_v7 = vmax.f32 %v4259_v11, 0.0  ;;  %v2205_v43 = vmax.f32 %v2197_v34, 0.0  ;;  %v2439_v26 = vld [vmem:[#allocation3 + $0x638] sm:$0xff]  ;;  %v1746_v50 = vpop.f32.mrf.mxu1 }
 0x29a   :  { %2773 = vmatprep.subr.mxu1 %v2467_v5  ;;  %2697 = vmatpush2.msra.mxu0 %v4288_v2  ;;  %v2189_v25 = vadd.f32 %v2181_v57, %v2165_v56  ;;  %v2132_v40 = vmax.f32 %v2124_v28, 0.0  ;;  %v2175_v35 = vadd.f32 %v4217_v62, %v3699_v45  ;;  %v2116_v54 = vadd.f32 %v2108_v17, %v2092_v18  ;;  %v2435_v41 = vld [vmem:[#allocation3 + $0x618] sm:$0xff] }
 0x29b   :  { %2774 = vmatpush2.msra.mxu1 %v4288_v2  ;;  %2698 = vmatprep.subr.mxu0 %v4288_v2  ;;  %v2119_v33 = vadd.f32 %v2111_v42, %v2095_v23  ;;  %v2196_v38 = vadd.f32 %v4105_v63, %v4523_v31  ;;  %v2229_v27 = vmax.f32 %v2221_v53, 0.0  ;;  %v2156_v55 = vmax.f32 %v2148_v39, 0.0  ;;  %v1748_v14 = vpop.f32.mrf.mxu1 }
 0x29c   :  { %2775 = vmatprep.subr.mxu1 %v2463_v58  ;;  %2699 = vmatpush2.msra.mxu0 %v4288_v2  ;;  %v2213_v11 = vadd.f32 %v2205_v43, %v2189_v25  ;;  %v2199_v1 = vadd.f32 %v4286_v51, %v3699_v45  ;;  %v2140_v62 = vadd.f32 %v2132_v40, %v2116_v54  ;;  %v2159_v13 = vmax.f32 %v4526_v4, 0.0 }
 0x29d   :  { %2776 = vmatpush2.msra.mxu1 %v4288_v2  ;;  %2700 = vmatprep.subr.mxu0 %v4288_v2  ;;  %v2143_v9 = vadd.f32 %v2135_v7, %v2119_v33  ;;  %v2180_v19 = vmax.f32 %v2172_v59, 0.0  ;;  %v2220_v63 = vadd.f32 %v4125_v8, %v4523_v31  ;;  %v2183_v24 = vmax.f32 %v2175_v35, 0.0  ;;  %v2447_v31 = vld [vmem:[#allocation3 + $0x678] sm:$0xff] }
 0x29e   :  { %2777 = vmatprep.subr.mxu1 %v2459_v6  ;;  %2701 = vmatpush2.msra.mxu0 %v4288_v2  ;;  %v2237_v60 = vadd.f32 %v2229_v27, %v2213_v11  ;;  %v2223_v51 = vadd.f32 %v4342_v20, %v3699_v45  ;;  %v2164_v21 = vadd.f32 %v2156_v55, %v2140_v62  ;;  %v2204_v10 = vmax.f32 %v2196_v38, 0.0  ;;  %v2443_v45 = vld [vmem:[#allocation3 + $0x658] sm:$0xff] }
 0x29f   :  { %2778 = vmatpush2.msra.mxu1 %v4288_v2  ;;  %2702 = vmatprep.subr.mxu0 %v4288_v2  ;;  %v2167_v52 = vadd.f32 %v2159_v13, %v2143_v9  ;;  %v2207_v8 = vmax.f32 %v2199_v1, 0.0  ;;  %v2228_v30 = vmax.f32 %v2220_v63, 0.0 }
 0x2a0   :  { %2779 = vmatprep.subr.mxu1 %v2455_v49  ;;  %2566 = vmatprep.mubr.f32.mxu0 %v2237_v60  ;;  %v2188_v37 = vadd.f32 %v2180_v19, %v2164_v21  ;;  %v2231_v16 = vmax.f32 %v2223_v51, 0.0 }
 0x2a1   :  { %2703 = vmatpush2.msra.mxu0 %v4288_v2  ;;  %2780 = vmatpush2.msra.mxu1 %v4288_v2  ;;  %v2191_v15 = vadd.f32 %v2183_v24, %v2167_v52 }
 0x2a2   :  { %2704 = vmatprep.subr.mxu0 %v4288_v2  ;;  %2781 = vmatprep.subr.mxu1 %v2451_v44  ;;  %v2212_v20 = vadd.f32 %v2204_v10, %v2188_v37 }
 0x2a3   :  { %2705 = vmatpush2.msra.mxu0 %v4288_v2  ;;  %2782 = vmatpush2.msra.mxu1 %v4288_v2  ;;  %v2215_v32 = vadd.f32 %v2207_v8, %v2191_v15 }
 0x2a4   :  { %2706 = vmatprep.subr.mxu0 %v4288_v2  ;;  %2783 = vmatprep.subr.mxu1 %v2447_v31  ;;  %v2236_v48 = vadd.f32 %v2228_v30, %v2212_v20 }
 0x2a5   :  { %2707 = vmatpush2.msra.mxu0 %v4288_v2  ;;  %2784 = vmatpush2.msra.mxu1 %v4288_v2  ;;  %v2239_v12 = vadd.f32 %v2231_v16, %v2215_v32 }
 0x2a6   :  { %2708 = vmatprep.subr.mxu0 %v4288_v2  ;;  %2785 = vmatprep.subr.mxu1 %v2443_v45 }
 0x2a7   :  { %2709 = vmatpush2.msra.mxu0 %v4288_v2  ;;  %2643 = vmatprep.mubr.f32.mxu1 %v2239_v12 }
 0x2a8   :  { %2567 = vmatmul.mubr.f32.gmra.mxu0 %v2236_v48  ;;  %2710 = vmatprep.subr.mxu0 %v4288_v2 }
 0x2a9   :  { %2786 = vmatpush2.msra.mxu1 %v4288_v2  ;;  %2711 = vmatpush2.msra.mxu0 %v4288_v2 }
 0x2aa   :  { %2644 = vmatmul.mubr.f32.gmra.mxu1 %v4407_v0  ;;  %2714 = vmatprep.mubr.f32.mxu0 %v4079_v46  ;;  %v1669_v46 = vpop.f32.mrf.mxu0 }
 0x2ab   :  { %2787 = vmatprep.subr.mxu1 %v2439_v26  ;;  %2712 = vmatprep.subr.mxu0 %v4288_v2 }
 0x2ac   :  { %2788 = vmatpush2.msra.mxu1 %v4288_v2  ;;  %2791 = vmatprep.mubr.f32.mxu1 %v4091_v22  ;;  %v1671_v34 = vpop.f32.mrf.mxu0  ;;  %v1752_v22 = vpop.f32.mrf.mxu1 }
 0x2ad   :  { %2713 = vmatpush2.msra.mxu0 %v4288_v2  ;;  %2789 = vmatprep.subr.mxu1 %v2435_v41 }
 0x2ae   :  { %2715 = vmatmul.mubr.f32.vlgmr.msra.gmra.mxu0 %v4089_v47  ;;  %2790 = vmatpush2.msra.mxu1 %v4288_v2  ;;  %v1675_v5 = vpop.f32.mrf.mxu0  ;;  %v1754_v28 = vpop.f32.mrf.mxu1  ;;  %v2812_v47 = vld [vmem:[%s4493_s6] sm:$0xf]  ;;  %s3032_s6 = smov [#allocation13]  }
 0x2af   :  { %2720 = vmatprep.mubr.f32.mxu0 %v2237_v60  ;;  %2792 = vmatmul.mubr.f32.vlgmr.msra.gmra.mxu1 %v4052_v61  ;;  %v4527_v61 = vld [vmem:[#allocation18_spill] sm:$0xff]  ;;  %s2863_s29 = sshll.u32 %s3032_s6, 4  ;;  %s2864_s29 = int_to_ptr.vmem [resolvable:$true] %s2863_s29 }
 0x2b0   :  { %2797 = vmatprep.mubr.f32.mxu1 %v2239_v12  ;;  %v1677_v29 = vpop.f32.mrf.mxu0  ;;  %v4528_v57 = vsub.s32 0, %v4527_v61  ;;  %v4529_v42 = vsub.s32 1, %v4527_v61  ;;  %v4530_v13 = vsub.s32 2, %v4527_v61  ;;  %v4531_v21 = vsub.s32 3, %v4527_v61  ;;  %s2993_s30 = scalar_lea.vmem %s2864_s29, 1024  ;;  %p2998_p12 = scmp.lt.s32.totalorder %s2864_s29, %s2864_s29 }
 0x2b1   :  { %p2994_p11 = scmp.ne.s32.totalorder %s2864_s29, %s2993_s30  ;;  %p2999_p13 = scmp.lt.s32.totalorder %s2993_s30, %s2993_s30 }
 0x2b2   :  { %2721 = vmatmul.mubr.f32.gmra.mxu0 %v2236_v48  ;;  %v2817_v53 = vrot.slane %v2812_v47, %v4528_v57  ;;  %v2821_v17 = vrot.slane %v2812_v47, %v4529_v42  ;;  %v2825_v19 = vrot.slane %v2812_v47, %v4530_v13  ;;  %v2829_v52 = vrot.slane %v2812_v47, %v4531_v21 }
 0x2b3   :  { %2798 = vmatmul.mubr.f32.gmra.mxu1 %v4407_v0  ;;  %p3000_p0 = por %p2999_p13, %p2998_p12 }
 0x2b5   :  { %p3001_p1 = pnand %p3000_p0, %p2994_p11 }
 0x32a   :  { %v2562_v2 = vpop.f32.mrf.mxu0 }
 0x32c   :  { %v2639_v3 = vpop.f32.mrf.mxu1  ;;  %v2564_v58 = vpop.f32.mrf.mxu0 }
 0x32d   :  { %v2640_v36 = vadd.f32 %v2639_v3, %v2562_v2 }
 0x32e   :  { %v2641_v0 = vpop.f32.mrf.mxu1 }
 0x32f   :  { %v2804_v56 = vadd.f32 %v2640_v36, %v1669_v46  ;;  %v2642_v39 = vadd.f32 %v2641_v0, %v2564_v58 }
 0x331   :  { %v2834_v18 = vadd.f32 %v2817_v53, %v2804_v56  ;;  %v2805_v23 = vadd.f32 %v2642_v39, %v1671_v34 }
 0x333   :  { %v2842_v59 = vmax.f32 %v2834_v18, 0.0  ;;  %v2835_v7 = vadd.f32 %v2821_v17, %v2805_v23 }
 0x335   :  { %2850 = vst [vmem:[#allocation13] sm:$0xff] %v2842_v59  ;;  %v2843_v43 = vmax.f32 %v2835_v7, 0.0 }
 0x337   :  { %2851 = vst [vmem:[#allocation13 + $0x8] sm:$0xff] %v2843_v43 }
 0x368   :  { %v2568_v6 = vpop.f32.mrf.mxu0 }
 0x36a   :  { %v2645_v25 = vpop.f32.mrf.mxu1  ;;  %v2570_v40 = vpop.f32.mrf.mxu0 }
 0x36b   :  { %v2646_v35 = vadd.f32 %v2645_v25, %v2568_v6 }
 0x36c   :  { %v2647_v54 = vpop.f32.mrf.mxu1 }
 0x36d   :  { %v2808_v33 = vadd.f32 %v2646_v35, %v1675_v5  ;;  %v2648_v38 = vadd.f32 %v2647_v54, %v2570_v40 }
 0x36e   :  { %v2716_v11 = vpop.f32.mrf.mxu0 }
 0x36f   :  { %v2838_v27 = vadd.f32 %v2817_v53, %v2808_v33  ;;  %v2809_v49 = vadd.f32 %v2648_v38, %v1677_v29  ;;  %v2793_v55 = vpop.f32.mrf.mxu1 }
 0x370   :  { %v2718_v1 = vpop.f32.mrf.mxu0  ;;  %v2794_v4 = vadd.f32 %v2793_v55, %v2716_v11 }
 0x371   :  { %v2846_v62 = vmax.f32 %v2838_v27, 0.0  ;;  %v2839_v9 = vadd.f32 %v2821_v17, %v2809_v49  ;;  %v2795_v63 = vpop.f32.mrf.mxu1 }
 0x372   :  { %v2722_v60 = vpop.f32.mrf.mxu0  ;;  %v2806_v51 = vadd.f32 %v2794_v4, %v1746_v50  ;;  %v2796_v44 = vadd.f32 %v2795_v63, %v2718_v1 }
 0x373   :  { %2854 = vst [vmem:[#allocation13 + $0x20] sm:$0xff] %v2846_v62  ;;  %v2847_v24 = vmax.f32 %v2839_v9, 0.0  ;;  %v2799_v10 = vpop.f32.mrf.mxu1 }
 0x374   :  { %v2724_v8 = vpop.f32.mrf.mxu0  ;;  %v2836_v31 = vadd.f32 %v2825_v19, %v2806_v51  ;;  %v2807_v37 = vadd.f32 %v2796_v44, %v1748_v14  ;;  %v2800_v15 = vadd.f32 %v2799_v10, %v2722_v60 }
 0x375   :  { %2855 = vst [vmem:[#allocation13 + $0x28] sm:$0xff] %v2847_v24  ;;  %v2801_v45 = vpop.f32.mrf.mxu1 }
 0x376   :  { %v2844_v20 = vmax.f32 %v2836_v31, 0.0  ;;  %v2837_v30 = vadd.f32 %v2829_v52, %v2807_v37  ;;  %v2810_v32 = vadd.f32 %v2800_v15, %v1752_v22  ;;  %v2802_v16 = vadd.f32 %v2801_v45, %v2724_v8 }
 0x378   :  { %2852 = vst [vmem:[#allocation13 + $0x10] sm:$0xff] %v2844_v20  ;;  %v2845_v48 = vmax.f32 %v2837_v30, 0.0  ;;  %v2840_v12 = vadd.f32 %v2825_v19, %v2810_v32  ;;  %v2811_v26 = vadd.f32 %v2802_v16, %v1754_v28 }
 0x37a   :  { %2853 = vst [vmem:[#allocation13 + $0x18] sm:$0xff] %v2845_v48  ;;  %v2848_v41 = vmax.f32 %v2840_v12, 0.0  ;;  %v2841_v46 = vadd.f32 %v2829_v52, %v2811_v26 }
 0x37c   :  { %2856 = vst [vmem:[#allocation13 + $0x30] sm:$0xff] %v2848_v41  ;;  %v2849_v50 = vmax.f32 %v2841_v46, 0.0 }
 0x37e   :  { %2857 = vst [vmem:[#allocation13 + $0x38] sm:$0xff] %v2849_v50 }
 0x37f   :  { %3004 = shalt.err (!%p3001_p1)
}
 0x380   :  { %s3033_s8 = smov 512  }
 0x381   :  { %2869 = dma.vmem_to_hbm [thread:$0]  %s2864_s29, 1024, %s4494_s7, [#allocation6], %s3033_s8, %s3033_s8, %s3030_s4  }
 0x382   :  { %3019 = dma.done.wait [#allocation6], 1024  }
 0x383   :  { %3020 = vsyncadd [#allocation6], 4294966272 }
 0x384   :  { %2873 = vsyncpa [#allocation5], 1 }
 0x385   :  { %2874 = vsyncpa [#allocation8], 1 }
 0x386   :  { %2875 = vsyncpa [#allocation11], 1 }
 0x387   :  { %2876 = vsyncpa [#allocation6], 1 }

</bundles_post_ra>
